<compile_context>
chip_gen: v5e
topology: v5e:2x2
jax: 0.10.0
libtpu: 0.0.40
codegen_flags: <defaults>
</compile_context>

<pallas_src>
import functools

import jax
import jax.numpy as jnp
import numpy as np
from jax import lax
from jax.experimental import pallas as pl
from jax.experimental.pallas import tpu as pltpu


def _convlstm_kernel(x_ref, h_ref, c_ref, w_ref, b_ref, h_out_ref, c_out_ref,
                     xh_scratch, *, H, W, K, hidden_dim, input_dim, cpad):
    """One batch element per grid step.

    x_ref     : (1, H, W, input_dim)         current input
    h_ref     : (1, H, W, hidden_dim)        previous hidden state
    c_ref     : (1, H*W, hidden_dim)         previous cell state
    w_ref     : (K*K, cpad, 4*hidden_dim)    per-tap conv weight blocks
                                             (input-channel order = [h, x, 0])
    b_ref     : (1, 4*hidden_dim)            conv bias
    h_out_ref : (1, H*W, hidden_dim)         new hidden state
    c_out_ref : (1, H*W, hidden_dim)         new cell state
    xh_scratch: (H+2p, W+2p, cpad) f32 VMEM  zero-haloed combined image
    """
    pad = K // 2
    f32 = jnp.float32
    four_h = 4 * hidden_dim

    # ---- zero-haloed, channel-padded combined image in VMEM -----------------
    # Zeroed every step (only ~40 full-lane vreg stores) so the kernel stays
    # correct under "parallel" megacore scheduling; interior written once.
    xh_scratch[...] = jnp.zeros_like(xh_scratch)
    # h first (lane offset 0, no cross-lane shift), then the 8x-smaller x.
    xh_scratch[pad:pad + H, pad:pad + W, 0:hidden_dim] = h_ref[0].astype(f32)
    xh_scratch[pad:pad + H, pad:pad + W,
               hidden_dim:hidden_dim + input_dim] = x_ref[0].astype(f32)

    # ---- conv = K*K accumulated tap matmuls (no im2col patch buffer) --------
    acc = jnp.zeros((H * W, four_h), f32)
    for kh in range(K):
        for kw in range(K):
            win = xh_scratch[kh:kh + H, kw:kw + W, :]          # (H, W, cpad)
            acc = acc + jnp.dot(win.reshape(H * W, cpad),
                                w_ref[kh * K + kw],
                                preferred_element_type=f32)
    acc = acc + b_ref[...]                                      # (H*W, 4h)

    # ---- gate activations: one full-width tanh pass --------------------------
    # lanes [0, 3h) -> sigmoid (i, f, o); lanes [3h, 4h) -> tanh (g),
    # using sigmoid(z) = 0.5 + 0.5 * tanh(z / 2).
    lane = lax.broadcasted_iota(jnp.int32, acc.shape, 1)
    is_sig = lane < 3 * hidden_dim
    t = jnp.tanh(jnp.where(is_sig, 0.5 * acc, acc))
    act = jnp.where(is_sig, 0.5 * t + 0.5, t)

    i_g = act[:, 0 * hidden_dim:1 * hidden_dim]
    f_g = act[:, 1 * hidden_dim:2 * hidden_dim]
    o_g = act[:, 2 * hidden_dim:3 * hidden_dim]
    g_g = act[:, 3 * hidden_dim:4 * hidden_dim]

    # ---- LSTM state update (stays (H*W, hidden); no in-kernel relayouts) ----
    c_prev = c_ref[0].astype(f32)
    c_new = f_g * c_prev + i_g * g_g
    h_new = o_g * jnp.tanh(c_new)

    c_out_ref[0] = c_new.astype(c_out_ref.dtype)
    h_out_ref[0] = h_new.astype(h_out_ref.dtype)


@functools.partial(jax.jit, static_argnames=("kernel_size",))
def conv_lstm_cell(x, h_prev, c_prev, w, b, *, kernel_size):
    """NHWC ConvLSTM cell forward.

    x      : (B, H, W, input_dim)
    h_prev : (B, H, W, hidden_dim)
    c_prev : (B, H, W, hidden_dim)
    w      : (K, K, input_dim + hidden_dim, 4*hidden_dim)   (HWIO)
    b      : (4*hidden_dim,)
    returns (h, c), each (B, H, W, hidden_dim)
    """
    B, H, W, input_dim = x.shape
    hidden_dim = h_prev.shape[-1]
    K = kernel_size
    pad = K // 2
    # NOTE: pad = K // 2 only matches the reference 'SAME' padding for odd K
    # (same restriction as the PyTorch module's padding=kernel_size//2).
    cin = input_dim + hidden_dim
    cpad = ((cin + 127) // 128) * 128            # lane-align the channel axis
    four_h = 4 * hidden_dim

    # One-time weight prep (cheap, fused under jit):
    #  * permute input channels to [h, x] so h lands at lane offset 0,
    #  * zero-pad channels to cpad (padding rows are mathematically inert),
    #  * split into one (cpad, 4*hidden) block per conv tap.
    w_perm = jnp.concatenate([w[:, :, input_dim:, :], w[:, :, :input_dim, :]],
                             axis=2)
    w_pad = jnp.pad(w_perm, ((0, 0), (0, 0), (0, cpad - cin), (0, 0)))
    w3d = w_pad.reshape(K * K, cpad, four_h)
    b2d = b.reshape(1, four_h)

    # (B, H*W, hidden) views: identical contiguous layout, free reshapes.
    c_prev2d = c_prev.reshape(B, H * W, hidden_dim)
    out_sds = jax.ShapeDtypeStruct((B, H * W, hidden_dim), x.dtype)

    kernel = functools.partial(_convlstm_kernel, H=H, W=W, K=K,
                               hidden_dim=hidden_dim, input_dim=input_dim,
                               cpad=cpad)

    itemsize = jnp.dtype(x.dtype).itemsize
    cost = pl.CostEstimate(
        flops=2 * B * H * W * K * K * cpad * four_h,
        transcendentals=B * H * W * (four_h + hidden_dim),
        bytes_accessed=itemsize * (x.size + h_prev.size + c_prev.size
                                   + 2 * B * H * W * hidden_dim)
        + 4 * (K * K * cpad * four_h + four_h),
    )

    h2d, c2d = pl.pallas_call(
        kernel,
        out_shape=(out_sds, out_sds),
        grid_spec=pltpu.PrefetchScalarGridSpec(
            num_scalar_prefetch=0,
            grid=(B,),
            in_specs=[
                pl.BlockSpec((1, H, W, input_dim), lambda bi: (bi, 0, 0, 0)),
                pl.BlockSpec((1, H, W, hidden_dim), lambda bi: (bi, 0, 0, 0)),
                pl.BlockSpec((1, H * W, hidden_dim), lambda bi: (bi, 0, 0)),
                pl.BlockSpec((K * K, cpad, four_h), lambda bi: (0, 0, 0)),
                pl.BlockSpec((1, four_h), lambda bi: (0, 0)),
            ],
            out_specs=[
                pl.BlockSpec((1, H * W, hidden_dim), lambda bi: (bi, 0, 0)),
                pl.BlockSpec((1, H * W, hidden_dim), lambda bi: (bi, 0, 0)),
            ],
            scratch_shapes=[
                pltpu.VMEM((H + 2 * pad, W + 2 * pad, cpad), jnp.float32),
            ],
        ),
        compiler_params=pltpu.CompilerParams(
            dimension_semantics=("parallel",)),
        cost_estimate=cost,
    )(x, h_prev, c_prev2d, w3d, b2d)

    h_new = h2d.reshape(B, H, W, hidden_dim)
    c_new = c2d.reshape(B, H, W, hidden_dim)
    return h_new, c_new


def _reference(x, h_prev, c_prev, w, b):
    """Pure-JAX reference (mirrors the PyTorch forward, NHWC)."""
    combined = jnp.concatenate([x, h_prev], axis=-1)
    conv_out = lax.conv_general_dilated(
        combined, w, window_strides=(1, 1), padding="SAME",
        dimension_numbers=("NHWC", "HWIO", "NHWC"),
        precision=lax.Precision.HIGHEST) + b
    cc_i, cc_f, cc_o, cc_g = jnp.split(conv_out, 4, axis=-1)
    i = jax.nn.sigmoid(cc_i)
    f = jax.nn.sigmoid(cc_f)
    o = jax.nn.sigmoid(cc_o)
    g = jnp.tanh(cc_g)
    c = f * c_prev + i * g
    h = o * jnp.tanh(c)
    return h, c


if __name__ == "__main__":
    # Module hyper-params (mirrors ConvLSTMCell(input_dim, hidden_dim, kernel_size)).
    input_dim, hidden_dim, kernel_size = 4, 32, 3
    B, H, W = 2, 16, 16

    key = jax.random.PRNGKey(0)
    k_x, k_h, k_c, k_w, k_b = jax.random.split(key, 5)

    x = jax.random.normal(k_x, (B, H, W, input_dim), dtype=jnp.float32)
    h_prev = jax.random.normal(k_h, (B, H, W, hidden_dim), dtype=jnp.float32)
    c_prev = jax.random.normal(k_c, (B, H, W, hidden_dim), dtype=jnp.float32)

    cin = input_dim + hidden_dim
    # Deterministic synthetic init for conv weight/bias (HWIO layout).
    fan_in = cin * kernel_size * kernel_size
    bound = 1.0 / np.sqrt(fan_in)
    w = jax.random.uniform(k_w, (kernel_size, kernel_size, cin, 4 * hidden_dim),
                           minval=-bound, maxval=bound, dtype=jnp.float32)
    b = jax.random.uniform(k_b, (4 * hidden_dim,),
                           minval=-bound, maxval=bound, dtype=jnp.float32)

    h_out, c_out = conv_lstm_cell(x, h_prev, c_prev, w, b,
                                  kernel_size=kernel_size)
    jax.block_until_ready((h_out, c_out))

    h_ref, c_ref = _reference(x, h_prev, c_prev, w, b)
    np.testing.assert_allclose(np.asarray(h_out), np.asarray(h_ref),
                               rtol=1e-4, atol=1e-4)
    np.testing.assert_allclose(np.asarray(c_out), np.asarray(c_ref),
                               rtol=1e-4, atol=1e-4)

    print("KERNEL_OK")
</pallas_src>

<mosaic_0001>
module attributes {stable_mosaic.version = 11 : i64} {
  func.func @_convlstm_kernel(%arg0: i32, %arg1: memref<1x16x16x4xf32, #tpu.memory_space<vmem>>, %arg2: memref<1x16x16x32xf32, #tpu.memory_space<vmem>>, %arg3: memref<1x256x32xf32, #tpu.memory_space<vmem>>, %arg4: memref<9x128x128xf32, #tpu.memory_space<vmem>>, %arg5: memref<1x128xf32, #tpu.memory_space<vmem>>, %arg6: memref<1x256x32xf32, #tpu.memory_space<vmem>>, %arg7: memref<1x256x32xf32, #tpu.memory_space<vmem>>, %arg8: memref<18x18x128xf32, #tpu.memory_space<vmem>>) attributes {dimension_semantics = [#tpu.dimension_semantics<parallel>], iteration_bounds = array<i64: 2>, scalar_prefetch = 0 : i64, scratch_operands = 1 : i64, tpu.core_type = #tpu.core_type<tc>, window_params = [{transform_indices = @transform_0, window_bounds = array<i64: 1, 16, 16, 4>}, {transform_indices = @transform_1, window_bounds = array<i64: 1, 16, 16, 32>}, {transform_indices = @transform_2, window_bounds = array<i64: 1, 256, 32>}, {pipeline_mode = #tpu.pipeline_mode<synchronous>, transform_indices = @transform_3, window_bounds = array<i64: 9, 128, 128>}, {pipeline_mode = #tpu.pipeline_mode<synchronous>, transform_indices = @transform_4, window_bounds = array<i64: 1, 128>}, {transform_indices = @transform_5, window_bounds = array<i64: 1, 256, 32>}, {transform_indices = @transform_6, window_bounds = array<i64: 1, 256, 32>}]} {
    %cst = arith.constant 0.000000e+00 : f32
    %0 = vector.broadcast %cst : f32 to vector<18x18x128xf32>
    %c0 = arith.constant 0 : index
    %c0_0 = arith.constant 0 : index
    %c0_1 = arith.constant 0 : index
    %1 = vector.load %arg8[%c0, %c0_0, %c0_1] : memref<18x18x128xf32, #tpu.memory_space<vmem>>, vector<18x18x128xf32>
    tpu.vector_store %arg8[%c0, %c0_0, %c0_1], %0 {strides = array<i32>} : memref<18x18x128xf32, #tpu.memory_space<vmem>>, vector<18x18x128xf32>,
    %c0_2 = arith.constant 0 : index
    %c0_3 = arith.constant 0 : index
    %c0_4 = arith.constant 0 : index
    %c0_5 = arith.constant 0 : index
    %2 = vector.load %arg2[%c0_2, %c0_3, %c0_4, %c0_5] : memref<1x16x16x32xf32, #tpu.memory_space<vmem>>, vector<1x16x16x32xf32>
    %3 = vector.shape_cast %2 : vector<1x16x16x32xf32> to vector<16x16x32xf32>
    %c1 = arith.constant 1 : index
    %c1_6 = arith.constant 1 : index
    %c0_7 = arith.constant 0 : index
    %4 = vector.load %arg8[%c1, %c1_6, %c0_7] : memref<18x18x128xf32, #tpu.memory_space<vmem>>, vector<16x16x32xf32>
    tpu.vector_store %arg8[%c1, %c1_6, %c0_7], %3 {strides = array<i32>} : memref<18x18x128xf32, #tpu.memory_space<vmem>>, vector<16x16x32xf32>,
    %c0_8 = arith.constant 0 : index
    %c0_9 = arith.constant 0 : index
    %c0_10 = arith.constant 0 : index
    %c0_11 = arith.constant 0 : index
    %5 = vector.load %arg1[%c0_8, %c0_9, %c0_10, %c0_11] : memref<1x16x16x4xf32, #tpu.memory_space<vmem>>, vector<1x16x16x4xf32>
    %6 = vector.shape_cast %5 : vector<1x16x16x4xf32> to vector<16x16x4xf32>
    %c1_12 = arith.constant 1 : index
    %c1_13 = arith.constant 1 : index
    %c32 = arith.constant 32 : index
    %7 = vector.load %arg8[%c1_12, %c1_13, %c32] : memref<18x18x128xf32, #tpu.memory_space<vmem>>, vector<16x16x4xf32>
    tpu.vector_store %arg8[%c1_12, %c1_13, %c32], %6 {strides = array<i32>} : memref<18x18x128xf32, #tpu.memory_space<vmem>>, vector<16x16x4xf32>,
    %cst_14 = arith.constant 0.000000e+00 : f32
    %8 = vector.broadcast %cst_14 : f32 to vector<256x128xf32>
    %c0_15 = arith.constant 0 : index
    %c0_16 = arith.constant 0 : index
    %c0_17 = arith.constant 0 : index
    %9 = vector.load %arg8[%c0_15, %c0_16, %c0_17] : memref<18x18x128xf32, #tpu.memory_space<vmem>>, vector<16x16x128xf32>
    %10 = vector.shape_cast %9 : vector<16x16x128xf32> to vector<256x128xf32>
    %c0_18 = arith.constant 0 : index
    %c0_19 = arith.constant 0 : index
    %c0_20 = arith.constant 0 : index
    %11 = vector.load %arg4[%c0_18, %c0_19, %c0_20] : memref<9x128x128xf32, #tpu.memory_space<vmem>>, vector<1x128x128xf32>
    %12 = vector.shape_cast %11 : vector<1x128x128xf32> to vector<128x128xf32>
    %cst_21 = arith.constant dense<0.000000e+00> : vector<256x128xf32>
    %13 = tpu.matmul %10, %12, %cst_21 {dimension_numbers = #tpu.dot_dimension_numbers<[1], [0], [0], [1], [0, 0, 1, 1], [], []>} : vector<256x128xf32>, vector<128x128xf32>, vector<256x128xf32> -> vector<256x128xf32>
    %14 = arith.addf %8, %13 : vector<256x128xf32>
    %c0_22 = arith.constant 0 : index
    %c1_23 = arith.constant 1 : index
    %c0_24 = arith.constant 0 : index
    %15 = vector.load %arg8[%c0_22, %c1_23, %c0_24] : memref<18x18x128xf32, #tpu.memory_space<vmem>>, vector<16x16x128xf32>
    %16 = vector.shape_cast %15 : vector<16x16x128xf32> to vector<256x128xf32>
    %c1_25 = arith.constant 1 : index
    %c0_26 = arith.constant 0 : index
    %c0_27 = arith.constant 0 : index
    %17 = vector.load %arg4[%c1_25, %c0_26, %c0_27] : memref<9x128x128xf32, #tpu.memory_space<vmem>>, vector<1x128x128xf32>
    %18 = vector.shape_cast %17 : vector<1x128x128xf32> to vector<128x128xf32>
    %cst_28 = arith.constant dense<0.000000e+00> : vector<256x128xf32>
    %19 = tpu.matmul %16, %18, %cst_28 {dimension_numbers = #tpu.dot_dimension_numbers<[1], [0], [0], [1], [0, 0, 1, 1], [], []>} : vector<256x128xf32>, vector<128x128xf32>, vector<256x128xf32> -> vector<256x128xf32>
    %20 = arith.addf %14, %19 : vector<256x128xf32>
    %c0_29 = arith.constant 0 : index
    %c2 = arith.constant 2 : index
    %c0_30 = arith.constant 0 : index
    %21 = vector.load %arg8[%c0_29, %c2, %c0_30] : memref<18x18x128xf32, #tpu.memory_space<vmem>>, vector<16x16x128xf32>
    %22 = vector.shape_cast %21 : vector<16x16x128xf32> to vector<256x128xf32>
    %c2_31 = arith.constant 2 : index
    %c0_32 = arith.constant 0 : index
    %c0_33 = arith.constant 0 : index
    %23 = vector.load %arg4[%c2_31, %c0_32, %c0_33] : memref<9x128x128xf32, #tpu.memory_space<vmem>>, vector<1x128x128xf32>
    %24 = vector.shape_cast %23 : vector<1x128x128xf32> to vector<128x128xf32>
    %cst_34 = arith.constant dense<0.000000e+00> : vector<256x128xf32>
    %25 = tpu.matmul %22, %24, %cst_34 {dimension_numbers = #tpu.dot_dimension_numbers<[1], [0], [0], [1], [0, 0, 1, 1], [], []>} : vector<256x128xf32>, vector<128x128xf32>, vector<256x128xf32> -> vector<256x128xf32>
    %26 = arith.addf %20, %25 : vector<256x128xf32>
    %c1_35 = arith.constant 1 : index
    %c0_36 = arith.constant 0 : index
    %c0_37 = arith.constant 0 : index
    %27 = vector.load %arg8[%c1_35, %c0_36, %c0_37] : memref<18x18x128xf32, #tpu.memory_space<vmem>>, vector<16x16x128xf32>
    %28 = vector.shape_cast %27 : vector<16x16x128xf32> to vector<256x128xf32>
    %c3 = arith.constant 3 : index
    %c0_38 = arith.constant 0 : index
    %c0_39 = arith.constant 0 : index
    %29 = vector.load %arg4[%c3, %c0_38, %c0_39] : memref<9x128x128xf32, #tpu.memory_space<vmem>>, vector<1x128x128xf32>
    %30 = vector.shape_cast %29 : vector<1x128x128xf32> to vector<128x128xf32>
    %cst_40 = arith.constant dense<0.000000e+00> : vector<256x128xf32>
    %31 = tpu.matmul %28, %30, %cst_40 {dimension_numbers = #tpu.dot_dimension_numbers<[1], [0], [0], [1], [0, 0, 1, 1], [], []>} : vector<256x128xf32>, vector<128x128xf32>, vector<256x128xf32> -> vector<256x128xf32>
    %32 = arith.addf %26, %31 : vector<256x128xf32>
    %c1_41 = arith.constant 1 : index
    %c1_42 = arith.constant 1 : index
    %c0_43 = arith.constant 0 : index
    %33 = vector.load %arg8[%c1_41, %c1_42, %c0_43] : memref<18x18x128xf32, #tpu.memory_space<vmem>>, vector<16x16x128xf32>
    %34 = vector.shape_cast %33 : vector<16x16x128xf32> to vector<256x128xf32>
    %c4 = arith.constant 4 : index
    %c0_44 = arith.constant 0 : index
    %c0_45 = arith.constant 0 : index
    %35 = vector.load %arg4[%c4, %c0_44, %c0_45] : memref<9x128x128xf32, #tpu.memory_space<vmem>>, vector<1x128x128xf32>
    %36 = vector.shape_cast %35 : vector<1x128x128xf32> to vector<128x128xf32>
    %cst_46 = arith.constant dense<0.000000e+00> : vector<256x128xf32>
    %37 = tpu.matmul %34, %36, %cst_46 {dimension_numbers = #tpu.dot_dimension_numbers<[1], [0], [0], [1], [0, 0, 1, 1], [], []>} : vector<256x128xf32>, vector<128x128xf32>, vector<256x128xf32> -> vector<256x128xf32>
    %38 = arith.addf %32, %37 : vector<256x128xf32>
    %c1_47 = arith.constant 1 : index
    %c2_48 = arith.constant 2 : index
    %c0_49 = arith.constant 0 : index
    %39 = vector.load %arg8[%c1_47, %c2_48, %c0_49] : memref<18x18x128xf32, #tpu.memory_space<vmem>>, vector<16x16x128xf32>
    %40 = vector.shape_cast %39 : vector<16x16x128xf32> to vector<256x128xf32>
    %c5 = arith.constant 5 : index
    %c0_50 = arith.constant 0 : index
    %c0_51 = arith.constant 0 : index
    %41 = vector.load %arg4[%c5, %c0_50, %c0_51] : memref<9x128x128xf32, #tpu.memory_space<vmem>>, vector<1x128x128xf32>
    %42 = vector.shape_cast %41 : vector<1x128x128xf32> to vector<128x128xf32>
    %cst_52 = arith.constant dense<0.000000e+00> : vector<256x128xf32>
    %43 = tpu.matmul %40, %42, %cst_52 {dimension_numbers = #tpu.dot_dimension_numbers<[1], [0], [0], [1], [0, 0, 1, 1], [], []>} : vector<256x128xf32>, vector<128x128xf32>, vector<256x128xf32> -> vector<256x128xf32>
    %44 = arith.addf %38, %43 : vector<256x128xf32>
    %c2_53 = arith.constant 2 : index
    %c0_54 = arith.constant 0 : index
    %c0_55 = arith.constant 0 : index
    %45 = vector.load %arg8[%c2_53, %c0_54, %c0_55] : memref<18x18x128xf32, #tpu.memory_space<vmem>>, vector<16x16x128xf32>
    %46 = vector.shape_cast %45 : vector<16x16x128xf32> to vector<256x128xf32>
    %c6 = arith.constant 6 : index
    %c0_56 = arith.constant 0 : index
    %c0_57 = arith.constant 0 : index
    %47 = vector.load %arg4[%c6, %c0_56, %c0_57] : memref<9x128x128xf32, #tpu.memory_space<vmem>>, vector<1x128x128xf32>
    %48 = vector.shape_cast %47 : vector<1x128x128xf32> to vector<128x128xf32>
    %cst_58 = arith.constant dense<0.000000e+00> : vector<256x128xf32>
    %49 = tpu.matmul %46, %48, %cst_58 {dimension_numbers = #tpu.dot_dimension_numbers<[1], [0], [0], [1], [0, 0, 1, 1], [], []>} : vector<256x128xf32>, vector<128x128xf32>, vector<256x128xf32> -> vector<256x128xf32>
    %50 = arith.addf %44, %49 : vector<256x128xf32>
    %c2_59 = arith.constant 2 : index
    %c1_60 = arith.constant 1 : index
    %c0_61 = arith.constant 0 : index
    %51 = vector.load %arg8[%c2_59, %c1_60, %c0_61] : memref<18x18x128xf32, #tpu.memory_space<vmem>>, vector<16x16x128xf32>
    %52 = vector.shape_cast %51 : vector<16x16x128xf32> to vector<256x128xf32>
    %c7 = arith.constant 7 : index
    %c0_62 = arith.constant 0 : index
    %c0_63 = arith.constant 0 : index
    %53 = vector.load %arg4[%c7, %c0_62, %c0_63] : memref<9x128x128xf32, #tpu.memory_space<vmem>>, vector<1x128x128xf32>
    %54 = vector.shape_cast %53 : vector<1x128x128xf32> to vector<128x128xf32>
    %cst_64 = arith.constant dense<0.000000e+00> : vector<256x128xf32>
    %55 = tpu.matmul %52, %54, %cst_64 {dimension_numbers = #tpu.dot_dimension_numbers<[1], [0], [0], [1], [0, 0, 1, 1], [], []>} : vector<256x128xf32>, vector<128x128xf32>, vector<256x128xf32> -> vector<256x128xf32>
    %56 = arith.addf %50, %55 : vector<256x128xf32>
    %c2_65 = arith.constant 2 : index
    %c2_66 = arith.constant 2 : index
    %c0_67 = arith.constant 0 : index
    %57 = vector.load %arg8[%c2_65, %c2_66, %c0_67] : memref<18x18x128xf32, #tpu.memory_space<vmem>>, vector<16x16x128xf32>
    %58 = vector.shape_cast %57 : vector<16x16x128xf32> to vector<256x128xf32>
    %c8 = arith.constant 8 : index
    %c0_68 = arith.constant 0 : index
    %c0_69 = arith.constant 0 : index
    %59 = vector.load %arg4[%c8, %c0_68, %c0_69] : memref<9x128x128xf32, #tpu.memory_space<vmem>>, vector<1x128x128xf32>
    %60 = vector.shape_cast %59 : vector<1x128x128xf32> to vector<128x128xf32>
    %cst_70 = arith.constant dense<0.000000e+00> : vector<256x128xf32>
    %61 = tpu.matmul %58, %60, %cst_70 {dimension_numbers = #tpu.dot_dimension_numbers<[1], [0], [0], [1], [0, 0, 1, 1], [], []>} : vector<256x128xf32>, vector<128x128xf32>, vector<256x128xf32> -> vector<256x128xf32>
    %62 = arith.addf %56, %61 : vector<256x128xf32>
    %c0_71 = arith.constant 0 : index
    %c0_72 = arith.constant 0 : index
    %63 = vector.load %arg5[%c0_71, %c0_72] : memref<1x128xf32, #tpu.memory_space<vmem>>, vector<1x128xf32>
    %64 = vector.broadcast %63 : vector<1x128xf32> to vector<256x128xf32>
    %65 = arith.addf %62, %64 : vector<256x128xf32>
    %66 = tpu.iota {dimensions = array<i32: 1>} : vector<256x128xi32>
    %c96_i32 = arith.constant 96 : i32
    %67 = vector.broadcast %c96_i32 : i32 to vector<256x128xi32>
    %68 = arith.cmpi slt, %66, %67 : vector<256x128xi32>
    %cst_73 = arith.constant 5.000000e-01 : f32
    %69 = vector.broadcast %cst_73 : f32 to vector<256x128xf32>
    %70 = arith.mulf %69, %65 : vector<256x128xf32>
    %71 = arith.select %68, %70, %65 : vector<256x128xi1>, vector<256x128xf32>
    %72 = math.tanh %71 : vector<256x128xf32>
    %cst_74 = arith.constant 5.000000e-01 : f32
    %73 = vector.broadcast %cst_74 : f32 to vector<256x128xf32>
    %74 = arith.mulf %73, %72 : vector<256x128xf32>
    %cst_75 = arith.constant 5.000000e-01 : f32
    %75 = vector.broadcast %cst_75 : f32 to vector<256x128xf32>
    %76 = arith.addf %74, %75 : vector<256x128xf32>
    %77 = arith.select %68, %76, %72 : vector<256x128xi1>, vector<256x128xf32>
    %78 = vector.extract_strided_slice %77 {offsets = [0, 0], sizes = [256, 32], strides = [1, 1]} : vector<256x128xf32> to vector<256x32xf32>
    %79 = vector.extract_strided_slice %77 {offsets = [0, 32], sizes = [256, 32], strides = [1, 1]} : vector<256x128xf32> to vector<256x32xf32>
    %80 = vector.extract_strided_slice %77 {offsets = [0, 64], sizes = [256, 32], strides = [1, 1]} : vector<256x128xf32> to vector<256x32xf32>
    %81 = vector.extract_strided_slice %77 {offsets = [0, 96], sizes = [256, 32], strides = [1, 1]} : vector<256x128xf32> to vector<256x32xf32>
    %c0_76 = arith.constant 0 : index
    %c0_77 = arith.constant 0 : index
    %c0_78 = arith.constant 0 : index
    %82 = vector.load %arg3[%c0_76, %c0_77, %c0_78] : memref<1x256x32xf32, #tpu.memory_space<vmem>>, vector<1x256x32xf32>
    %83 = vector.shape_cast %82 : vector<1x256x32xf32> to vector<256x32xf32>
    %84 = arith.mulf %79, %83 : vector<256x32xf32>
    %85 = arith.mulf %78, %81 : vector<256x32xf32>
    %86 = arith.addf %84, %85 : vector<256x32xf32>
    %87 = math.tanh %86 : vector<256x32xf32>
    %88 = arith.mulf %80, %87 : vector<256x32xf32>
    %c0_79 = arith.constant 0 : index
    %c0_80 = arith.constant 0 : index
    %c0_81 = arith.constant 0 : index
    %89 = vector.load %arg7[%c0_79, %c0_80, %c0_81] : memref<1x256x32xf32, #tpu.memory_space<vmem>>, vector<1x256x32xf32>
    %90 = vector.shape_cast %89 : vector<1x256x32xf32> to vector<256x32xf32>
    %91 = vector.shape_cast %86 : vector<256x32xf32> to vector<1x256x32xf32>
    tpu.vector_store %arg7[%c0_79, %c0_80, %c0_81], %91 {strides = array<i32>} : memref<1x256x32xf32, #tpu.memory_space<vmem>>, vector<1x256x32xf32>,
    %c0_82 = arith.constant 0 : index
    %c0_83 = arith.constant 0 : index
    %c0_84 = arith.constant 0 : index
    %92 = vector.load %arg6[%c0_82, %c0_83, %c0_84] : memref<1x256x32xf32, #tpu.memory_space<vmem>>, vector<1x256x32xf32>
    %93 = vector.shape_cast %92 : vector<1x256x32xf32> to vector<256x32xf32>
    %94 = vector.shape_cast %88 : vector<256x32xf32> to vector<1x256x32xf32>
    tpu.vector_store %arg6[%c0_82, %c0_83, %c0_84], %94 {strides = array<i32>} : memref<1x256x32xf32, #tpu.memory_space<vmem>>, vector<1x256x32xf32>,
    return
  }
  func.func @transform_0(%arg0: i32) -> (i32, i32, i32, i32) {
    %c0_i32 = arith.constant 0 : i32
    %c0_i32_0 = arith.constant 0 : i32
    %c0_i32_1 = arith.constant 0 : i32
    %c0_i32_2 = arith.constant 0 : i32
    return %arg0, %c0_i32, %c0_i32_0, %c0_i32_1 : i32, i32, i32, i32
  }
  func.func @transform_1(%arg0: i32) -> (i32, i32, i32, i32) {
    %c0_i32 = arith.constant 0 : i32
    %c0_i32_0 = arith.constant 0 : i32
    %c0_i32_1 = arith.constant 0 : i32
    %c0_i32_2 = arith.constant 0 : i32
    return %arg0, %c0_i32, %c0_i32_0, %c0_i32_1 : i32, i32, i32, i32
  }
  func.func @transform_2(%arg0: i32) -> (i32, i32, i32) {
    %c0_i32 = arith.constant 0 : i32
    %c0_i32_0 = arith.constant 0 : i32
    %c0_i32_1 = arith.constant 0 : i32
    return %arg0, %c0_i32, %c0_i32_0 : i32, i32, i32
  }
  func.func @transform_3(%arg0: i32) -> (i32, i32, i32) {
    %c0_i32 = arith.constant 0 : i32
    %c0_i32_0 = arith.constant 0 : i32
    %c0_i32_1 = arith.constant 0 : i32
    %c0_i32_2 = arith.constant 0 : i32
    return %c0_i32, %c0_i32_0, %c0_i32_1 : i32, i32, i32
  }
  func.func @transform_4(%arg0: i32) -> (i32, i32) {
    %c0_i32 = arith.constant 0 : i32
    %c0_i32_0 = arith.constant 0 : i32
    %c0_i32_1 = arith.constant 0 : i32
    return %c0_i32, %c0_i32_0 : i32, i32
  }
  func.func @transform_5(%arg0: i32) -> (i32, i32, i32) {
    %c0_i32 = arith.constant 0 : i32
    %c0_i32_0 = arith.constant 0 : i32
    %c0_i32_1 = arith.constant 0 : i32
    return %arg0, %c0_i32, %c0_i32_0 : i32, i32, i32
  }
  func.func @transform_6(%arg0: i32) -> (i32, i32, i32) {
    %c0_i32 = arith.constant 0 : i32
    %c0_i32_0 = arith.constant 0 : i32
    %c0_i32_1 = arith.constant 0 : i32
    return %arg0, %c0_i32, %c0_i32_0 : i32, i32, i32
  }
}

</mosaic_0001>

<bundles_post_ra>
// kernel: conv_lstm_cell.1
= control target key start
LH: loop header
LB: loop body
LE: loop exit
PB: predicated region body
PF: predicated region fallthrough
CT: control target
= control target key end

     0   :  { %12 = vsyncpa [#allocation4], 0  ;;  %s6290_s0 = inlined_call_operand.vmem [shape: f32[2,16,16,4], index: 0, kind: input, shape index: {}]   ;;  %s6291_s1 = inlined_call_operand.vmem [shape: f32[2,16,16,32], index: 1, kind: input, shape index: {}]   ;;  %s6292_s2 = inlined_call_operand.vmem [shape: f32[2,256,32], index: 2, kind: input, shape index: {}]   ;;  %s6293_s3 = inlined_call_operand.vmem [shape: f32[9,128,128], index: 3, kind: input, shape index: {}]   ;;  %s6294_s4 = inlined_call_operand.vmem [shape: f32[1,128], index: 4, kind: input, shape index: {}]   ;;  %s6295_s5 = inlined_call_operand.hbm [shape: f32[2,256,32], index: 5, kind: output, shape index: {0}]   ;;  %s6296_s6 = inlined_call_operand.hbm [shape: f32[2,256,32], index: 6, kind: output, shape index: {1}]  }
   0x1   :  { %14 = vsyncpa [#allocation4 + $0x1], 0 }
   0x2   :  { %15 = vsyncpa [#allocation6], 0 }
   0x3   :  { %17 = vsyncpa [#allocation6 + $0x1], 0  ;;  %s4227_s21 = smov 0   ;;  %s4229_s22 = smov 0  }
   0x4   :  { %s4231_s23 = smov 0   ;;  %s4233_s24 = smov 0  }
   0x5 LB: > { %s4248_s25 = sadd.s32 4294967295, %s4184_s24   ;;  %s3708_s26 = sadd.s32 4294967294, %s4184_s24   ;;  %s4184_s24 = sphi %s4233_s24, %s6340_s24   ;;  %s4180_s23 = sphi %s4231_s23, %s6339_s23   ;;  %s4176_s22 = sphi %s4229_s22, %s6338_s22   ;;  %s4172_s21 = sphi %s4227_s21, %s6337_s21  }
   0x6   : > { %s4252_s27 = sadd.s32 1, %s4184_s24   ;;  %s150_s28 = sadd.s32 1, %s4180_s23 }
   0x7   : > { %s147_s29 = ssub.s32 %s4184_s24, %s4252_s27  ;;  %p160_p0 = scmp.ne.s32.totalorder %s4180_s23, %s4176_s22 }
   0x8   : > { %p148_p1 = scmp.eq.s32.totalorder %s147_s29, 0  ;;  %p161_p2 = scmp.eq.s32.totalorder %s4248_s25, 1 }
   0x9   : > { %p166_p3 = scmp.ne.s32.totalorder %s4176_s22, %s4172_s21  ;;  %p167_p4 = scmp.eq.s32.totalorder %s3708_s26, 1 }
   0xa   : > { %s4263_s30 = scalar_select %p148_p1, %s4180_s23, %s150_s28  }
   0xb   : > { %p4265_p5 = por %p161_p2, %p160_p0  ;;  %p4269_p6 = por %p167_p4, %p166_p3 }
   0xc   : > { %p3711_p7 = scmp.ge.s32.totalorder %s4184_s24, 1  ;;  %p241_p8 = scmp.lt.s32.totalorder %s4184_s24, 3 }
   0xe   : > { %p242_p9 = pnand %p3711_p7, %p241_p8 }
  0x10   : > { %245 = sbr.rel (%p242_p9) target bundleno = 1373 (0x55d), region = 40 }
  0x15   : > { %p286_p10 = scmp.lt.s32.totalorder %s4248_s25, 1  ;;  %s4186_s14 = smov 32   ;;  %v3735_v18 = vld [vmem:[%s6293_s3 + $0xf8] sm:$0xff]  ;;  %v3734_v19 = vld [vmem:[%s6293_s3 + $0xf0] sm:$0xff]  ;;  %v3733_v20 = vld [vmem:[%s6293_s3 + $0xe8] sm:$0xff]  ;;  %v4187_v21 = vmov 0.0  }
  0x16   : > { %3862 = vmatpush.msra.mxu2 %v3735_v18  ;;  %3861 = vmatpush.msra.mxu1 %v3735_v18  ;;  %338 = vst [vmem:[#allocation2 + $0x128] sm:$0xff] %v4187_v21  ;;  %vm388_vm0 = vcmask 261120   ;;  %v3732_v25 = vld [vmem:[%s6293_s3 + $0xe0] sm:$0xff]  ;;  %v3731_v27 = vld [vmem:[%s6293_s3 + $0xd8] sm:$0xff]  ;;  %v3730_v28 = vld [vmem:[%s6293_s3 + $0xd0] sm:$0xff]  ;;  %vm581_vm1 = vcmask 294144  }
  0x17   : > { %s287_s9 = scalar_select %p286_p10, %s4248_s25, 1  ;;  %3863 = vmatpush.msra.mxu3 %v3735_v18  ;;  %711 = vmatpush.msra.mxu0 %v3735_v18  ;;  %339 = vst [vmem:[#allocation2 + $0x130] sm:$0x3] %v4187_v21  ;;  %v3729_v29 = vld [vmem:[%s6293_s3 + $0xc8] sm:$0xff]  ;;  %v3728_v32 = vld [vmem:[%s6293_s3 + $0xc0] sm:$0xff]  ;;  %v3727_v34 = vld [vmem:[%s6293_s3 + $0xb8] sm:$0xff] }
  0x18   : > { %3865 = vmatpush.msra.mxu2 %v3734_v19  ;;  %3864 = vmatpush.msra.mxu1 %v3734_v19  ;;  %301 = vst [vmem:[#allocation2] sm:$0xff] %v4187_v21  ;;  %v3726_v38 = vld [vmem:[%s6293_s3 + $0xb0] sm:$0xff]  ;;  %v3725_v39 = vld [vmem:[%s6293_s3 + $0xa8] sm:$0xff]  ;;  %v3724_v40 = vld [vmem:[%s6293_s3 + $0xa0] sm:$0xff]  ;;  %s4188_s17 = smov 96   ;;  %s5937_s18 = sand.u32 1, %s4176_s22  }
  0x19   : > { %s4277_s10 = sshll.u32 %s287_s9, 8  ;;  %3866 = vmatpush.msra.mxu3 %v3734_v19  ;;  %712 = vmatpush.msra.mxu0 %v3734_v19  ;;  %302 = vst [vmem:[#allocation2 + $0x8] sm:$0xff] %v4187_v21  ;;  %v3723_v44 = vld [vmem:[%s6293_s3 + $0x98] sm:$0xff]  ;;  %v3722_v45 = vld [vmem:[%s6293_s3 + $0x90] sm:$0xff]  ;;  %v3721_v46 = vld [vmem:[%s6293_s3 + $0x88] sm:$0xff]  ;;  %s3712_s19 = sshll.u32 %s5937_s18, 8 }
  0x1a   : > { %s4283_s13 = scalar_lea.vmem %s6290_s0, %s4277_s10  ;;  %s4331_s26 = scalar_lea.vmem %s6291_s1, %s4277_s10  ;;  %3868 = vmatpush.msra.mxu2 %v3733_v20  ;;  %3867 = vmatpush.msra.mxu1 %v3733_v20  ;;  %303 = vst [vmem:[#allocation2 + $0x10] sm:$0x3] %v4187_v21  ;;  %v3720_v47 = vld [vmem:[%s6293_s3 + $0x80] sm:$0xff]  ;;  %v3751_v55 = vld [vmem:[%s6293_s3 + $0x178] sm:$0xff]  ;;  %v3782_v19 = vld [vmem:[%s6293_s3 + $0x270] sm:$0xff] }
  0x1b   : > { %v435_v0 = vld [vmem:[%s4283_s13 + $0x70] sm:$0xff]  ;;  %v444_v2 = vld [vmem:[%s4283_s13 + $0xb8] sm:$0xff]  ;;  %v437_v6 = vld [vmem:[%s4283_s13 + $0x80] sm:$0xff]  ;;  %3869 = vmatpush.msra.mxu3 %v3733_v20  ;;  %304 = vst [vmem:[#allocation2 + $0x18] sm:$0xff] %v4187_v21  ;;  %713 = vmatpush.msra.mxu0 %v3733_v20  ;;  %s5230_s12 = scalar_lea.vmem %s6292_s2, %s4277_s10  ;;  %s5953_s20 = scalar_lea.vmem [#allocation5], %s3712_s19 }
  0x1c   : > { %v427_v1 = vld [vmem:[%s4283_s13 + $0x30] sm:$0xff]  ;;  %513 = vrot.lane.b32.xlu0 %v435_v0, %s4186_s14  ;;  %531 = vrot.lane.b32.xlu2 %v444_v2, %s4186_s14  ;;  %v436_v4 = vld [vmem:[%s4283_s13 + $0x78] sm:$0xff]  ;;  %305 = vst [vmem:[#allocation2 + $0x20] sm:$0xff] %v4187_v21  ;;  %s6090_s28 = scalar_lea.vmem [#allocation3], %s3712_s19  ;;  %s3557_s15 = scalar_lea.sflag [#allocation6], %s5937_s18 }
  0x1d   : > { %497 = vrot.lane.b32.xlu1 %v427_v1, %s4186_s14  ;;  %v443_v3 = vld [vmem:[%s4283_s13 + $0xb0] sm:$0xff]  ;;  %v428_v5 = vld [vmem:[%s4283_s13 + $0x38] sm:$0xff]  ;;  %v445_v7 = vld [vmem:[%s4283_s13 + $0xc0] sm:$0xff]  ;;  %3871 = vmatpush.msra.mxu2 %v3732_v25  ;;  %306 = vst [vmem:[#allocation2 + $0x28] sm:$0x3] %v4187_v21  ;;  %s4110_s29 = scalar_lea.hbm %s6296_s6, 512 }
  0x1e   : > { %v429_v8 = vld [vmem:[%s4283_s13 + $0x40] sm:$0xff]  ;;  %v438_v9 = vld [vmem:[%s4283_s13 + $0x88] sm:$0xff]  ;;  %v439_v13 = vld [vmem:[%s4283_s13 + $0x90] sm:$0xff]  ;;  %3870 = vmatpush.msra.mxu1 %v3732_v25  ;;  %3872 = vmatpush.msra.mxu3 %v3732_v25  ;;  %307 = vst [vmem:[#allocation2 + $0x30] sm:$0xff] %v4187_v21 }
  0x1f   : > { %v421_v10 = vld [vmem:[%s4283_s13] sm:$0xff]  ;;  %v446_v11 = vld [vmem:[%s4283_s13 + $0xc8] sm:$0xff]  ;;  %v447_v15 = vld [vmem:[%s4283_s13 + $0xd0] sm:$0xff]  ;;  %3874 = vmatpush.msra.mxu2 %v3731_v27  ;;  %714 = vmatpush.msra.mxu0 %v3732_v25  ;;  %308 = vst [vmem:[#allocation2 + $0x38] sm:$0xff] %v4187_v21 }
  0x20   : > { %v430_v12 = vld [vmem:[%s4283_s13 + $0x48] sm:$0xff]  ;;  %v431_v16 = vld [vmem:[%s4283_s13 + $0x50] sm:$0xff]  ;;  %v440_v17 = vld [vmem:[%s4283_s13 + $0x98] sm:$0xff]  ;;  %3873 = vmatpush.msra.mxu1 %v3731_v27  ;;  %3875 = vmatpush.msra.mxu3 %v3731_v27  ;;  %309 = vst [vmem:[#allocation2 + $0x40] sm:$0x3] %v4187_v21 }
  0x21   : > { %v422_v14 = vld [vmem:[%s4283_s13 + $0x8] sm:$0xff]  ;;  %v378_v22 = vld [vmem:[%s4331_s26 + $0xb8] sm:$0xff]  ;;  %v423_v23 = vld [vmem:[%s4283_s13 + $0x10] sm:$0xff]  ;;  %3877 = vmatpush.msra.mxu2 %v3730_v28  ;;  %715 = vmatpush.msra.mxu0 %v3731_v27  ;;  %310 = vst [vmem:[#allocation2 + $0x48] sm:$0xff] %v4187_v21 }
  0x22   : > { %v448_v24 = vld [vmem:[%s4283_s13 + $0xd8] sm:$0xff]  ;;  %412 = vst.msk [vmem:[#allocation2 + $0x129] sm:$0xff] %vm388_vm0, %v378_v22  ;;  %v441_v30 = vld [vmem:[%s4283_s13 + $0xa0] sm:$0xff]  ;;  %3876 = vmatpush.msra.mxu1 %v3730_v28  ;;  %3878 = vmatpush.msra.mxu3 %v3730_v28  ;;  %v442_v36 = vld [vmem:[%s4283_s13 + $0xa8] sm:$0xff] }
  0x23   : > { %v432_v26 = vld [vmem:[%s4283_s13 + $0x58] sm:$0xff]  ;;  %v449_v33 = vld [vmem:[%s4283_s13 + $0xe0] sm:$0xff]  ;;  %3880 = vmatpush.msra.mxu2 %v3729_v29  ;;  %311 = vst [vmem:[#allocation2 + $0x50] sm:$0xff] %v4187_v21  ;;  %716 = vmatpush.msra.mxu0 %v3730_v28  ;;  %v450_v41 = vld [vmem:[%s4283_s13 + $0xe8] sm:$0xff] }
  0x24   : > { %529 = vrot.lane.b32.xlu0 %v443_v3, %s4186_s14  ;;  %499 = vrot.lane.b32.xlu2 %v428_v5, %s4186_s14  ;;  %v424_v31 = vld [vmem:[%s4283_s13 + $0x18] sm:$0xff]  ;;  %312 = vst [vmem:[#allocation2 + $0x58] sm:$0x3] %v4187_v21  ;;  %v433_v35 = vld [vmem:[%s4283_s13 + $0x60] sm:$0xff]  ;;  %v663_v1 = vld [vmem:[#allocation2 + $0x9] sm:$0xff] }
  0x25   : > { %515 = vrot.lane.b32.xlu1 %v436_v4, %s4186_s14  ;;  %3879 = vmatpush.msra.mxu1 %v3729_v29  ;;  %313 = vst [vmem:[#allocation2 + $0x60] sm:$0xff] %v4187_v21  ;;  %v425_v37 = vld [vmem:[%s4283_s13 + $0x20] sm:$0xff]  ;;  %v434_v42 = vld [vmem:[%s4283_s13 + $0x68] sm:$0xff]  ;;  %v369_v49 = vld [vmem:[%s4331_s26 + $0x70] sm:$0xff] }
  0x26   : > { %3883 = vmatpush.msra.mxu2 %v3728_v32  ;;  %314 = vst [vmem:[#allocation2 + $0x68] sm:$0xff] %v4187_v21  ;;  %3881 = vmatpush.msra.mxu3 %v3729_v29  ;;  %v426_v43 = vld [vmem:[%s4283_s13 + $0x28] sm:$0xff]  ;;  %v361_v50 = vld [vmem:[%s4331_s26 + $0x30] sm:$0xff]  ;;  %v362_v51 = vld [vmem:[%s4331_s26 + $0x38] sm:$0xff] }
  0x27   : > { %3882 = vmatpush.msra.mxu1 %v3728_v32  ;;  %315 = vst [vmem:[#allocation2 + $0x70] sm:$0x3] %v4187_v21  ;;  %717 = vmatpush.msra.mxu0 %v3729_v29  ;;  %v377_v53 = vld [vmem:[%s4331_s26 + $0xb0] sm:$0xff]  ;;  %v662_v54 = vld [vmem:[#allocation2 + $0x1] sm:$0xff]  ;;  %v370_v56 = vld [vmem:[%s4331_s26 + $0x78] sm:$0xff] }
  0x28   : > { %3886 = vmatpush.msra.mxu2 %v3727_v34  ;;  %316 = vst [vmem:[#allocation2 + $0x78] sm:$0xff] %v4187_v21  ;;  %3884 = vmatpush.msra.mxu3 %v3728_v32  ;;  %v363_v57 = vld [vmem:[%s4331_s26 + $0x40] sm:$0xff]  ;;  %v380_v60 = vld [vmem:[%s4331_s26 + $0xc8] sm:$0xff]  ;;  %v3767_v0 = vld [vmem:[%s6293_s3 + $0x1f8] sm:$0xff] }
  0x29   : > { %3885 = vmatpush.msra.mxu1 %v3727_v34  ;;  %317 = vst [vmem:[#allocation2 + $0x80] sm:$0xff] %v4187_v21  ;;  %718 = vmatpush.msra.mxu0 %v3728_v32  ;;  %v371_v58 = vld [vmem:[%s4331_s26 + $0x80] sm:$0xff]  ;;  %v372_v61 = vld [vmem:[%s4331_s26 + $0x88] sm:$0xff]  ;;  %v661_v3 = vld [vmem:[%s6293_s3 + $0x78] sm:$0xff] }
  0x2a   : > { %318 = vst [vmem:[#allocation2 + $0x88] sm:$0x3] %v4187_v21  ;;  %3887 = vmatpush.msra.mxu3 %v3727_v34  ;;  %3889 = vmatpush.msra.mxu2 %v3726_v38  ;;  %v379_v59 = vld [vmem:[%s4331_s26 + $0xc0] sm:$0xff]  ;;  %v356_v2 = vld [vmem:[%s4331_s26 + $0x8] sm:$0xff]  ;;  %v3750_v4 = vld [vmem:[%s6293_s3 + $0x170] sm:$0xff] }
  0x2b   : > { %319 = vst [vmem:[#allocation2 + $0x90] sm:$0xff] %v4187_v21  ;;  %3888 = vmatpush.msra.mxu1 %v3726_v38  ;;  %719 = vmatpush.msra.mxu0 %v3727_v34  ;;  %v355_v63 = vld [vmem:[%s4331_s26] sm:$0xff]  ;;  %v3766_v5 = vld [vmem:[%s6293_s3 + $0x1f0] sm:$0xff]  ;;  %v3747_v22 = vld [vmem:[%s6293_s3 + $0x158] sm:$0xff] }
  0x2c   : > { %517 = vrot.lane.b32.xlu0 %v437_v6, %s4186_s14  ;;  %501 = vrot.lane.b32.xlu2 %v429_v8, %s4186_s14  ;;  %320 = vst [vmem:[#allocation2 + $0x98] sm:$0xff] %v4187_v21  ;;  %v660_v6 = vld [vmem:[%s6293_s3 + $0x70] sm:$0xff]  ;;  %v364_v8 = vld [vmem:[%s4331_s26 + $0x48] sm:$0xff] }
  0x2d   : > { %533 = vrot.lane.b32.xlu1 %v445_v7, %s4186_s14  ;;  %321 = vst [vmem:[#allocation2 + $0xa0] sm:$0x3] %v4187_v21  ;;  %3890 = vmatpush.msra.mxu3 %v3726_v38  ;;  %v3749_v7 = vld [vmem:[%s6293_s3 + $0x168] sm:$0xff]  ;;  %v3764_v18 = vld [vmem:[%s6293_s3 + $0x1e0] sm:$0xff]  ;;  %v365_v28 = vld [vmem:[%s4331_s26 + $0x50] sm:$0xff] }
  0x2e   : > { %322 = vst [vmem:[#allocation2 + $0xa8] sm:$0xff] %v4187_v21  ;;  %3892 = vmatpush.msra.mxu2 %v3725_v39  ;;  %3891 = vmatpush.msra.mxu1 %v3725_v39  ;;  %v658_v20 = vld [vmem:[%s6293_s3 + $0x60] sm:$0xff]  ;;  %v366_v32 = vld [vmem:[%s4331_s26 + $0x58] sm:$0xff]  ;;  %v3746_v34 = vld [vmem:[%s6293_s3 + $0x150] sm:$0xff] }
  0x2f   : > { %323 = vst [vmem:[#allocation2 + $0xb0] sm:$0xff] %v4187_v21  ;;  %720 = vmatpush.msra.mxu0 %v3726_v38  ;;  %3893 = vmatpush.msra.mxu3 %v3725_v39  ;;  %v3745_v38 = vld [vmem:[%s6293_s3 + $0x148] sm:$0xff] }
  0x30   : > { %324 = vst [vmem:[#allocation2 + $0xb8] sm:$0x3] %v4187_v21  ;;  %3895 = vmatpush.msra.mxu2 %v3724_v40  ;;  %3894 = vmatpush.msra.mxu1 %v3724_v40 }
  0x31   : > { %325 = vst [vmem:[#allocation2 + $0xc0] sm:$0xff] %v4187_v21  ;;  %721 = vmatpush.msra.mxu0 %v3725_v39  ;;  %3896 = vmatpush.msra.mxu3 %v3724_v40  ;;  %v357_v39 = vld [vmem:[%s4331_s26 + $0x10] sm:$0xff] }
  0x32   : > { %326 = vst [vmem:[#allocation2 + $0xc8] sm:$0xff] %v4187_v21  ;;  %3898 = vmatpush.msra.mxu2 %v3723_v44  ;;  %3897 = vmatpush.msra.mxu1 %v3723_v44 }
  0x33   : > { %327 = vst [vmem:[#allocation2 + $0xd0] sm:$0x3] %v4187_v21  ;;  %722 = vmatpush.msra.mxu0 %v3724_v40  ;;  %3899 = vmatpush.msra.mxu3 %v3723_v44 }
  0x34   : > { %519 = vrot.lane.b32.xlu0 %v438_v9, %s4186_s14  ;;  %535 = vrot.lane.b32.xlu2 %v446_v11, %s4186_s14  ;;  %328 = vst [vmem:[#allocation2 + $0xd8] sm:$0xff] %v4187_v21  ;;  %v373_v11 = vld [vmem:[%s4331_s26 + $0x90] sm:$0xff] }
  0x35   : > { %485 = vrot.lane.b32.xlu1 %v421_v10, %s4186_s14  ;;  %329 = vst [vmem:[#allocation2 + $0xe0] sm:$0xff] %v4187_v21  ;;  %723 = vmatpush.msra.mxu0 %v3723_v44 }
  0x36   : > { %330 = vst [vmem:[#allocation2 + $0xe8] sm:$0x3] %v4187_v21  ;;  %3901 = vmatpush.msra.mxu2 %v3722_v45  ;;  %3900 = vmatpush.msra.mxu1 %v3722_v45 }
  0x37   : > { %331 = vst [vmem:[#allocation2 + $0xf0] sm:$0xff] %v4187_v21  ;;  %3902 = vmatpush.msra.mxu3 %v3722_v45  ;;  %724 = vmatpush.msra.mxu0 %v3722_v45  ;;  %v382_v45 = vld [vmem:[%s4331_s26 + $0xd8] sm:$0xff] }
  0x38   : > { %332 = vst [vmem:[#allocation2 + $0xf8] sm:$0xff] %v4187_v21  ;;  %3904 = vmatpush.msra.mxu2 %v3721_v46  ;;  %3903 = vmatpush.msra.mxu1 %v3721_v46 }
  0x39   : > { %333 = vst [vmem:[#allocation2 + $0x100] sm:$0x3] %v4187_v21  ;;  %3905 = vmatpush.msra.mxu3 %v3721_v46  ;;  %725 = vmatpush.msra.mxu0 %v3721_v46 }
  0x3a   : > { %334 = vst [vmem:[#allocation2 + $0x108] sm:$0xff] %v4187_v21  ;;  %3907 = vmatpush.msra.mxu2 %v3720_v47  ;;  %3906 = vmatpush.msra.mxu1 %v3720_v47 }
  0x3b   : > { %335 = vst [vmem:[#allocation2 + $0x110] sm:$0xff] %v4187_v21  ;;  %3908 = vmatpush.msra.mxu3 %v3720_v47  ;;  %726 = vmatpush.msra.mxu0 %v3720_v47  ;;  %v3761_v47 = vld [vmem:[%s6293_s3 + $0x1c8] sm:$0xff] }
  0x3c   : > { %503 = vrot.lane.b32.xlu0 %v430_v12, %s4186_s14  ;;  %487 = vrot.lane.b32.xlu2 %v422_v14, %s4186_s14  ;;  %336 = vst [vmem:[#allocation2 + $0x118] sm:$0x3] %v4187_v21  ;;  %v3783_v14 = vld [vmem:[%s6293_s3 + $0x278] sm:$0xff] }
  0x3d   : > { %521 = vrot.lane.b32.xlu1 %v439_v13, %s4186_s14  ;;  %337 = vst [vmem:[#allocation2 + $0x120] sm:$0xff] %v4187_v21  ;;  %727 = vmatmul.f32.vlgmr.msra.gmra.mxu0 %v662_v54  ;;  %v3765_v13 = vld [vmem:[%s6293_s3 + $0x1e8] sm:$0xff]  ;;  %v3743_v54 = vld [vmem:[%s6293_s3 + $0x138] sm:$0xff] }
  0x3e   : > { %340 = vst [vmem:[#allocation2 + $0x138] sm:$0xff] %v4187_v21  ;;  %986 = vmatpush.msrb.mxu2 %v3751_v55  ;;  %1180 = vmatpush.msrb.mxu3 %v3767_v0  ;;  %v375_v55 = vld [vmem:[%s4331_s26 + $0xa0] sm:$0xff]  ;;  %v3759_v0 = vld [vmem:[%s6293_s3 + $0x1b8] sm:$0xff] }
  0x3f   : > { %341 = vst [vmem:[#allocation2 + $0x140] sm:$0xff] %v4187_v21  ;;  %824 = vmatpush.msrb.mxu1 %v661_v3  ;;  %1374 = vmatpush.msrb.mxu0 %v3783_v14  ;;  %v3742_v3 = vld [vmem:[%s6293_s3 + $0x130] sm:$0xff]  ;;  %v359_v14 = vld [vmem:[%s4331_s26 + $0x20] sm:$0xff] }
  0x40   : > { %342 = vst [vmem:[#allocation2 + $0x148] sm:$0x3] %v4187_v21  ;;  %987 = vmatpush.msrb.mxu2 %v3750_v4  ;;  %1181 = vmatpush.msrb.mxu3 %v3766_v5  ;;  %v3758_v4 = vld [vmem:[%s6293_s3 + $0x1b0] sm:$0xff]  ;;  %v3776_v5 = vld [vmem:[%s6293_s3 + $0x240] sm:$0xff] }
  0x41   : > { %343 = vst [vmem:[#allocation2 + $0x150] sm:$0xff] %v4187_v21  ;;  %825 = vmatpush.msrb.mxu1 %v660_v6  ;;  %1375 = vmatpush.msrb.mxu0 %v3782_v19  ;;  %v652_v6 = vld [vmem:[%s6293_s3 + $0x30] sm:$0xff]  ;;  %v651_v19 = vld [vmem:[%s6293_s3 + $0x28] sm:$0xff] }
  0x42   : > { %344 = vst [vmem:[#allocation2 + $0x158] sm:$0xff] %v4187_v21  ;;  %988 = vmatpush.msrb.mxu2 %v3749_v7  ;;  %1182 = vmatpush.msrb.mxu3 %v3765_v13  ;;  %v3741_v7 = vld [vmem:[%s6293_s3 + $0x128] sm:$0xff] }
  0x43   : > { %345 = vst [vmem:[#allocation2 + $0x160] sm:$0x3] %v4187_v21 }
  0x44   : > { %537 = vrot.lane.b32.xlu0 %v447_v15, %s4186_s14  ;;  %523 = vrot.lane.b32.xlu2 %v440_v17, %s4186_s14  ;;  %346 = vst [vmem:[#allocation2 + $0x168] sm:$0xff] %v4187_v21  ;;  %v374_v15 = vld [vmem:[%s4331_s26 + $0x98] sm:$0xff]  ;;  %v3748_v17 = vld [vmem:[%s6293_s3 + $0x160] sm:$0xff] }
  0x45   : > { %505 = vrot.lane.b32.xlu1 %v431_v16, %s4186_s14  ;;  %347 = vst [vmem:[#allocation2 + $0x170] sm:$0xff] %v4187_v21  ;;  %730 = vmatmul.f32.gmra.mxu0 %v663_v1  ;;  %v659_v16 = vld [vmem:[%s6293_s3 + $0x68] sm:$0xff] }
  0x46   : > { %348 = vst [vmem:[#allocation2 + $0x178] sm:$0x3] %v4187_v21  ;;  %826 = vmatpush.msrb.mxu1 %v659_v16  ;;  %989 = vmatpush.msrb.mxu2 %v3748_v17  ;;  %v3777_v1 = vld [vmem:[%s6293_s3 + $0x248] sm:$0xff] }
  0x47   : > { %349 = vst [vmem:[#allocation2 + $0x180] sm:$0xff] %v4187_v21  ;;  %1183 = vmatpush.msrb.mxu3 %v3764_v18  ;;  %v376_v16 = vld [vmem:[%s4331_s26 + $0xa8] sm:$0xff]  ;;  %v3775_v18 = vld [vmem:[%s6293_s3 + $0x238] sm:$0xff] }
  0x48   : > { %350 = vst [vmem:[#allocation2 + $0x188] sm:$0xff] %v4187_v21  ;;  %827 = vmatpush.msrb.mxu1 %v658_v20  ;;  %990 = vmatpush.msrb.mxu2 %v3747_v22  ;;  %v3757_v17 = vld [vmem:[%s6293_s3 + $0x1a8] sm:$0xff]  ;;  %v3740_v20 = vld [vmem:[%s6293_s3 + $0x120] sm:$0xff] }
  0x49   : > { %351 = vst [vmem:[#allocation2 + $0x190] sm:$0x3] %v4187_v21  ;;  %v3756_v22 = vld [vmem:[%s6293_s3 + $0x1a0] sm:$0xff] }
  0x4a   : > { %352 = vst [vmem:[#allocation2 + $0x198] sm:$0xff] %v4187_v21  ;;  %991 = vmatpush.msrb.mxu2 %v3746_v34 }
  0x4b   : > { %353 = vst [vmem:[#allocation2 + $0x1a0] sm:$0xff] %v4187_v21 }
  0x4c   : > { %489 = vrot.lane.b32.xlu0 %v423_v23, %s4186_s14  ;;  %507 = vrot.lane.b32.xlu2 %v432_v26, %s4186_s14  ;;  %354 = vst [vmem:[#allocation2 + $0x1a8] sm:$0x3] %v4187_v21  ;;  %v381_v23 = vld [vmem:[%s4331_s26 + $0xd0] sm:$0xff] }
  0x4d   : > { %539 = vrot.lane.b32.xlu1 %v448_v24, %s4186_s14  ;;  %403 = vst.msk [vmem:[#allocation2 + $0xc1] sm:$0xff] %vm388_vm0, %v369_v49  ;;  %992 = vmatpush.msrb.mxu2 %v3745_v38  ;;  %v655_v49 = vld [vmem:[%s6293_s3 + $0x48] sm:$0xff]  ;;  %v3755_v38 = vld [vmem:[%s6293_s3 + $0x198] sm:$0xff] }
  0x4e   : > { %395 = vst.msk [vmem:[#allocation2 + $0x61] sm:$0xff] %vm388_vm0, %v361_v50  ;;  %v3744_v50 = vld [vmem:[%s6293_s3 + $0x140] sm:$0xff] }
  0x4f   : > { %396 = vst.msk [vmem:[#allocation2 + $0x69] sm:$0xff] %vm388_vm0, %v362_v51  ;;  %v3760_v51 = vld [vmem:[%s6293_s3 + $0x1c0] sm:$0xff]  ;;  %993 = vmatpush.msrb.mxu2 %v3744_v50 }
  0x50   : > { %411 = vst.msk [vmem:[#allocation2 + $0x121] sm:$0xff] %vm388_vm0, %v377_v53  ;;  %v654_v53 = vld [vmem:[%s6293_s3 + $0x40] sm:$0xff] }
  0x51   : > { %404 = vst.msk [vmem:[#allocation2 + $0xc9] sm:$0xff] %vm388_vm0, %v370_v56  ;;  %994 = vmatpush.msrb.mxu2 %v3743_v54 }
  0x52   : > { %397 = vst.msk [vmem:[#allocation2 + $0x79] sm:$0xff] %vm388_vm0, %v363_v57 }
  0x53   : > { %405 = vst.msk [vmem:[#allocation2 + $0xd9] sm:$0xff] %vm388_vm0, %v371_v58  ;;  %995 = vmatpush.msrb.mxu2 %v3742_v3 }
  0x54   : > { %525 = vrot.lane.b32.xlu0 %v441_v30, %s4186_s14  ;;  %541 = vrot.lane.b32.xlu2 %v449_v33, %s4186_s14  ;;  %413 = vst.msk [vmem:[#allocation2 + $0x139] sm:$0xff] %vm388_vm0, %v379_v59  ;;  %v3763_v30 = vld [vmem:[%s6293_s3 + $0x1d8] sm:$0xff] }
  0x55   : > { %491 = vrot.lane.b32.xlu1 %v424_v31, %s4186_s14  ;;  %414 = vst.msk [vmem:[#allocation2 + $0x141] sm:$0xff] %vm388_vm0, %v380_v60  ;;  %v3781_v31 = vld [vmem:[%s6293_s3 + $0x268] sm:$0xff]  ;;  %1184 = vmatpush.msrb.mxu3 %v3763_v30  ;;  %v657_v33 = vld [vmem:[%s6293_s3 + $0x58] sm:$0xff] }
  0x56   : > { %406 = vst.msk [vmem:[#allocation2 + $0xe1] sm:$0xff] %vm388_vm0, %v372_v61  ;;  %1376 = vmatpush.msrb.mxu0 %v3781_v31  ;;  %828 = vmatpush.msrb.mxu1 %v657_v33  ;;  %v383_v61 = vld [vmem:[%s4331_s26 + $0xe0] sm:$0xff] }
  0x57   : > { %389 = vst.msk [vmem:[#allocation2 + $0x19] sm:$0xff] %vm388_vm0, %v355_v63  ;;  %v358_v63 = vld [vmem:[%s4331_s26 + $0x18] sm:$0xff]  ;;  %996 = vmatpush.msrb.mxu2 %v3741_v7 }
  0x58   : > { %390 = vst.msk [vmem:[#allocation2 + $0x21] sm:$0xff] %vm388_vm0, %v356_v2  ;;  %v653_v2 = vld [vmem:[%s6293_s3 + $0x38] sm:$0xff] }
  0x59   : > { %398 = vst.msk [vmem:[#allocation2 + $0x81] sm:$0xff] %vm388_vm0, %v364_v8  ;;  %v367_v8 = vld [vmem:[%s4331_s26 + $0x60] sm:$0xff]  ;;  %997 = vmatpush.msrb.mxu2 %v3740_v20  ;;  %v3831_v7 = vld [vmem:[%s6293_s3 + $0x3f8] sm:$0xff] }
  0x5a   : > { %407 = vst.msk [vmem:[#allocation2 + $0xf1] sm:$0xff] %vm388_vm0, %v373_v11 }
  0x5b   : > { %408 = vst.msk [vmem:[#allocation2 + $0xf9] sm:$0xff] %vm388_vm0, %v374_v15 }
  0x5c   : > { %509 = vrot.lane.b32.xlu0 %v433_v35, %s4186_s14  ;;  %493 = vrot.lane.b32.xlu2 %v425_v37, %s4186_s14  ;;  %415 = vst.msk [vmem:[#allocation2 + $0x151] sm:$0xff] %vm388_vm0, %v381_v23  ;;  %v3762_v35 = vld [vmem:[%s6293_s3 + $0x1d0] sm:$0xff] }
  0x5d   : > { %527 = vrot.lane.b32.xlu1 %v442_v36, %s4186_s14  ;;  %399 = vst.msk [vmem:[#allocation2 + $0x91] sm:$0xff] %vm388_vm0, %v365_v28  ;;  %v3780_v36 = vld [vmem:[%s6293_s3 + $0x260] sm:$0xff]  ;;  %v656_v37 = vld [vmem:[%s6293_s3 + $0x50] sm:$0xff]  ;;  %1185 = vmatpush.msrb.mxu3 %v3762_v35  ;;  %v384_v28 = vld [vmem:[%s4331_s26 + $0xe8] sm:$0xff] }
  0x5e   : > { %400 = vst.msk [vmem:[#allocation2 + $0x99] sm:$0xff] %vm388_vm0, %v366_v32  ;;  %1377 = vmatpush.msrb.mxu0 %v3780_v36  ;;  %829 = vmatpush.msrb.mxu1 %v656_v37  ;;  %v3774_v23 = vld [vmem:[%s6293_s3 + $0x230] sm:$0xff]  ;;  %v360_v35 = vld [vmem:[%s4331_s26 + $0x28] sm:$0xff] }
  0x5f   : > { %391 = vst.msk [vmem:[#allocation2 + $0x31] sm:$0xff] %vm388_vm0, %v357_v39  ;;  %1186 = vmatpush.msrb.mxu3 %v3761_v47  ;;  %v368_v37 = vld [vmem:[%s4331_s26 + $0x68] sm:$0xff]  ;;  %v648_v47 = vld [vmem:[%s6293_s3 + $0x10] sm:$0xff] }
  0x60   : > { %416 = vst.msk [vmem:[#allocation2 + $0x159] sm:$0xff] %vm388_vm0, %v382_v45  ;;  %830 = vmatpush.msrb.mxu1 %v655_v49  ;;  %v3773_v39 = vld [vmem:[%s6293_s3 + $0x228] sm:$0xff]  ;;  %v3772_v45 = vld [vmem:[%s6293_s3 + $0x220] sm:$0xff] }
  0x61   : > { %1187 = vmatpush.msrb.mxu3 %v3760_v51  ;;  %409 = vst.msk [vmem:[#allocation2 + $0x109] sm:$0xff] %vm388_vm0, %v375_v55  ;;  %v3753_v55 = vld [vmem:[%s6293_s3 + $0x188] sm:$0xff] }
  0x62   : > { %831 = vmatpush.msrb.mxu1 %v654_v53  ;;  %417 = vst.msk [vmem:[#allocation2 + $0x169] sm:$0xff] %vm388_vm0, %v383_v61  ;;  %v3752_v61 = vld [vmem:[%s6293_s3 + $0x180] sm:$0xff] }
  0x63   : > { %1188 = vmatpush.msrb.mxu3 %v3759_v0  ;;  %392 = vst.msk [vmem:[#allocation2 + $0x39] sm:$0xff] %vm388_vm0, %v358_v63  ;;  %v646_v63 = vld [vmem:[%s6293_s3] sm:$0xff]  ;;  %v3815_v0 = vld [vmem:[%s6293_s3 + $0x378] sm:$0xff] }
  0x64   : > { %543 = vrot.lane.b32.xlu0 %v450_v41, %s4186_s14  ;;  %495 = vrot.lane.b32.xlu2 %v426_v43, %s4186_s14  ;;  %401 = vst.msk [vmem:[#allocation2 + $0xa9] sm:$0xff] %vm388_vm0, %v367_v8  ;;  %v3799_v8 = vld [vmem:[%s6293_s3 + $0x2f8] sm:$0xff] }
  0x65   : > { %511 = vrot.lane.b32.xlu1 %v434_v42, %s4186_s14  ;;  %832 = vmatpush.msrb.mxu1 %v653_v2  ;;  %393 = vst.msk [vmem:[#allocation2 + $0x49] sm:$0xff] %vm388_vm0, %v359_v14 }
  0x66   : > { %1189 = vmatpush.msrb.mxu3 %v3758_v4  ;;  %410 = vst.msk [vmem:[#allocation2 + $0x111] sm:$0xff] %vm388_vm0, %v376_v16  ;;  %v3847_v16 = vld [vmem:[%s6293_s3 + $0x478] sm:$0xff] }
  0x67   : > { %833 = vmatpush.msrb.mxu1 %v652_v6  ;;  %418 = vst.msk [vmem:[#allocation2 + $0x171] sm:$0xff] %vm388_vm0, %v384_v28 }
  0x68   : > { %1190 = vmatpush.msrb.mxu3 %v3757_v17  ;;  %394 = vst.msk [vmem:[#allocation2 + $0x51] sm:$0xff] %vm388_vm0, %v360_v35  ;;  %v3814_v17 = vld [vmem:[%s6293_s3 + $0x370] sm:$0xff] }
  0x69   : > { %834 = vmatpush.msrb.mxu1 %v651_v19  ;;  %402 = vst.msk [vmem:[#allocation2 + $0xb1] sm:$0xff] %vm388_vm0, %v368_v37  ;;  %v3846_v35 = vld [vmem:[%s6293_s3 + $0x470] sm:$0xff] }
  0x6a   : > { %1191 = vmatpush.msrb.mxu3 %v3756_v22  ;;  %v938_v37 = vld [vmem:[#allocation2 + $0xa] sm:$0xff] }
  0x6c   : > { %1192 = vmatpush.msrb.mxu3 %v3755_v38 }
  0x76   : > { %v532_v48 = vpop.permute.xlu2 %531 }
  0x77   : > { %605 = vst.msk [vmem:[#allocation2 + $0x129] sm:$0xff] %vm581_vm1, %v532_v48  ;;  %v3779_v48 = vld [vmem:[%s6293_s3 + $0x258] sm:$0xff] }
  0x78   : > { %1378 = vmatpush.msrb.mxu0 %v3779_v48  ;;  %v3736_v48 = vld [vmem:[%s6293_s3 + $0x100] sm:$0xff] }
  0x7e   : > { %v500_v52 = vpop.permute.xlu2 %499  ;;  %v687_v60 = vld [vmem:[#allocation2 + $0x129] sm:$0xff] }
  0x7f   : > { %589 = vst.msk [vmem:[#allocation2 + $0x69] sm:$0xff] %vm581_vm1, %v500_v52  ;;  %v3778_v52 = vld [vmem:[%s6293_s3 + $0x250] sm:$0xff] }
  0x80   : > { %1379 = vmatpush.msrb.mxu0 %v3778_v52 }
  0x82   : > { %1380 = vmatpush.msrb.mxu0 %v3777_v1 }
  0x84   : > { %1381 = vmatpush.msrb.mxu0 %v3776_v5  ;;  %v3768_v5 = vld [vmem:[%s6293_s3 + $0x200] sm:$0xff] }
  0x86   : > { %v502_v62 = vpop.permute.xlu2 %501  ;;  %v4577_v40 = vld [vmem:[#allocation2 + $0x69] sm:$0xff]  ;;  %1382 = vmatpush.msrb.mxu0 %v3775_v18 }
  0x87   : > { %590 = vst.msk [vmem:[#allocation2 + $0x79] sm:$0xff] %vm581_vm1, %v502_v62 }
  0x88   : > { %1383 = vmatpush.msrb.mxu0 %v3774_v23 }
  0x8a   : > { %1384 = vmatpush.msrb.mxu0 %v3773_v39  ;;  %v3829_v39 = vld [vmem:[%s6293_s3 + $0x3e8] sm:$0xff] }
  0x8c   : > { %1385 = vmatpush.msrb.mxu0 %v3772_v45  ;;  %v3812_v45 = vld [vmem:[%s6293_s3 + $0x360] sm:$0xff] }
  0x8e   : > { %v514_v9 = vpop.permute.xlu0 %513  ;;  %v536_v12 = vpop.permute.xlu2 %535  ;;  %v4614_v56 = vld [vmem:[#allocation2 + $0x79] sm:$0xff] }
  0x8f   : > { %v498_v10 = vpop.permute.xlu1 %497  ;;  %596 = vst.msk [vmem:[#allocation2 + $0xc1] sm:$0xff] %vm581_vm1, %v514_v9 }
  0x90   : > { %588 = vst.msk [vmem:[#allocation2 + $0x61] sm:$0xff] %vm581_vm1, %v498_v10 }
  0x91   : > { %607 = vst.msk [vmem:[#allocation2 + $0x141] sm:$0xff] %vm581_vm1, %v536_v12 }
  0x96   : > { %v530_v24 = vpop.permute.xlu0 %529  ;;  %v4538_v26 = vld [vmem:[#allocation2 + $0xc1] sm:$0xff]  ;;  %v488_v29 = vpop.permute.xlu2 %487 }
  0x97   : > { %v516_v25 = vpop.permute.xlu1 %515  ;;  %604 = vst.msk [vmem:[#allocation2 + $0x121] sm:$0xff] %vm581_vm1, %v530_v24  ;;  %775 = vmatmul.f32.vlgmr.msra.gmra.mxu2 %v4538_v26  ;;  %v4542_v27 = vld [vmem:[#allocation2 + $0x61] sm:$0xff] }
  0x98   : > { %597 = vst.msk [vmem:[#allocation2 + $0xc9] sm:$0xff] %vm581_vm1, %v516_v25  ;;  %751 = vmatmul.f32.vlgmr.msra.gmra.mxu1 %v4542_v27  ;;  %v650_v24 = vld [vmem:[%s6293_s3 + $0x20] sm:$0xff]  ;;  %v3739_v25 = vld [vmem:[%s6293_s3 + $0x118] sm:$0xff] }
  0x99   : > { %583 = vst.msk [vmem:[#allocation2 + $0x21] sm:$0xff] %vm581_vm1, %v488_v29  ;;  %v689_v29 = vld [vmem:[#allocation2 + $0x141] sm:$0xff]  ;;  %835 = vmatpush.msrb.mxu1 %v650_v24  ;;  %998 = vmatpush.msrb.mxu2 %v3739_v25  ;;  %v3830_v24 = vld [vmem:[%s6293_s3 + $0x3f0] sm:$0xff] }
  0x9a   : > { %v3798_v25 = vld [vmem:[%s6293_s3 + $0x2f0] sm:$0xff] }
  0x9e   : > { %v518_v41 = vpop.permute.xlu0 %517  ;;  %v686_v43 = vld [vmem:[#allocation2 + $0x121] sm:$0xff]  ;;  %v524_v46 = vpop.permute.xlu2 %523 }
  0x9f   : > { %v534_v42 = vpop.permute.xlu1 %533  ;;  %598 = vst.msk [vmem:[#allocation2 + $0xd9] sm:$0xff] %vm581_vm1, %v518_v41  ;;  %v4580_v44 = vld [vmem:[#allocation2 + $0xc9] sm:$0xff]  ;;  %799 = vmatmul.f32.vlgmr.msra.gmra.mxu3 %v686_v43  ;;  %v649_v41 = vld [vmem:[%s6293_s3 + $0x18] sm:$0xff] }
  0xa0   : > { %606 = vst.msk [vmem:[#allocation2 + $0x139] sm:$0xff] %vm581_vm1, %v534_v42  ;;  %778 = vmatmul.f32.gmra.mxu2 %v4580_v44  ;;  %754 = vmatmul.f32.gmra.mxu1 %v4577_v40  ;;  %v4692_v30 = vld [vmem:[#allocation2 + $0x21] sm:$0xff]  ;;  %v3738_v42 = vld [vmem:[%s6293_s3 + $0x110] sm:$0xff] }
  0xa1   : > { %601 = vst.msk [vmem:[#allocation2 + $0xf9] sm:$0xff] %vm581_vm1, %v524_v46  ;;  %v3754_v43 = vld [vmem:[%s6293_s3 + $0x190] sm:$0xff]  ;;  %836 = vmatpush.msrb.mxu1 %v649_v41  ;;  %999 = vmatpush.msrb.mxu2 %v3738_v42  ;;  %v3737_v46 = vld [vmem:[%s6293_s3 + $0x108] sm:$0xff] }
  0xa2   : > { %1193 = vmatpush.msrb.mxu3 %v3754_v43  ;;  %v3797_v41 = vld [vmem:[%s6293_s3 + $0x2e8] sm:$0xff] }
  0xa3   : > { %1000 = vmatpush.msrb.mxu2 %v3737_v46  ;;  %837 = vmatpush.msrb.mxu1 %v648_v47  ;;  %v3796_v47 = vld [vmem:[%s6293_s3 + $0x2e0] sm:$0xff] }
  0xa4   : > { %1194 = vmatpush.msrb.mxu3 %v3753_v55 }
  0xa5   : > { %1001 = vmatpush.msrb.mxu2 %v3736_v48 }
  0xa6   : > { %v520_v57 = vpop.permute.xlu0 %519  ;;  %v4616_v59 = vld [vmem:[#allocation2 + $0xd9] sm:$0xff]  ;;  %v508_v62 = vpop.permute.xlu2 %507  ;;  %1195 = vmatpush.msrb.mxu3 %v3752_v61 }
  0xa7   : > { %v486_v58 = vpop.permute.xlu1 %485  ;;  %599 = vst.msk [vmem:[#allocation2 + $0xe1] sm:$0xff] %vm581_vm1, %v520_v57  ;;  %802 = vmatmul.f32.gmra.mxu3 %v687_v60  ;;  %v688_v12 = vld [vmem:[#allocation2 + $0x139] sm:$0xff]  ;;  %v3770_v60 = vld [vmem:[%s6293_s3 + $0x210] sm:$0xff]  ;;  %1763 = vmatpush.msra.mxu2 %v3815_v0 }
  0xa8   : > { %582 = vst.msk [vmem:[#allocation2 + $0x19] sm:$0xff] %vm581_vm1, %v486_v58  ;;  %781 = vmatmul.f32.gmra.mxu2 %v4616_v59  ;;  %757 = vmatmul.f32.gmra.mxu1 %v4614_v56  ;;  %v4735_v49 = vld [vmem:[#allocation2 + $0xf9] sm:$0xff]  ;;  %v647_v58 = vld [vmem:[%s6293_s3 + $0x8] sm:$0xff] }
  0xa9   : > { %593 = vst.msk [vmem:[#allocation2 + $0x99] sm:$0xff] %vm581_vm1, %v508_v62  ;;  %v3771_v57 = vld [vmem:[%s6293_s3 + $0x218] sm:$0xff]  ;;  %838 = vmatpush.msrb.mxu1 %v647_v58  ;;  %v3769_v62 = vld [vmem:[%s6293_s3 + $0x208] sm:$0xff]  ;;  %1957 = vmatpush.msra.mxu3 %v3831_v7  ;;  %v4892_v0 = vld [vmem:[#allocation2 + $0x60] sm:$0xff] }
  0xaa   : > { %1386 = vmatpush.msrb.mxu0 %v3771_v57  ;;  %1764 = vmatpush.msra.mxu2 %v3814_v17  ;;  %v3827_v57 = vld [vmem:[%s6293_s3 + $0x3d8] sm:$0xff] }
  0xab   : > { %839 = vmatpush.msrb.mxu1 %v646_v63  ;;  %1958 = vmatpush.msra.mxu3 %v3830_v24  ;;  %v3795_v58 = vld [vmem:[%s6293_s3 + $0x2d8] sm:$0xff]  ;;  %v3810_v63 = vld [vmem:[%s6293_s3 + $0x350] sm:$0xff]  ;;  %v3793_v24 = vld [vmem:[%s6293_s3 + $0x2c8] sm:$0xff] }
  0xac   : > { %1387 = vmatpush.msrb.mxu0 %v3770_v60 }
  0xad   : > { %1568 = vmatpush.msra.mxu1 %v3799_v8  ;;  %1959 = vmatpush.msra.mxu3 %v3829_v39  ;;  %v1138_v8 = vld [vmem:[#allocation2 + $0x68] sm:$0xff] }
  0xae   : > { %v504_v9 = vpop.permute.xlu0 %503  ;;  %v4653_v11 = vld [vmem:[#allocation2 + $0xe1] sm:$0xff]  ;;  %v542_v15 = vpop.permute.xlu2 %541  ;;  %1388 = vmatpush.msrb.mxu0 %v3769_v62  ;;  %v3843_v62 = vld [vmem:[%s6293_s3 + $0x458] sm:$0xff] }
  0xaf   : > { %v522_v10 = vpop.permute.xlu1 %521  ;;  %591 = vst.msk [vmem:[#allocation2 + $0x81] sm:$0xff] %vm581_vm1, %v504_v9  ;;  %805 = vmatmul.f32.gmra.mxu3 %v688_v12  ;;  %v4656_v13 = vld [vmem:[#allocation2 + $0x19] sm:$0xff]  ;;  %1569 = vmatpush.msra.mxu1 %v3798_v25 }
  0xb0   : > { %600 = vst.msk [vmem:[#allocation2 + $0xf1] sm:$0xff] %vm581_vm1, %v522_v10  ;;  %784 = vmatmul.f32.gmra.mxu2 %v4653_v11  ;;  %733 = vmatmul.f32.gmra.mxu0 %v4656_v13  ;;  %v4768_v1 = vld [vmem:[#allocation2 + $0x99] sm:$0xff] }
  0xb1   : > { %610 = vst.msk [vmem:[#allocation2 + $0x169] sm:$0xff] %vm581_vm1, %v542_v15  ;;  %1389 = vmatpush.msrb.mxu0 %v3768_v5  ;;  %v1131_v38 = vld [vmem:[#allocation2 + $0x18] sm:$0xff]  ;;  %1570 = vmatpush.msra.mxu1 %v3797_v41  ;;  %v1132_v42 = vld [vmem:[#allocation2 + $0x20] sm:$0xff] }
  0xb2   : > { %v939_v43 = vld [vmem:[#allocation2 + $0x1a] sm:$0xff] }
  0xb3   : > { %2151 = vmatpush.msra.mxu0 %v3847_v16  ;;  %1571 = vmatpush.msra.mxu1 %v3796_v47  ;;  %v3809_v16 = vld [vmem:[%s6293_s3 + $0x348] sm:$0xff] }
  0xb5   : > { %2152 = vmatpush.msra.mxu0 %v3846_v35  ;;  %1572 = vmatpush.msra.mxu1 %v3795_v58  ;;  %v3841_v35 = vld [vmem:[%s6293_s3 + $0x448] sm:$0xff] }
  0xb6   : > { %v538_v31 = vpop.permute.xlu0 %537  ;;  %v4694_v33 = vld [vmem:[#allocation2 + $0x81] sm:$0xff]  ;;  %v494_v36 = vpop.permute.xlu2 %493 }
  0xb7   : > { %v506_v32 = vpop.permute.xlu1 %505  ;;  %608 = vst.msk [vmem:[#allocation2 + $0x151] sm:$0xff] %vm581_vm1, %v538_v31  ;;  %760 = vmatmul.f32.gmra.mxu1 %v4694_v33  ;;  %808 = vmatmul.f32.gmra.mxu3 %v689_v29  ;;  %v4698_v34 = vld [vmem:[#allocation2 + $0xf1] sm:$0xff]  ;;  %v937_v31 = vld [vmem:[#allocation2 + $0x2] sm:$0xff] }
  0xb8   : > { %592 = vst.msk [vmem:[#allocation2 + $0x91] sm:$0xff] %vm581_vm1, %v506_v32  ;;  %787 = vmatmul.f32.gmra.mxu2 %v4698_v34  ;;  %736 = vmatmul.f32.gmra.mxu0 %v4692_v30  ;;  %v4785_v9 = vld [vmem:[#allocation2 + $0x169] sm:$0xff] }
  0xb9   : > { %586 = vst.msk [vmem:[#allocation2 + $0x49] sm:$0xff] %vm581_vm1, %v494_v36  ;;  %v3813_v36 = vld [vmem:[%s6293_s3 + $0x368] sm:$0xff] }
  0xba   : > { %1765 = vmatpush.msra.mxu2 %v3813_v36  ;;  %v4907_v7 = vpop.f32.mrf.mxu0  ;;  %v948_v41 = vld [vmem:[#allocation2 + $0x82] sm:$0xff] }
  0xbc   : > { %1766 = vmatpush.msra.mxu2 %v3812_v45 }
  0xbe   : > { %v490_v50 = vpop.permute.xlu0 %489  ;;  %v690_v52 = vld [vmem:[#allocation2 + $0x151] sm:$0xff]  ;;  %v496_v54 = vpop.permute.xlu2 %495 }
  0xbf   : > { %v540_v51 = vpop.permute.xlu1 %539  ;;  %584 = vst.msk [vmem:[#allocation2 + $0x31] sm:$0xff] %vm581_vm1, %v490_v50  ;;  %811 = vmatmul.f32.gmra.mxu3 %v690_v52  ;;  %v4738_v53 = vld [vmem:[#allocation2 + $0x91] sm:$0xff] }
  0xc0   : > { %609 = vst.msk [vmem:[#allocation2 + $0x159] sm:$0xff] %vm581_vm1, %v540_v51  ;;  %763 = vmatmul.f32.gmra.mxu1 %v4738_v53  ;;  %790 = vmatmul.f32.gmra.mxu2 %v4735_v49  ;;  %v4802_v18 = vld [vmem:[#allocation2 + $0x49] sm:$0xff]  ;;  %v3844_v51 = vld [vmem:[%s6293_s3 + $0x460] sm:$0xff]  ;;  %v3811_v52 = vld [vmem:[%s6293_s3 + $0x358] sm:$0xff] }
  0xc1   : > { %587 = vst.msk [vmem:[#allocation2 + $0x51] sm:$0xff] %vm581_vm1, %v496_v54  ;;  %1767 = vmatpush.msra.mxu2 %v3811_v52  ;;  %v4870_v54 = vld [vmem:[#allocation2 + $0x48] sm:$0xff]  ;;  %v1141_v39 = vld [vmem:[#allocation2 + $0x90] sm:$0xff]  ;;  %v1142_v47 = vld [vmem:[#allocation2 + $0x98] sm:$0xff] }
  0xc2   : > { %v949_v52 = vld [vmem:[#allocation2 + $0x92] sm:$0xff] }
  0xc3   : > { %1768 = vmatpush.msra.mxu2 %v3810_v63 }
  0xc5   : > { %1769 = vmatpush.msra.mxu2 %v3809_v16 }
  0xc6   : > { %v526_v2 = vpop.permute.xlu0 %525  ;;  %v4770_v4 = vld [vmem:[#allocation2 + $0x31] sm:$0xff] }
  0xc7   : > { %v492_v3 = vpop.permute.xlu1 %491  ;;  %602 = vst.msk [vmem:[#allocation2 + $0x109] sm:$0xff] %vm581_vm1, %v526_v2  ;;  %739 = vmatmul.f32.gmra.mxu0 %v4770_v4  ;;  %v691_v6 = vld [vmem:[#allocation2 + $0x159] sm:$0xff]  ;;  %v4847_v46 = vld [vmem:[#allocation2 + $0x30] sm:$0xff] }
  0xc8   : > { %585 = vst.msk [vmem:[#allocation2 + $0x39] sm:$0xff] %vm581_vm1, %v492_v3  ;;  %814 = vmatmul.f32.gmra.mxu3 %v691_v6  ;;  %766 = vmatmul.f32.gmra.mxu1 %v4768_v1  ;;  %v4819_v28 = vld [vmem:[#allocation2 + $0x51] sm:$0xff] }
  0xc9   : > { %v4881_v60 = vld [vmem:[#allocation2 + $0x50] sm:$0xff] }
  0xca   : > { %v943_v61 = vld [vmem:[#allocation2 + $0x4a] sm:$0xff]  ;;  %v944_v2 = vld [vmem:[#allocation2 + $0x52] sm:$0xff] }
  0xcb   : > { %v3826_v3 = vld [vmem:[%s6293_s3 + $0x3d0] sm:$0xff] }
  0xce   : > { %v510_v10 = vpop.permute.xlu0 %509  ;;  %v4787_v14 = vld [vmem:[#allocation2 + $0x109] sm:$0xff] }
  0xcf   : > { %v528_v12 = vpop.permute.xlu1 %527  ;;  %594 = vst.msk [vmem:[#allocation2 + $0xa9] sm:$0xff] %vm581_vm1, %v510_v10  ;;  %v4790_v15 = vld [vmem:[#allocation2 + $0x39] sm:$0xff]  ;;  %793 = vmatmul.f32.gmra.mxu2 %v4787_v14  ;;  %v3842_v10 = vld [vmem:[%s6293_s3 + $0x450] sm:$0xff] }
  0xd0   : > { %603 = vst.msk [vmem:[#allocation2 + $0x111] sm:$0xff] %vm581_vm1, %v528_v12  ;;  %742 = vmatmul.f32.gmra.mxu0 %v4790_v15  ;;  %817 = vmatmul.f32.gmra.mxu3 %v4785_v9  ;;  %v4857_v48 = vld [vmem:[#allocation2 + $0x38] sm:$0xff] }
  0xd1   : > { %v4860_v50 = vld [vmem:[#allocation2 + $0x32] sm:$0xff]  ;;  %v942_v55 = vld [vmem:[#allocation2 + $0x3a] sm:$0xff] }
  0xd6   : > { %v544_v19 = vpop.permute.xlu0 %543  ;;  %v4804_v22 = vld [vmem:[#allocation2 + $0xa9] sm:$0xff] }
  0xd7   : > { %v512_v20 = vpop.permute.xlu1 %511  ;;  %611 = vst.msk [vmem:[#allocation2 + $0x171] sm:$0xff] %vm581_vm1, %v544_v19  ;;  %769 = vmatmul.f32.gmra.mxu1 %v4804_v22  ;;  %v4808_v23 = vld [vmem:[#allocation2 + $0x111] sm:$0xff] }
  0xd8   : > { %595 = vst.msk [vmem:[#allocation2 + $0xb1] sm:$0xff] %vm581_vm1, %v512_v20  ;;  %745 = vmatmul.f32.gmra.mxu0 %v4802_v18  ;;  %796 = vmatmul.f32.gmra.mxu2 %v4808_v23  ;;  %v946_v19 = vld [vmem:[#allocation2 + $0x6a] sm:$0xff] }
  0xd9   : > { %v3825_v20 = vld [vmem:[%s6293_s3 + $0x3c8] sm:$0xff] }
  0xde   : > { %v693_v29 = vld [vmem:[#allocation2 + $0x171] sm:$0xff] }
  0xdf   : > { %v4821_v32 = vld [vmem:[#allocation2 + $0xb1] sm:$0xff]  ;;  %820 = vmatmul.f32.gmra.mxu3 %v693_v29  ;;  %v1140_v29 = vld [vmem:[#allocation2 + $0x80] sm:$0xff] }
  0xe0   : > { %748 = vmatmul.f32.gmra.mxu0 %v4819_v28  ;;  %772 = vmatmul.f32.gmra.mxu1 %v4821_v32  ;;  %v951_v16 = vld [vmem:[#allocation2 + $0xaa] sm:$0xff] }
  0xe1   : > { %1002 = vmatmul.f32.vlgmr.msrb.gmra.mxu2 %v937_v31 }
  0xe7   : > { %1196 = vmatmul.f32.vlgmr.msrb.gmra.mxu3 %v1131_v38 }
  0xe8   : > { %840 = vmatmul.f32.vlgmr.msrb.gmra.mxu1 %v4187_v21  ;;  %1390 = vmatmul.f32.vlgmr.msrb.gmra.mxu0 %v4656_v13  ;;  %v3845_v13 = vld [vmem:[%s6293_s3 + $0x468] sm:$0xff] }
  0xe9   : > { %1005 = vmatmul.f32.gmra.mxu2 %v938_v37  ;;  %2153 = vmatpush.msra.mxu0 %v3845_v13 }
  0xeb   : > { %2154 = vmatpush.msra.mxu0 %v3844_v51 }
  0xed   : > { %2155 = vmatpush.msra.mxu0 %v3843_v62  ;;  %v3807_v62 = vld [vmem:[%s6293_s3 + $0x338] sm:$0xff] }
  0xef   : > { %1199 = vmatmul.f32.gmra.mxu3 %v1132_v42  ;;  %2156 = vmatpush.msra.mxu0 %v3842_v10  ;;  %v1144_v10 = vld [vmem:[#allocation2 + $0xb0] sm:$0xff] }
  0xf0   : > { %843 = vmatmul.f32.gmra.mxu1 %v4187_v21  ;;  %1393 = vmatmul.f32.gmra.mxu0 %v4692_v30  ;;  %v940_v21 = vld [vmem:[#allocation2 + $0x22] sm:$0xff] }
  0xf1   : > { %1008 = vmatmul.f32.gmra.mxu2 %v939_v43  ;;  %v3828_v30 = vld [vmem:[%s6293_s3 + $0x3e0] sm:$0xff]  ;;  %2157 = vmatpush.msra.mxu0 %v3841_v35  ;;  %v3806_v35 = vld [vmem:[%s6293_s3 + $0x330] sm:$0xff] }
  0xf2   : > { %1960 = vmatpush.msra.mxu3 %v3828_v30  ;;  %v3792_v43 = vld [vmem:[%s6293_s3 + $0x2c0] sm:$0xff]  ;;  %v452_v30 = vld [vmem:[%s4283_s13 + $0xf8] sm:$0xff] }
  0xf3   : > { %547 = vrot.lane.b32.xlu1 %v452_v30, %s4186_s14  ;;  %v953_v30 = vld [vmem:[#allocation2 + $0xc2] sm:$0xff] }
  0xf4   : > { %1961 = vmatpush.msra.mxu3 %v3827_v57 }
  0xf6   : > { %1962 = vmatpush.msra.mxu3 %v3826_v3  ;;  %v3823_v3 = vld [vmem:[%s6293_s3 + $0x3b8] sm:$0xff] }
  0xf7   : > { %1202 = vmatmul.f32.gmra.mxu3 %v4847_v46 }
  0xf8   : > { %846 = vmatmul.f32.gmra.mxu1 %v1131_v38  ;;  %1396 = vmatmul.f32.gmra.mxu0 %v4770_v4  ;;  %v3794_v4 = vld [vmem:[%s6293_s3 + $0x2d0] sm:$0xff]  ;;  %v3808_v38 = vld [vmem:[%s6293_s3 + $0x340] sm:$0xff] }
  0xf9   : > { %1011 = vmatmul.f32.gmra.mxu2 %v940_v21  ;;  %1573 = vmatpush.msra.mxu1 %v3794_v4  ;;  %v451_v21 = vld [vmem:[%s4283_s13 + $0xf0] sm:$0xff]  ;;  %v3791_v4 = vld [vmem:[%s6293_s3 + $0x2b8] sm:$0xff]  ;;  %s4189_s13 = smov 64  }
  0xfa   : > { %1963 = vmatpush.msra.mxu3 %v3825_v20  ;;  %1770 = vmatpush.msra.mxu2 %v3808_v38 }
  0xfb   : > { %1574 = vmatpush.msra.mxu1 %v3793_v24  ;;  %545 = vrot.lane.b32.xlu0 %v451_v21, %s4186_s14 }
  0xfc   : > { %1771 = vmatpush.msra.mxu2 %v3807_v62 }
  0xfd   : > { %1575 = vmatpush.msra.mxu1 %v3792_v43 }
  0xfe   : > { %1772 = vmatpush.msra.mxu2 %v3806_v35 }
  0xff   : > { %1205 = vmatmul.f32.gmra.mxu3 %v4857_v48  ;;  %1576 = vmatpush.msra.mxu1 %v3791_v4  ;;  %v3805_v4 = vld [vmem:[%s6293_s3 + $0x328] sm:$0xff] }
 0x100   : > { %849 = vmatmul.f32.gmra.mxu1 %v1132_v42  ;;  %1399 = vmatmul.f32.gmra.mxu0 %v4790_v15  ;;  %v3824_v42 = vld [vmem:[%s6293_s3 + $0x3c0] sm:$0xff] }
 0x101   : > { %1014 = vmatmul.f32.gmra.mxu2 %v4860_v50  ;;  %1964 = vmatpush.msra.mxu3 %v3824_v42 }
 0x102   : > { %1773 = vmatpush.msra.mxu2 %v3805_v4 }
 0x103   : > { %1965 = vmatpush.msra.mxu3 %v3823_v3  ;;  %v1147_v3 = vld [vmem:[#allocation2 + $0xd8] sm:$0xff] }
 0x107   : > { %1208 = vmatmul.f32.gmra.mxu3 %v4870_v54 }
 0x108   : > { %852 = vmatmul.f32.gmra.mxu1 %v4847_v46  ;;  %1402 = vmatmul.f32.gmra.mxu0 %v4802_v18  ;;  %v4923_v18 = vld [vmem:[#allocation2 + $0x78] sm:$0xff] }
 0x109   : > { %1017 = vmatmul.f32.gmra.mxu2 %v942_v55  ;;  %v3840_v55 = vld [vmem:[%s6293_s3 + $0x440] sm:$0xff] }
 0x10a   : > { %2158 = vmatpush.msra.mxu0 %v3840_v55 }
 0x10f   : > { %1211 = vmatmul.f32.gmra.mxu3 %v4881_v60 }
 0x110   : > { %855 = vmatmul.f32.gmra.mxu1 %v4857_v48  ;;  %1405 = vmatmul.f32.gmra.mxu0 %v4819_v28 }
 0x111   : > { %1020 = vmatmul.f32.gmra.mxu2 %v943_v61  ;;  %v1143_v61 = vld [vmem:[#allocation2 + $0xa8] sm:$0xff] }
 0x115   : > { %v4905_v6 = vpop.f32.mrf.mxu1 }
 0x117   : > { %1214 = vmatmul.f32.gmra.mxu3 %v4892_v0 }
 0x118   : > { %858 = vmatmul.f32.gmra.mxu1 %v4870_v54  ;;  %1408 = vmatmul.f32.gmra.mxu0 %v4542_v27  ;;  %v945_v27 = vld [vmem:[#allocation2 + $0x62] sm:$0xff] }
 0x119   : > { %1023 = vmatmul.f32.gmra.mxu2 %v944_v2 }
 0x11a   : > { %v4903_v5 = vpop.f32.mrf.mxu2 }
 0x11d   : > { %v4921_v17 = vpop.f32.mrf.mxu1 }
 0x11f   : > { %1217 = vmatmul.f32.gmra.mxu3 %v1138_v8 }
 0x120   : > { %861 = vmatmul.f32.gmra.mxu1 %v4881_v60  ;;  %1411 = vmatmul.f32.gmra.mxu0 %v4577_v40  ;;  %v4926_v40 = vpop.f32.mrf.mxu0 }
 0x121   : > { %1026 = vmatmul.f32.gmra.mxu2 %v945_v27 }
 0x122   : > { %v4914_v12 = vpop.f32.mrf.mxu3 }
 0x123   : > { %v4916_v15 = vpop.f32.mrf.mxu2 }
 0x125   : > { %v4940_v31 = vpop.f32.mrf.mxu1 }
 0x127   : > { %1220 = vmatmul.f32.gmra.mxu3 %v4923_v18 }
 0x128   : > { %864 = vmatmul.f32.gmra.mxu1 %v4892_v0  ;;  %1414 = vmatmul.f32.gmra.mxu0 %v4614_v56  ;;  %v947_v56 = vld [vmem:[#allocation2 + $0x7a] sm:$0xff] }
 0x129   : > { %1029 = vmatmul.f32.gmra.mxu2 %v946_v19  ;;  %v3839_v19 = vld [vmem:[%s6293_s3 + $0x438] sm:$0xff] }
 0x12a   : > { %v4936_v25 = vpop.f32.mrf.mxu3  ;;  %2159 = vmatpush.msra.mxu0 %v3839_v19 }
 0x12b   : > { %v4938_v28 = vpop.f32.mrf.mxu2 }
 0x12d   : > { %v4946_v36 = vpop.f32.mrf.mxu0 }
 0x12f   : > { %1223 = vmatmul.f32.gmra.mxu3 %v1140_v29 }
 0x130   : > { %867 = vmatmul.f32.gmra.mxu1 %v1138_v8  ;;  %1417 = vmatmul.f32.gmra.mxu0 %v4694_v33 }
 0x131   : > { %1032 = vmatmul.f32.gmra.mxu2 %v947_v56  ;;  %v1145_v56 = vld [vmem:[#allocation2 + $0xc0] sm:$0xff] }
 0x132   : > { %v4948_v37 = vpop.f32.mrf.mxu3 }
 0x133   : > { %v4953_v33 = vpop.f32.mrf.mxu2 }
 0x134   : > { %v4963_v13 = vpop.f32.mrf.mxu1 }
 0x135   : > { %v4965_v45 = vpop.f32.mrf.mxu0 }
 0x137   : > { %1226 = vmatmul.f32.gmra.mxu3 %v1141_v39 }
 0x138   : > { %870 = vmatmul.f32.gmra.mxu1 %v4923_v18  ;;  %1420 = vmatmul.f32.gmra.mxu0 %v4738_v53 }
 0x139   : > { %1035 = vmatmul.f32.gmra.mxu2 %v948_v41  ;;  %v3790_v41 = vld [vmem:[%s6293_s3 + $0x2b0] sm:$0xff] }
 0x13a   : > { %v4971_v53 = vpop.f32.mrf.mxu3  ;;  %1577 = vmatpush.msra.mxu1 %v3790_v41 }
 0x13b   : > { %v4973_v51 = vpop.f32.mrf.mxu2 }
 0x13d   : > { %v4979_v57 = vpop.f32.mrf.mxu1 }
 0x13f   : > { %1229 = vmatmul.f32.gmra.mxu3 %v1142_v47 }
 0x140   : > { %873 = vmatmul.f32.gmra.mxu1 %v1140_v29  ;;  %1423 = vmatmul.f32.gmra.mxu0 %v4768_v1  ;;  %v950_v1 = vld [vmem:[#allocation2 + $0x9a] sm:$0xff] }
 0x141   : > { %1038 = vmatmul.f32.gmra.mxu2 %v949_v52 }
 0x142   : > { %v4986_v63 = vpop.f32.mrf.mxu3 }
 0x143   : > { %v4989_v2 = vpop.f32.mrf.mxu2 }
 0x144   : > { %v4981_v58 = vpop.f32.mrf.mxu0 }
 0x145   : > { %v4997_v8 = vpop.f32.mrf.mxu1 }
 0x147   : > { %1232 = vmatmul.f32.gmra.mxu3 %v1143_v61 }
 0x148   : > { %876 = vmatmul.f32.gmra.mxu1 %v1141_v39  ;;  %1426 = vmatmul.f32.gmra.mxu0 %v4804_v22  ;;  %v3822_v39 = vld [vmem:[%s6293_s3 + $0x3b0] sm:$0xff] }
 0x149   : > { %1041 = vmatmul.f32.gmra.mxu2 %v950_v1  ;;  %1966 = vmatpush.msra.mxu3 %v3822_v39 }
 0x14b   : > { %v5001_v22 = vpop.f32.mrf.mxu3 }
 0x14d   : > { %v4999_v27 = vpop.f32.mrf.mxu0 }
 0x14f   : > { %1235 = vmatmul.f32.gmra.mxu3 %v1144_v10 }
 0x150   : > { %879 = vmatmul.f32.gmra.mxu1 %v1142_v47  ;;  %1429 = vmatmul.f32.gmra.mxu0 %v4821_v32  ;;  %v952_v32 = vld [vmem:[#allocation2 + $0xb2] sm:$0xff] }
 0x151   : > { %1044 = vmatmul.f32.gmra.mxu2 %v951_v16  ;;  %v3838_v47 = vld [vmem:[%s6293_s3 + $0x430] sm:$0xff]  ;;  %v3821_v16 = vld [vmem:[%s6293_s3 + $0x3a8] sm:$0xff] }
 0x152   : > { %v5007_v20 = vpop.f32.mrf.mxu2  ;;  %2160 = vmatpush.msra.mxu0 %v3838_v47  ;;  %1967 = vmatpush.msra.mxu3 %v3821_v16  ;;  %v955_v47 = vld [vmem:[#allocation2 + $0xda] sm:$0xff] }
 0x153   : > { %v5017_v38 = vpop.f32.mrf.mxu3 }
 0x154   : > { %v5009_v24 = vpop.f32.mrf.mxu1 }
 0x155   : > { %v5011_v29 = vpop.f32.mrf.mxu0 }
 0x157   : > { %1238 = vmatmul.f32.gmra.mxu3 %v1145_v56 }
 0x158   : > { %882 = vmatmul.f32.gmra.mxu1 %v1143_v61  ;;  %1432 = vmatmul.f32.gmra.mxu0 %v4538_v26  ;;  %v1146_v26 = vld [vmem:[#allocation2 + $0xc8] sm:$0xff] }
 0x159   : > { %1047 = vmatmul.f32.gmra.mxu2 %v952_v32 }
 0x15b   : > { %v5025_v42 = vpop.f32.mrf.mxu2 }
 0x15d   : > { %v5027_v43 = vpop.f32.mrf.mxu0  ;;  %v5029_v21 = vpop.f32.mrf.mxu1 }
 0x15f   : > { %1241 = vmatmul.f32.gmra.mxu3 %v1146_v26 }
 0x160   : > { %885 = vmatmul.f32.gmra.mxu1 %v1144_v10  ;;  %1435 = vmatmul.f32.gmra.mxu0 %v4580_v44  ;;  %v954_v44 = vld [vmem:[#allocation2 + $0xca] sm:$0xff] }
 0x161   : > { %1050 = vmatmul.f32.gmra.mxu2 %v953_v30  ;;  %v1148_v30 = vld [vmem:[#allocation2 + $0xe0] sm:$0xff] }
 0x162   : > { %v5035_v52 = vpop.f32.mrf.mxu3 }
 0x164   : > { %v1003_v55 = vpop.f32.mrf.mxu2 }
 0x165   : > { %v841_v61 = vpop.f32.mrf.mxu1  ;;  %v1391_v62 = vpop.f32.mrf.mxu0 }
 0x166   : > { %v842_v1 = vadd.f32 %v841_v61, %v4907_v7  ;;  %v3789_v7 = vld [vmem:[%s6293_s3 + $0x2a8] sm:$0xff] }
 0x167   : > { %1244 = vmatmul.f32.gmra.mxu3 %v1147_v3  ;;  %1578 = vmatpush.msra.mxu1 %v3789_v7  ;;  %v3837_v61 = vld [vmem:[%s6293_s3 + $0x428] sm:$0xff] }
 0x168   : > { %888 = vmatmul.f32.gmra.mxu1 %v1145_v56  ;;  %1438 = vmatmul.f32.gmra.mxu0 %v4616_v59  ;;  %v1099_v10 = vadd.f32 %v1003_v55, %v842_v1  ;;  %v956_v7 = vld [vmem:[#allocation2 + $0xe2] sm:$0xff] }
 0x169   : > { %1053 = vmatmul.f32.gmra.mxu2 %v954_v44  ;;  %2161 = vmatpush.msra.mxu0 %v3837_v61  ;;  %v957_v61 = vld [vmem:[#allocation2 + $0xf2] sm:$0xff] }
 0x16a   : > { %v1197_v19 = vpop.f32.mrf.mxu3 }
 0x16b   : > { %v1293_v35 = vadd.f32 %v1197_v19, %v1099_v10 }
 0x16c   : > { %v1006_v32 = vpop.f32.mrf.mxu2 }
 0x16d   : > { %v844_v39 = vpop.f32.mrf.mxu1  ;;  %v1394_v56 = vpop.f32.mrf.mxu0  ;;  %v5048_v41 = vadd.f32 %v1391_v62, %v1293_v35  ;;  %v3820_v35 = vld [vmem:[%s6293_s3 + $0x3a0] sm:$0xff] }
 0x16e   : > { %v845_v59 = vadd.f32 %v844_v39, %v4926_v40  ;;  %1968 = vmatpush.msra.mxu3 %v3820_v35 }
 0x16f   : > { %1247 = vmatmul.f32.gmra.mxu3 %v1148_v30 }
 0x170   : > { %891 = vmatmul.f32.gmra.mxu1 %v1146_v26  ;;  %1441 = vmatmul.f32.gmra.mxu0 %v4653_v11  ;;  %v1100_v55 = vadd.f32 %v1006_v32, %v845_v59  ;;  %v1149_v26 = vld [vmem:[#allocation2 + $0xf0] sm:$0xff]  ;;  %v3804_v11 = vld [vmem:[%s6293_s3 + $0x320] sm:$0xff] }
 0x171   : > { %1056 = vmatmul.f32.gmra.mxu2 %v955_v47 }
 0x172   : > { %v1200_v1 = vpop.f32.mrf.mxu3  ;;  %1774 = vmatpush.msra.mxu2 %v3804_v11 }
 0x173   : > { %v1294_v4 = vadd.f32 %v1200_v1, %v1100_v55  ;;  %v1150_v55 = vld [vmem:[#allocation2 + $0xf8] sm:$0xff] }
 0x174   : > { %v1009_v44 = vpop.f32.mrf.mxu2 }
 0x175   : > { %v847_v62 = vpop.f32.mrf.mxu1  ;;  %v1397_v10 = vpop.f32.mrf.mxu0  ;;  %v5055_v16 = vadd.f32 %v1394_v56, %v1294_v4  ;;  %v3836_v4 = vld [vmem:[%s6293_s3 + $0x420] sm:$0xff] }
 0x176   : > { %v848_v40 = vadd.f32 %v847_v62, %v4946_v36  ;;  %v3788_v36 = vld [vmem:[%s6293_s3 + $0x2a0] sm:$0xff]  ;;  %2162 = vmatpush.msra.mxu0 %v3836_v4 }
 0x177   : > { %1250 = vmatmul.f32.gmra.mxu3 %v1149_v26  ;;  %1579 = vmatpush.msra.mxu1 %v3788_v36  ;;  %v3819_v36 = vld [vmem:[%s6293_s3 + $0x398] sm:$0xff] }
 0x178   : > { %894 = vmatmul.f32.gmra.mxu1 %v1147_v3  ;;  %1444 = vmatmul.f32.gmra.mxu0 %v4698_v34  ;;  %v1101_v19 = vadd.f32 %v1009_v44, %v848_v40 }
 0x179   : > { %1059 = vmatmul.f32.gmra.mxu2 %v956_v7  ;;  %v1151_v7 = vld [vmem:[#allocation2 + $0x108] sm:$0xff]  ;;  %1969 = vmatpush.msra.mxu3 %v3819_v36 }
 0x17a   : > { %v1203_v32 = vpop.f32.mrf.mxu3 }
 0x17b   : > { %v1295_v39 = vadd.f32 %v1203_v32, %v1101_v19  ;;  %v958_v19 = vld [vmem:[#allocation2 + $0xfa] sm:$0xff] }
 0x17c   : > { %v1012_v56 = vpop.f32.mrf.mxu2 }
 0x17d   : > { %v850_v59 = vpop.f32.mrf.mxu1  ;;  %v1400_v3 = vpop.f32.mrf.mxu0  ;;  %v5068_v47 = vadd.f32 %v1397_v10, %v1295_v39 }
 0x17e   : > { %v851_v34 = vadd.f32 %v850_v59, %v4965_v45 }
 0x17f   : > { %1253 = vmatmul.f32.gmra.mxu3 %v1150_v55 }
 0x180   : > { %897 = vmatmul.f32.gmra.mxu1 %v1148_v30  ;;  %1447 = vmatmul.f32.gmra.mxu0 %v4735_v49  ;;  %v1102_v1 = vadd.f32 %v1012_v56, %v851_v34  ;;  %v3803_v49 = vld [vmem:[%s6293_s3 + $0x318] sm:$0xff]  ;;  %v959_v34 = vld [vmem:[#allocation2 + $0x10a] sm:$0xff] }
 0x181   : > { %1062 = vmatmul.f32.gmra.mxu2 %v957_v61 }
 0x182   : > { %v1206_v44 = vpop.f32.mrf.mxu3  ;;  %1775 = vmatpush.msra.mxu2 %v3803_v49  ;;  %v960_v49 = vld [vmem:[#allocation2 + $0x112] sm:$0xff] }
 0x183   : > { %v1296_v62 = vadd.f32 %v1206_v44, %v1102_v1  ;;  %v3835_v1 = vld [vmem:[%s6293_s3 + $0x418] sm:$0xff] }
 0x184   : > { %v1015_v40 = vpop.f32.mrf.mxu2  ;;  %2163 = vmatpush.msra.mxu0 %v3835_v1 }
 0x185   : > { %v853_v10 = vpop.f32.mrf.mxu1  ;;  %v5075_v11 = vpop.f32.mrf.mxu0  ;;  %v5077_v45 = vadd.f32 %v1400_v3, %v1296_v62  ;;  %v1152_v3 = vld [vmem:[#allocation2 + $0x110] sm:$0xff] }
 0x186   : > { %v854_v30 = vadd.f32 %v853_v10, %v4981_v58  ;;  %v3787_v58 = vld [vmem:[%s6293_s3 + $0x298] sm:$0xff] }
 0x187   : > { %1256 = vmatmul.f32.gmra.mxu3 %v1151_v7  ;;  %1580 = vmatpush.msra.mxu1 %v3787_v58 }
 0x188   : > { %900 = vmatmul.f32.gmra.mxu1 %v1149_v26  ;;  %1450 = vmatmul.f32.gmra.mxu0 %v4787_v14  ;;  %v1103_v35 = vadd.f32 %v1015_v40, %v854_v30  ;;  %v1153_v30 = vld [vmem:[#allocation2 + $0x120] sm:$0xff] }
 0x189   : > { %1065 = vmatmul.f32.gmra.mxu2 %v958_v19 }
 0x18a   : > { %v1209_v32 = vpop.f32.mrf.mxu3 }
 0x18b   : > { %v1297_v39 = vadd.f32 %v1209_v32, %v1103_v35  ;;  %v3818_v35 = vld [vmem:[%s6293_s3 + $0x390] sm:$0xff] }
 0x18c   : > { %v1018_v56 = vpop.f32.mrf.mxu2  ;;  %1970 = vmatpush.msra.mxu3 %v3818_v35  ;;  %v1349_v35 = vld [vmem:[#allocation2 + $0x139] sm:$0xff] }
 0x18d   : > { %v856_v59 = vpop.f32.mrf.mxu1  ;;  %v5090_v26 = vpop.f32.mrf.mxu0 }
 0x18e   : > { %v857_v14 = vadd.f32 %v856_v59, %v4999_v27 }
 0x18f   : > { %1259 = vmatmul.f32.gmra.mxu3 %v1152_v3 }
 0x190   : > { %903 = vmatmul.f32.gmra.mxu1 %v1150_v55  ;;  %1453 = vmatmul.f32.gmra.mxu0 %v4808_v23  ;;  %v1104_v61 = vadd.f32 %v1018_v56, %v857_v14  ;;  %v3802_v23 = vld [vmem:[%s6293_s3 + $0x310] sm:$0xff]  ;;  %v1347_v55 = vld [vmem:[#allocation2 + $0x121] sm:$0xff] }
 0x191   : > { %1068 = vmatmul.f32.gmra.mxu2 %v959_v34  ;;  %v1154_v14 = vld [vmem:[#allocation2 + $0x128] sm:$0xff] }
 0x192   : > { %v1212_v4 = vpop.f32.mrf.mxu3  ;;  %1776 = vmatpush.msra.mxu2 %v3802_v23  ;;  %v1348_v34 = vld [vmem:[#allocation2 + $0x129] sm:$0xff] }
 0x193   : > { %v1298_v44 = vadd.f32 %v1212_v4, %v1104_v61  ;;  %v961_v61 = vld [vmem:[#allocation2 + $0x122] sm:$0xff]  ;;  %v3834_v4 = vld [vmem:[%s6293_s3 + $0x410] sm:$0xff] }
 0x194   : > { %v1021_v62 = vpop.f32.mrf.mxu2  ;;  %2164 = vmatpush.msra.mxu0 %v3834_v4  ;;  %v385_v4 = vld [vmem:[%s4331_s26 + $0xf0] sm:$0xff] }
 0x195   : > { %v859_v40 = vpop.f32.mrf.mxu1  ;;  %v5097_v10 = vpop.f32.mrf.mxu0  ;;  %419 = vst.msk [vmem:[#allocation2 + $0x181] sm:$0xff] %vm388_vm0, %v385_v4  ;;  %v3816_v4 = vld [vmem:[%s6293_s3 + $0x380] sm:$0xff] }
 0x196   : > { %v860_v27 = vadd.f32 %v859_v40, %v5011_v29  ;;  %v3786_v29 = vld [vmem:[%s6293_s3 + $0x290] sm:$0xff] }
 0x197   : > { %1262 = vmatmul.f32.gmra.mxu3 %v1153_v30  ;;  %1581 = vmatpush.msra.mxu1 %v3786_v29  ;;  %v962_v29 = vld [vmem:[#allocation2 + $0x12a] sm:$0xff] }
 0x198   : > { %906 = vmatmul.f32.gmra.mxu1 %v1151_v7  ;;  %1456 = vmatmul.f32.gmra.mxu0 %v1347_v55  ;;  %v1105_v19 = vadd.f32 %v1021_v62, %v860_v27  ;;  %v5120_v27 = vadd.f32 %v5075_v11, %v1297_v39  ;;  %v3817_v39 = vld [vmem:[%s6293_s3 + $0x388] sm:$0xff] }
 0x199   : > { %1071 = vmatmul.f32.gmra.mxu2 %v960_v49  ;;  %v1155_v49 = vld [vmem:[#allocation2 + $0x138] sm:$0xff]  ;;  %1971 = vmatpush.msra.mxu3 %v3817_v39 }
 0x19a   : > { %v1215_v36 = vpop.f32.mrf.mxu3 }
 0x19b   : > { %v5109_v58 = vadd.f32 %v1215_v36, %v1105_v19  ;;  %v3801_v19 = vld [vmem:[%s6293_s3 + $0x308] sm:$0xff]  ;;  %1972 = vmatpush.msra.mxu3 %v3816_v4  ;;  %v966_v4 = vld [vmem:[#allocation2 + $0x15a] sm:$0xff] }
 0x19c   : > { %v1024_v32 = vpop.f32.mrf.mxu2  ;;  %1777 = vmatpush.msra.mxu2 %v3801_v19  ;;  %v963_v19 = vld [vmem:[#allocation2 + $0x13a] sm:$0xff] }
 0x19d   : > { %v862_v56 = vpop.f32.mrf.mxu1  ;;  %v5111_v7 = vpop.f32.mrf.mxu0 }
 0x19e   : > { %v863_v59 = vadd.f32 %v862_v56, %v5027_v43  ;;  %v5137_v56 = vadd.f32 %v5090_v26, %v1298_v44 }
 0x19f   : > { %1265 = vmatmul.f32.gmra.mxu3 %v1154_v14 }
 0x1a0   : > { %909 = vmatmul.f32.gmra.mxu1 %v1152_v3  ;;  %1459 = vmatmul.f32.gmra.mxu0 %v1348_v34  ;;  %v1106_v1 = vadd.f32 %v1024_v32, %v863_v59 }
 0x1a1   : > { %1074 = vmatmul.f32.gmra.mxu2 %v961_v61 }
 0x1a2   : > { %v1218_v62 = vpop.f32.mrf.mxu3 }
 0x1a3   : > { %v5117_v40 = vadd.f32 %v1218_v62, %v1106_v1  ;;  %v1156_v1 = vld [vmem:[#allocation2 + $0x140] sm:$0xff]  ;;  %v546_v62 = vpop.permute.xlu0 %545 }
 0x1a4   : > { %v1027_v43 = vpop.f32.mrf.mxu2  ;;  %612 = vst.msk [vmem:[#allocation2 + $0x181] sm:$0xff] %vm581_vm1, %v546_v62 }
 0x1a5   : > { %v865_v23 = vpop.f32.mrf.mxu1  ;;  %v5122_v55 = vpop.f32.mrf.mxu0 }
 0x1a6   : > { %v866_v3 = vadd.f32 %v865_v23, %v4905_v6  ;;  %v3785_v6 = vld [vmem:[%s6293_s3 + $0x288] sm:$0xff] }
 0x1a7   : > { %1268 = vmatmul.f32.gmra.mxu3 %v1155_v49  ;;  %1582 = vmatpush.msra.mxu1 %v3785_v6  ;;  %v1350_v23 = vld [vmem:[#allocation2 + $0x141] sm:$0xff]  ;;  %v1157_v6 = vld [vmem:[#allocation2 + $0x150] sm:$0xff] }
 0x1a8   : > { %912 = vmatmul.f32.gmra.mxu1 %v1153_v30  ;;  %1462 = vmatmul.f32.gmra.mxu0 %v1349_v35  ;;  %v1107_v11 = vadd.f32 %v1027_v43, %v866_v3  ;;  %v386_v43 = vld [vmem:[%s4331_s26 + $0xf8] sm:$0xff]  ;;  %v548_v3 = vpop.permute.xlu1 %547 }
 0x1a9   : > { %1077 = vmatmul.f32.gmra.mxu2 %v962_v29  ;;  %420 = vst.msk [vmem:[#allocation2 + $0x189] sm:$0xff] %vm388_vm0, %v386_v43  ;;  %v3784_v43 = vld [vmem:[%s6293_s3 + $0x280] sm:$0xff] }
 0x1aa   : > { %v1221_v36 = vpop.f32.mrf.mxu3  ;;  %613 = vst.msk [vmem:[#allocation2 + $0x189] sm:$0xff] %vm581_vm1, %v548_v3  ;;  %1583 = vmatpush.msra.mxu1 %v3784_v43 }
 0x1ab   : > { %v5134_v32 = vadd.f32 %v1221_v36, %v1107_v11  ;;  %v3800_v36 = vld [vmem:[%s6293_s3 + $0x300] sm:$0xff] }
 0x1ac   : > { %v1030_v30 = vpop.f32.mrf.mxu2  ;;  %1778 = vmatpush.msra.mxu2 %v3800_v36 }
 0x1ad   : > { %v868_v59 = vpop.f32.mrf.mxu1  ;;  %v5139_v34 = vpop.f32.mrf.mxu0 }
 0x1ae   : > { %v869_v61 = vadd.f32 %v868_v59, %v4921_v17  ;;  %v3833_v17 = vld [vmem:[%s6293_s3 + $0x408] sm:$0xff] }
 0x1af   : > { %1271 = vmatmul.f32.gmra.mxu3 %v1156_v1  ;;  %2165 = vmatpush.msra.mxu0 %v3833_v17  ;;  %v964_v59 = vld [vmem:[#allocation2 + $0x142] sm:$0xff]  ;;  %v1158_v17 = vld [vmem:[#allocation2 + $0x158] sm:$0xff] }
 0x1b0   : > { %915 = vmatmul.f32.gmra.mxu1 %v1154_v14  ;;  %1465 = vmatmul.f32.gmra.mxu0 %v1350_v23  ;;  %v1108_v26 = vadd.f32 %v1030_v30, %v869_v61  ;;  %v1351_v30 = vld [vmem:[#allocation2 + $0x151] sm:$0xff] }
 0x1b1   : > { %1080 = vmatmul.f32.gmra.mxu2 %v963_v19 }
 0x1b2   : > { %v1224_v44 = vpop.f32.mrf.mxu3 }
 0x1b3   : > { %v5151_v35 = vadd.f32 %v1224_v44, %v1108_v26  ;;  %v1352_v44 = vld [vmem:[#allocation2 + $0x159] sm:$0xff] }
 0x1b4   : > { %v1033_v29 = vpop.f32.mrf.mxu2 }
 0x1b5   : > { %v871_v14 = vpop.f32.mrf.mxu1  ;;  %v5153_v11 = vpop.f32.mrf.mxu0 }
 0x1b6   : > { %v872_v39 = vadd.f32 %v871_v14, %v4940_v31  ;;  %v5164_v31 = vadd.f32 %v5097_v10, %v5109_v58  ;;  %v965_v10 = vld [vmem:[#allocation2 + $0x152] sm:$0xff]  ;;  %v5177_v14 = vadd.f32 %v5111_v7, %v5117_v40  ;;  %v5185_v7 = vadd.f32 %v5122_v55, %v5134_v32 }
 0x1b7   : > { %1274 = vmatmul.f32.gmra.mxu3 %v1157_v6  ;;  %v5192_v55 = vadd.f32 %v5139_v34, %v5151_v35 }
 0x1b8   : > { %918 = vmatmul.f32.gmra.mxu1 %v1155_v49  ;;  %1468 = vmatmul.f32.gmra.mxu0 %v1351_v30  ;;  %v1109_v61 = vadd.f32 %v1033_v29, %v872_v39  ;;  %v3832_v29 = vld [vmem:[%s6293_s3 + $0x400] sm:$0xff] }
 0x1b9   : > { %1083 = vmatmul.f32.gmra.mxu2 %v964_v59  ;;  %2166 = vmatpush.msra.mxu0 %v3832_v29 }
 0x1ba   : > { %v1227_v62 = vpop.f32.mrf.mxu3 }
 0x1bb   : > { %v1303_v23 = vadd.f32 %v1227_v62, %v1109_v61  ;;  %v1159_v61 = vld [vmem:[#allocation2 + $0x168] sm:$0xff] }
 0x1bc   : > { %v1036_v49 = vpop.f32.mrf.mxu2 }
 0x1bd   : > { %v874_v3 = vpop.f32.mrf.mxu1  ;;  %v5169_v19 = vpop.f32.mrf.mxu0 }
 0x1be   : > { %v875_v26 = vadd.f32 %v874_v3, %v4963_v13 }
 0x1bf   : > { %1277 = vmatmul.f32.gmra.mxu3 %v1158_v17 }
 0x1c0   : > { %921 = vmatmul.f32.gmra.mxu1 %v1156_v1  ;;  %1471 = vmatmul.f32.gmra.mxu0 %v1352_v44  ;;  %v1110_v58 = vadd.f32 %v1036_v49, %v875_v26  ;;  %v1160_v44 = vld [vmem:[#allocation2 + $0x170] sm:$0xff] }
 0x1c1   : > { %1086 = vmatmul.f32.gmra.mxu2 %v965_v10  ;;  %v967_v10 = vld [vmem:[#allocation2 + $0x16a] sm:$0xff] }
 0x1c2   : > { %v1230_v39 = vpop.f32.mrf.mxu3 }
 0x1c3   : > { %v1304_v36 = vadd.f32 %v1230_v39, %v1110_v58  ;;  %v1161_v39 = vld [vmem:[#allocation2 + $0x180] sm:$0xff] }
 0x1c4   : > { %v1039_v13 = vpop.f32.mrf.mxu2 }
 0x1c5   : > { %v877_v30 = vpop.f32.mrf.mxu1  ;;  %v5179_v59 = vpop.f32.mrf.mxu0 }
 0x1c6   : > { %v878_v1 = vadd.f32 %v877_v30, %v4979_v57 }
 0x1c7   : > { %1280 = vmatmul.f32.gmra.mxu3 %v1159_v61 }
 0x1c8   : > { %924 = vmatmul.f32.gmra.mxu1 %v1157_v6  ;;  %1474 = vmatmul.f32.gmra.mxu0 %v4785_v9  ;;  %v1111_v62 = vadd.f32 %v1039_v13, %v878_v1  ;;  %v1354_v6 = vld [vmem:[#allocation2 + $0x171] sm:$0xff] }
 0x1c9   : > { %1089 = vmatmul.f32.gmra.mxu2 %v966_v4 }
 0x1ca   : > { %v1233_v40 = vpop.f32.mrf.mxu3 }
 0x1cb   : > { %v1305_v43 = vadd.f32 %v1233_v40, %v1111_v62  ;;  %v5198_v62 = vadd.f32 %v5153_v11, %v1303_v23 }
 0x1cc   : > { %v1042_v49 = vpop.f32.mrf.mxu2 }
 0x1cd   : > { %v880_v3 = vpop.f32.mrf.mxu1  ;;  %v5187_v26 = vpop.f32.mrf.mxu0 }
 0x1ce   : > { %v881_v57 = vadd.f32 %v880_v3, %v4997_v8  ;;  %v1355_v8 = vld [vmem:[#allocation2 + $0x181] sm:$0xff] }
 0x1cf   : > { %1283 = vmatmul.f32.gmra.mxu3 %v1160_v44 }
 0x1d0   : > { %927 = vmatmul.f32.gmra.mxu1 %v1158_v17  ;;  %1477 = vmatmul.f32.gmra.mxu0 %v1354_v6  ;;  %v1112_v9 = vadd.f32 %v1042_v49, %v881_v57  ;;  %v968_v17 = vld [vmem:[#allocation2 + $0x172] sm:$0xff]  ;;  %v1356_v57 = vld [vmem:[#allocation2 + $0x189] sm:$0xff] }
 0x1d1   : > { %1092 = vmatmul.f32.gmra.mxu2 %v967_v10  ;;  %v1162_v10 = vld [vmem:[#allocation2 + $0x188] sm:$0xff] }
 0x1d2   : > { %v1236_v32 = vpop.f32.mrf.mxu3 }
 0x1d3   : > { %v1306_v58 = vadd.f32 %v1236_v32, %v1112_v9 }
 0x1d4   : > { %v1045_v29 = vpop.f32.mrf.mxu2 }
 0x1d5   : > { %v883_v13 = vpop.f32.mrf.mxu1  ;;  %v5194_v30 = vpop.f32.mrf.mxu0 }
 0x1d6   : > { %v884_v1 = vadd.f32 %v883_v13, %v5009_v24  ;;  %v1908_v13 = vld [vmem:[#allocation2 + $0x31] sm:$0xff] }
 0x1d7   : > { %1286 = vmatmul.f32.gmra.mxu3 %v1161_v39 }
 0x1d8   : > { %930 = vmatmul.f32.gmra.mxu1 %v1159_v61  ;;  %1480 = vmatmul.f32.gmra.mxu0 %v1355_v8  ;;  %v1113_v4 = vadd.f32 %v1045_v29, %v884_v1  ;;  %v5205_v61 = vadd.f32 %v5169_v19, %v1304_v36  ;;  %v5213_v19 = vadd.f32 %v5179_v59, %v1305_v43 }
 0x1d9   : > { %1095 = vmatmul.f32.gmra.mxu2 %v968_v17  ;;  %v5222_v59 = vadd.f32 %v5187_v26, %v1306_v58  ;;  %v2104_v26 = vld [vmem:[#allocation2 + $0x4a] sm:$0xff] }
 0x1da   : > { %v1239_v34 = vpop.f32.mrf.mxu3 }
 0x1db   : > { %v1307_v35 = vadd.f32 %v1239_v34, %v1113_v4  ;;  %v1909_v4 = vld [vmem:[#allocation2 + $0x39] sm:$0xff]  ;;  %v1520_v34 = vld [vmem:[#allocation2 + $0x22] sm:$0xff] }
 0x1dc   : > { %v1048_v40 = vpop.f32.mrf.mxu2 }
 0x1dd   : > { %v886_v49 = vpop.f32.mrf.mxu1  ;;  %v5200_v3 = vpop.f32.mrf.mxu0 }
 0x1de   : > { %v887_v6 = vadd.f32 %v886_v49, %v5029_v21  ;;  %v1519_v21 = vld [vmem:[#allocation2 + $0x1a] sm:$0xff] }
 0x1df   : > { %1289 = vmatmul.f32.gmra.mxu3 %v1162_v10  ;;  %v2528_v10 = vld [vmem:[%s5230_s12 + $0x8] sm:$0xff] }
 0x1e0   : > { %933 = vmatmul.f32.gmra.mxu1 %v1160_v44  ;;  %1483 = vmatmul.f32.gmra.mxu0 %v1356_v57  ;;  %v1114_v24 = vadd.f32 %v1048_v40, %v887_v6 }
 0x1e1   : > { %1779 = vmatmul.f32.vlgmr.msra.gmra.mxu2 %v4847_v46  ;;  %2593 = vrot.lane.b32.xlu0 %v2528_v10, %s4186_s14 }
 0x1e2   : > { %v1242_v11 = vpop.f32.mrf.mxu3 }
 0x1e3   : > { %v1308_v23 = vadd.f32 %v1242_v11, %v1114_v24  ;;  %v1521_v24 = vld [vmem:[#allocation2 + $0x32] sm:$0xff]  ;;  %v5239_v11 = vadd.f32 %v5194_v30, %v1307_v35 }
 0x1e4   : > { %v1051_v9 = vpop.f32.mrf.mxu2 }
 0x1e5   : > { %v889_v32 = vpop.f32.mrf.mxu1  ;;  %v5207_v29 = vpop.f32.mrf.mxu0  ;;  %v5250_v30 = vadd.f32 %v5200_v3, %v1308_v23 }
 0x1e6   : > { %v890_v39 = vadd.f32 %v889_v32, %v4903_v5 }
 0x1e7   : > { %1973 = vmatmul.f32.vlgmr.msra.gmra.mxu3 %v1908_v13 }
 0x1e8   : > { %1584 = vmatmul.f32.vlgmr.msra.gmra.mxu1 %v1519_v21  ;;  %2167 = vmatmul.f32.vlgmr.msra.gmra.mxu0 %v4860_v50  ;;  %v1115_v46 = vadd.f32 %v1051_v9, %v890_v39  ;;  %v2103_v50 = vld [vmem:[#allocation2 + $0x3a] sm:$0xff] }
 0x1e9   : > { %1782 = vmatmul.f32.gmra.mxu2 %v4857_v48 }
 0x1ea   : > { %v1245_v36 = vpop.f32.mrf.mxu3 }
 0x1eb   : > { %v5215_v44 = vadd.f32 %v1245_v36, %v1115_v46  ;;  %v1911_v46 = vld [vmem:[#allocation2 + $0x51] sm:$0xff] }
 0x1ec   : > { %v1054_v8 = vpop.f32.mrf.mxu2  ;;  %v2529_v36 = vld [vmem:[%s5230_s12 + $0x10] sm:$0xff] }
 0x1ed   : > { %v892_v1 = vpop.f32.mrf.mxu1  ;;  %v5217_v17 = vpop.f32.mrf.mxu0  ;;  %2595 = vrot.lane.b32.xlu1 %v2529_v36, %s4186_s14  ;;  %v5261_v23 = vadd.f32 %v5207_v29, %v5215_v44  ;;  %v1914_v36 = vld [vmem:[#allocation2 + $0x79] sm:$0xff] }
 0x1ee   : > { %v893_v5 = vadd.f32 %v892_v1, %v4916_v15 }
 0x1ef   : > { %1976 = vmatmul.f32.gmra.mxu3 %v1909_v4 }
 0x1f0   : > { %1587 = vmatmul.f32.gmra.mxu1 %v1520_v34  ;;  %2170 = vmatmul.f32.gmra.mxu0 %v2103_v50  ;;  %v1116_v48 = vadd.f32 %v1054_v8, %v893_v5  ;;  %v2105_v8 = vld [vmem:[#allocation2 + $0x52] sm:$0xff] }
 0x1f1   : > { %1785 = vmatmul.f32.gmra.mxu2 %v4870_v54  ;;  %v1910_v54 = vld [vmem:[#allocation2 + $0x49] sm:$0xff] }
 0x1f2   : > { %v1248_v43 = vpop.f32.mrf.mxu3 }
 0x1f3   : > { %v5224_v40 = vadd.f32 %v1248_v43, %v1116_v48  ;;  %v1912_v48 = vld [vmem:[#allocation2 + $0x61] sm:$0xff] }
 0x1f4   : > { %v1057_v15 = vpop.f32.mrf.mxu2  ;;  %v2527_v43 = vld [vmem:[%s5230_s12] sm:$0xff] }
 0x1f5   : > { %v895_v49 = vpop.f32.mrf.mxu1  ;;  %v5232_v57 = vpop.f32.mrf.mxu0  ;;  %2591 = vrot.lane.b32.xlu2 %v2527_v43, %s4186_s14  ;;  %v5273_v44 = vadd.f32 %v5217_v17, %v5224_v40  ;;  %v2530_v40 = vld [vmem:[%s5230_s12 + $0x18] sm:$0xff] }
 0x1f6   : > { %v896_v6 = vadd.f32 %v895_v49, %v4938_v28 }
 0x1f7   : > { %1979 = vmatmul.f32.gmra.mxu3 %v1910_v54 }
 0x1f8   : > { %1590 = vmatmul.f32.gmra.mxu1 %v1521_v24  ;;  %2173 = vmatmul.f32.gmra.mxu0 %v2104_v26  ;;  %v1117_v58 = vadd.f32 %v1057_v15, %v896_v6  ;;  %v1913_v24 = vld [vmem:[#allocation2 + $0x69] sm:$0xff] }
 0x1f9   : > { %1788 = vmatmul.f32.gmra.mxu2 %v4881_v60 }
 0x1fa   : > { %v1251_v9 = vpop.f32.mrf.mxu3 }
 0x1fb   : > { %v5241_v32 = vadd.f32 %v1251_v9, %v1117_v58  ;;  %v2531_v58 = vld [vmem:[%s5230_s12 + $0x20] sm:$0xff] }
 0x1fc   : > { %v1060_v28 = vpop.f32.mrf.mxu2  ;;  %2599 = vrot.lane.b32.xlu0 %v2531_v58, %s4186_s14 }
 0x1fd   : > { %v898_v39 = vpop.f32.mrf.mxu1  ;;  %v5243_v13 = vpop.f32.mrf.mxu0  ;;  %2597 = vrot.lane.b32.xlu2 %v2530_v40, %s4186_s14 }
 0x1fe   : > { %v899_v21 = vadd.f32 %v898_v39, %v4953_v33 }
 0x1ff   : > { %1982 = vmatmul.f32.gmra.mxu3 %v1911_v46 }
 0x200   : > { %1593 = vmatmul.f32.gmra.mxu1 %v2103_v50  ;;  %2176 = vmatmul.f32.gmra.mxu0 %v2105_v8  ;;  %v1118_v60 = vadd.f32 %v1060_v28, %v899_v21  ;;  %v2106_v50 = vld [vmem:[#allocation2 + $0x62] sm:$0xff] }
 0x201   : > { %1791 = vmatmul.f32.gmra.mxu2 %v4892_v0  ;;  %v1719_v0 = vld [vmem:[#allocation2 + $0x68] sm:$0xff] }
 0x202   : > { %v1254_v35 = vpop.f32.mrf.mxu3 }
 0x203   : > { %v5252_v1 = vadd.f32 %v1254_v35, %v1118_v60  ;;  %v2108_v60 = vld [vmem:[#allocation2 + $0x7a] sm:$0xff]  ;;  %v5285_v35 = vadd.f32 %v5232_v57, %v5241_v32  ;;  %v2533_v32 = vld [vmem:[%s5230_s12 + $0x30] sm:$0xff] }
 0x204   : > { %v1063_v5 = vpop.f32.mrf.mxu2 }
 0x205   : > { %v901_v33 = vpop.f32.mrf.mxu1  ;;  %v5254_v4 = vpop.f32.mrf.mxu0  ;;  %2603 = vrot.lane.b32.xlu2 %v2533_v32, %s4186_s14 }
 0x206   : > { %v902_v34 = vadd.f32 %v901_v33, %v4973_v51 }
 0x207   : > { %1985 = vmatmul.f32.gmra.mxu3 %v1912_v48 }
 0x208   : > { %1596 = vmatmul.f32.gmra.mxu1 %v2104_v26  ;;  %2179 = vmatmul.f32.gmra.mxu0 %v2106_v50  ;;  %v1119_v3 = vadd.f32 %v1063_v5, %v902_v34  ;;  %v2107_v26 = vld [vmem:[#allocation2 + $0x6a] sm:$0xff] }
 0x209   : > { %1794 = vmatmul.f32.gmra.mxu2 %v1719_v0  ;;  %v2109_v0 = vld [vmem:[#allocation2 + $0x82] sm:$0xff] }
 0x20a   : > { %v1257_v15 = vpop.f32.mrf.mxu3 }
 0x20b   : > { %v5263_v49 = vadd.f32 %v1257_v15, %v1119_v3  ;;  %v1722_v3 = vld [vmem:[#allocation2 + $0x90] sm:$0xff]  ;;  %v2535_v15 = vld [vmem:[%s5230_s12 + $0x40] sm:$0xff] }
 0x20c   : > { %v1066_v51 = vpop.f32.mrf.mxu2 }
 0x20d   : > { %v904_v6 = vpop.f32.mrf.mxu1  ;;  %v5265_v54 = vpop.f32.mrf.mxu0 }
 0x20e   : > { %v905_v10 = vadd.f32 %v904_v6, %v4989_v2 }
 0x20f   : > { %1988 = vmatmul.f32.gmra.mxu3 %v1913_v24 }
 0x210   : > { %1599 = vmatmul.f32.gmra.mxu1 %v2105_v8  ;;  %2182 = vmatmul.f32.gmra.mxu0 %v2107_v26  ;;  %v1120_v29 = vadd.f32 %v1066_v51, %v905_v10  ;;  %v2532_v8 = vld [vmem:[%s5230_s12 + $0x28] sm:$0xff]  ;;  %v5297_v51 = vadd.f32 %v5243_v13, %v5252_v1  ;;  %v2110_v13 = vld [vmem:[#allocation2 + $0x92] sm:$0xff] }
 0x211   : > { %1797 = vmatmul.f32.gmra.mxu2 %v4923_v18  ;;  %2601 = vrot.lane.b32.xlu1 %v2532_v8, %s4186_s14  ;;  %v1721_v18 = vld [vmem:[#allocation2 + $0x80] sm:$0xff]  ;;  %v1723_v1 = vld [vmem:[#allocation2 + $0x98] sm:$0xff] }
 0x212   : > { %v1260_v9 = vpop.f32.mrf.mxu3 }
 0x213   : > { %v5275_v28 = vadd.f32 %v1260_v9, %v1120_v29  ;;  %v1916_v29 = vld [vmem:[#allocation2 + $0x91] sm:$0xff] }
 0x214   : > { %v1069_v2 = vpop.f32.mrf.mxu2  ;;  %v2534_v9 = vld [vmem:[%s5230_s12 + $0x38] sm:$0xff] }
 0x215   : > { %v907_v39 = vpop.f32.mrf.mxu1  ;;  %v5277_v21 = vpop.f32.mrf.mxu0  ;;  %2605 = vrot.lane.b32.xlu0 %v2534_v9, %s4186_s14  ;;  %v2544_v9 = vld [vmem:[%s5230_s12 + $0x88] sm:$0xff] }
 0x216   : > { %v908_v46 = vadd.f32 %v907_v39, %v5007_v20  ;;  %v2536_v39 = vld [vmem:[%s5230_s12 + $0x48] sm:$0xff] }
 0x217   : > { %1991 = vmatmul.f32.gmra.mxu3 %v1914_v36  ;;  %v5312_v36 = vadd.f32 %v5254_v4, %v5263_v49  ;;  %2609 = vrot.lane.b32.xlu2 %v2536_v39, %s4186_s14  ;;  %v2111_v4 = vld [vmem:[#allocation2 + $0x9a] sm:$0xff]  ;;  %v1724_v49 = vld [vmem:[#allocation2 + $0xa8] sm:$0xff] }
 0x218   : > { %1602 = vmatmul.f32.gmra.mxu1 %v2106_v50  ;;  %2185 = vmatmul.f32.gmra.mxu0 %v2108_v60  ;;  %v1121_v17 = vadd.f32 %v1069_v2, %v908_v46  ;;  %v1915_v50 = vld [vmem:[#allocation2 + $0x81] sm:$0xff]  ;;  %v2538_v46 = vld [vmem:[%s5230_s12 + $0x58] sm:$0xff] }
 0x219   : > { %1800 = vmatmul.f32.gmra.mxu2 %v1721_v18  ;;  %2607 = vrot.lane.b32.xlu1 %v2535_v15, %s4186_s14 }
 0x21a   : > { %v1263_v5 = vpop.f32.mrf.mxu3 }
 0x21b   : > { %v5288_v20 = vadd.f32 %v1263_v5, %v1121_v17  ;;  %v1917_v5 = vld [vmem:[#allocation2 + $0x99] sm:$0xff] }
 0x21c   : > { %v1072_v33 = vpop.f32.mrf.mxu2 }
 0x21d   : > { %v910_v34 = vpop.f32.mrf.mxu1  ;;  %v5290_v48 = vpop.f32.mrf.mxu0 }
 0x21e   : > { %v911_v43 = vadd.f32 %v910_v34, %v5025_v42  ;;  %v2537_v34 = vld [vmem:[%s5230_s12 + $0x50] sm:$0xff] }
 0x21f   : > { %1994 = vmatmul.f32.gmra.mxu3 %v1915_v50  ;;  %v2541_v50 = vld [vmem:[%s5230_s12 + $0x70] sm:$0xff]  ;;  %2611 = vrot.lane.b32.xlu0 %v2537_v34, %s4186_s14 }
 0x220   : > { %1605 = vmatmul.f32.gmra.mxu1 %v2107_v26  ;;  %2188 = vmatmul.f32.gmra.mxu0 %v2109_v0  ;;  %v1122_v57 = vadd.f32 %v1072_v33, %v911_v43  ;;  %v2539_v43 = vld [vmem:[%s5230_s12 + $0x60] sm:$0xff] }
 0x221   : > { %1803 = vmatmul.f32.gmra.mxu2 %v1722_v3  ;;  %2613 = vrot.lane.b32.xlu1 %v2538_v46, %s4186_s14  ;;  %v5326_v3 = vadd.f32 %v5265_v54, %v5275_v28  ;;  %v1918_v54 = vld [vmem:[#allocation2 + $0xa9] sm:$0xff] }
 0x222   : > { %v1266_v6 = vpop.f32.mrf.mxu3  ;;  %2615 = vrot.lane.b32.xlu2 %v2539_v43, %s4186_s14  ;;  %v2112_v28 = vld [vmem:[#allocation2 + $0xaa] sm:$0xff] }
 0x223   : > { %v5301_v42 = vadd.f32 %v1266_v6, %v1122_v57 }
 0x224   : > { %v1075_v10 = vpop.f32.mrf.mxu2 }
 0x225   : > { %v913_v24 = vpop.f32.mrf.mxu1  ;;  %v5303_v58 = vpop.f32.mrf.mxu0 }
 0x226   : > { %v914_v26 = vadd.f32 %v913_v24, %v4914_v12 }
 0x227   : > { %1997 = vmatmul.f32.gmra.mxu3 %v1916_v29  ;;  %v2542_v29 = vld [vmem:[%s5230_s12 + $0x78] sm:$0xff] }
 0x228   : > { %1608 = vmatmul.f32.gmra.mxu1 %v2108_v60  ;;  %2191 = vmatmul.f32.gmra.mxu0 %v2110_v13  ;;  %v1123_v2 = vadd.f32 %v1075_v10, %v914_v26  ;;  %v1725_v10 = vld [vmem:[#allocation2 + $0xb0] sm:$0xff]  ;;  %v2540_v26 = vld [vmem:[%s5230_s12 + $0x68] sm:$0xff] }
 0x229   : > { %1806 = vmatmul.f32.gmra.mxu2 %v1723_v1  ;;  %2619 = vrot.lane.b32.xlu1 %v2541_v50, %s4186_s14  ;;  %v5341_v1 = vadd.f32 %v5277_v21, %v5288_v20  ;;  %v1919_v21 = vld [vmem:[#allocation2 + $0xb1] sm:$0xff] }
 0x22a   : > { %v1269_v8 = vpop.f32.mrf.mxu3  ;;  %2617 = vrot.lane.b32.xlu0 %v2540_v26, %s4186_s14  ;;  %2621 = vrot.lane.b32.xlu2 %v2542_v29, %s4186_s14  ;;  %v2113_v20 = vld [vmem:[#allocation2 + $0xb2] sm:$0xff] }
 0x22b   : > { %v5316_v12 = vadd.f32 %v1269_v8, %v1123_v2 }
 0x22c   : > { %v1078_v60 = vpop.f32.mrf.mxu2 }
 0x22d   : > { %v916_v18 = vpop.f32.mrf.mxu1  ;;  %v5318_v17 = vpop.f32.mrf.mxu0 }
 0x22e   : > { %v917_v40 = vadd.f32 %v916_v18, %v4936_v25 }
 0x22f   : > { %2000 = vmatmul.f32.gmra.mxu3 %v1917_v5  ;;  %v2545_v5 = vld [vmem:[%s5230_s12 + $0x90] sm:$0xff] }
 0x230   : > { %1611 = vmatmul.f32.gmra.mxu1 %v2109_v0  ;;  %2194 = vmatmul.f32.gmra.mxu0 %v2111_v4  ;;  %v1124_v33 = vadd.f32 %v1078_v60, %v917_v40  ;;  %v1726_v60 = vld [vmem:[#allocation2 + $0xc0] sm:$0xff] }
 0x231   : > { %1809 = vmatmul.f32.gmra.mxu2 %v1724_v49  ;;  %2625 = vrot.lane.b32.xlu1 %v2544_v9, %s4186_s14  ;;  %v2543_v40 = vld [vmem:[%s5230_s12 + $0x80] sm:$0xff] }
 0x232   : > { %v1272_v57 = vpop.f32.mrf.mxu3  ;;  %v2547_v49 = vld [vmem:[%s5230_s12 + $0xa0] sm:$0xff]  ;;  %2623 = vrot.lane.b32.xlu0 %v2543_v40, %s4186_s14  ;;  %2627 = vrot.lane.b32.xlu2 %v2545_v5, %s4186_s14  ;;  %v2549_v40 = vld [vmem:[%s5230_s12 + $0xb0] sm:$0xff] }
 0x233   : > { %v5330_v25 = vadd.f32 %v1272_v57, %v1124_v33  ;;  %v5356_v33 = vadd.f32 %v5290_v48, %v5301_v42  ;;  %v1920_v48 = vld [vmem:[#allocation2 + $0xc1] sm:$0xff] }
 0x234   : > { %v1081_v0 = vpop.f32.mrf.mxu2  ;;  %v2114_v42 = vld [vmem:[#allocation2 + $0xc2] sm:$0xff] }
 0x235   : > { %v919_v32 = vpop.f32.mrf.mxu1  ;;  %v5333_v15 = vpop.f32.mrf.mxu0  ;;  %v2551_v5 = vld [vmem:[%s5230_s12 + $0xc0] sm:$0xff] }
 0x236   : > { %v920_v6 = vadd.f32 %v919_v32, %v4948_v37 }
 0x237   : > { %2003 = vmatmul.f32.gmra.mxu3 %v1918_v54  ;;  %v2548_v54 = vld [vmem:[%s5230_s12 + $0xa8] sm:$0xff] }
 0x238   : > { %1614 = vmatmul.f32.gmra.mxu1 %v2110_v13  ;;  %2197 = vmatmul.f32.gmra.mxu0 %v2112_v28  ;;  %v1125_v24 = vadd.f32 %v1081_v0, %v920_v6  ;;  %v1727_v0 = vld [vmem:[#allocation2 + $0xc8] sm:$0xff]  ;;  %v2546_v6 = vld [vmem:[%s5230_s12 + $0x98] sm:$0xff] }
 0x239   : > { %1812 = vmatmul.f32.gmra.mxu2 %v1725_v10  ;;  %2631 = vrot.lane.b32.xlu1 %v2547_v49, %s4186_s14  ;;  %v2550_v10 = vld [vmem:[%s5230_s12 + $0xb8] sm:$0xff]  ;;  %v2553_v49 = vld [vmem:[%s5230_s12 + $0xd0] sm:$0xff] }
 0x23a   : > { %v1275_v2 = vpop.f32.mrf.mxu3  ;;  %2629 = vrot.lane.b32.xlu0 %v2546_v6, %s4186_s14  ;;  %2633 = vrot.lane.b32.xlu2 %v2548_v54, %s4186_s14  ;;  %v2554_v6 = vld [vmem:[%s5230_s12 + $0xd8] sm:$0xff]  ;;  %v2556_v54 = vld [vmem:[%s5230_s12 + $0xe8] sm:$0xff] }
 0x23b   : > { %v5345_v37 = vadd.f32 %v1275_v2, %v1125_v24  ;;  %v5371_v24 = vadd.f32 %v5303_v58, %v5316_v12  ;;  %v1921_v58 = vld [vmem:[#allocation2 + $0xc9] sm:$0xff] }
 0x23c   : > { %v1084_v13 = vpop.f32.mrf.mxu2  ;;  %v2115_v12 = vld [vmem:[#allocation2 + $0xca] sm:$0xff] }
 0x23d   : > { %v922_v39 = vpop.f32.mrf.mxu1  ;;  %v5348_v46 = vpop.f32.mrf.mxu0 }
 0x23e   : > { %v923_v8 = vadd.f32 %v922_v39, %v4971_v53 }
 0x23f   : > { %2006 = vmatmul.f32.gmra.mxu3 %v1919_v21 }
 0x240   : > { %1617 = vmatmul.f32.gmra.mxu1 %v2111_v4  ;;  %2200 = vmatmul.f32.gmra.mxu0 %v2113_v20  ;;  %v1126_v18 = vadd.f32 %v1084_v13, %v923_v8  ;;  %v1728_v13 = vld [vmem:[#allocation2 + $0xd8] sm:$0xff]  ;;  %v5383_v8 = vadd.f32 %v5318_v17, %v5330_v25 }
 0x241   : > { %1815 = vmatmul.f32.gmra.mxu2 %v1726_v60  ;;  %2637 = vrot.lane.b32.xlu1 %v2550_v10, %s4186_s14  ;;  %v1922_v17 = vld [vmem:[#allocation2 + $0xd9] sm:$0xff] }
 0x242   : > { %v1278_v34 = vpop.f32.mrf.mxu3  ;;  %2635 = vrot.lane.b32.xlu0 %v2549_v40, %s4186_s14  ;;  %2639 = vrot.lane.b32.xlu2 %v2551_v5, %s4186_s14  ;;  %v2116_v25 = vld [vmem:[#allocation2 + $0xda] sm:$0xff]  ;;  %v1924_v5 = vld [vmem:[#allocation2 + $0xf1] sm:$0xff] }
 0x243   : > { %v5360_v53 = vadd.f32 %v1278_v34, %v1126_v18 }
 0x244   : > { %v1087_v4 = vpop.f32.mrf.mxu2 }
 0x245   : > { %v925_v43 = vpop.f32.mrf.mxu1  ;;  %v5363_v50 = vpop.f32.mrf.mxu0 }
 0x246   : > { %v926_v57 = vadd.f32 %v925_v43, %v4986_v63 }
 0x247   : > { %2009 = vmatmul.f32.gmra.mxu3 %v1920_v48 }
 0x248   : > { %1620 = vmatmul.f32.gmra.mxu1 %v2112_v28  ;;  %2203 = vmatmul.f32.gmra.mxu0 %v2114_v42  ;;  %v1127_v32 = vadd.f32 %v1087_v4, %v926_v57  ;;  %v1729_v4 = vld [vmem:[#allocation2 + $0xe0] sm:$0xff]  ;;  %v5398_v57 = vadd.f32 %v5333_v15, %v5345_v37 }
 0x249   : > { %1818 = vmatmul.f32.gmra.mxu2 %v1727_v0  ;;  %2643 = vrot.lane.b32.xlu1 %v2553_v49, %s4186_s14  ;;  %v1923_v15 = vld [vmem:[#allocation2 + $0xe1] sm:$0xff]  ;;  %v2118_v49 = vld [vmem:[#allocation2 + $0xf2] sm:$0xff] }
 0x24a   : > { %v1281_v26 = vpop.f32.mrf.mxu3  ;;  %2645 = vrot.lane.b32.xlu2 %v2554_v6, %s4186_s14  ;;  %v2117_v37 = vld [vmem:[#allocation2 + $0xe2] sm:$0xff] }
 0x24b   : > { %v5375_v63 = vadd.f32 %v1281_v26, %v1127_v32 }
 0x24c   : > { %v1090_v28 = vpop.f32.mrf.mxu2 }
 0x24d   : > { %v928_v29 = vpop.f32.mrf.mxu1  ;;  %v5378_v9 = vpop.f32.mrf.mxu0 }
 0x24e   : > { %v929_v2 = vadd.f32 %v928_v29, %v5001_v22 }
 0x24f   : > { %2012 = vmatmul.f32.gmra.mxu3 %v1921_v58 }
 0x250   : > { %1623 = vmatmul.f32.gmra.mxu1 %v2113_v20  ;;  %2206 = vmatmul.f32.gmra.mxu0 %v2115_v12  ;;  %v1128_v39 = vadd.f32 %v1090_v28, %v929_v2  ;;  %v1730_v28 = vld [vmem:[#allocation2 + $0xf0] sm:$0xff]  ;;  %v5413_v2 = vadd.f32 %v5348_v46, %v5360_v53  ;;  %v1731_v46 = vld [vmem:[#allocation2 + $0xf8] sm:$0xff]  ;;  %v2332_v53 = vlaneseq }
 0x251   : > { %1821 = vmatmul.f32.gmra.mxu2 %v1728_v13  ;;  %2649 = vrot.lane.b32.xlu1 %v2556_v54, %s4186_s14 }
 0x252   : > { %v1284_v21 = vpop.f32.mrf.mxu3 }
 0x253   : > { %v5385_v60 = vadd.f32 %v1284_v21, %v1128_v39  ;;  %v2555_v21 = vld [vmem:[%s5230_s12 + $0xe0] sm:$0xff] }
 0x254   : > { %v1093_v18 = vpop.f32.mrf.mxu2 }
 0x255   : > { %v931_v22 = vpop.f32.mrf.mxu1  ;;  %v5390_v34 = vpop.f32.mrf.mxu0 }
 0x256   : > { %v932_v20 = vadd.f32 %v931_v22, %v5017_v38  ;;  %v2552_v38 = vld [vmem:[%s5230_s12 + $0xc8] sm:$0xff] }
 0x257   : > { %2015 = vmatmul.f32.gmra.mxu3 %v1922_v17  ;;  %2641 = vrot.lane.b32.xlu0 %v2552_v38, %s4186_s14 }
 0x258   : > { %1626 = vmatmul.f32.gmra.mxu1 %v2114_v42  ;;  %2209 = vmatmul.f32.gmra.mxu0 %v2116_v25  ;;  %v1129_v43 = vadd.f32 %v1093_v18, %v932_v20  ;;  %v5424_v20 = vadd.f32 %v5363_v50, %v5375_v63  ;;  %v1925_v50 = vld [vmem:[#allocation2 + $0xf9] sm:$0xff] }
 0x259   : > { %1824 = vmatmul.f32.gmra.mxu2 %v1729_v4 }
 0x25a   : > { %v1287_v48 = vpop.f32.mrf.mxu3 }
 0x25b   : > { %v5400_v0 = vadd.f32 %v1287_v48, %v1129_v43  ;;  %v5431_v48 = vand.u32 127, %v2332_v53 }
 0x25c   : > { %v1096_v32 = vpop.f32.mrf.mxu2 }
 0x25d   : > { %v934_v10 = vpop.f32.mrf.mxu1  ;;  %v5405_v26 = vpop.f32.mrf.mxu0  ;;  %vm2334_vm2 = vcmp.lt.s32.totalorder %v5431_v48, 96 }
 0x25e   : > { %v935_v42 = vadd.f32 %v934_v10, %v5035_v52  ;;  %v2557_v52 = vld [vmem:[%s5230_s12 + $0xf0] sm:$0xff]  ;;  %v2119_v10 = vld [vmem:[#allocation2 + $0xfa] sm:$0xff] }
 0x25f   : > { %2018 = vmatmul.f32.gmra.mxu3 %v1923_v15  ;;  %2647 = vrot.lane.b32.xlu0 %v2555_v21, %s4186_s14 }
 0x260   : > { %1629 = vmatmul.f32.gmra.mxu1 %v2115_v12  ;;  %2212 = vmatmul.f32.gmra.mxu0 %v2117_v37  ;;  %v1130_v29 = vadd.f32 %v1096_v32, %v935_v42  ;;  %v1732_v42 = vld [vmem:[#allocation2 + $0x108] sm:$0xff] }
 0x261   : > { %1827 = vmatmul.f32.gmra.mxu2 %v1730_v28  ;;  %2651 = vrot.lane.b32.xlu2 %v2557_v52, %s4186_s14 }
 0x262   : > { %v1290_v58 = vpop.f32.mrf.mxu3 }
 0x263   : > { %v5415_v13 = vadd.f32 %v1290_v58, %v1130_v29  ;;  %v5440_v29 = vadd.f32 %v5378_v9, %v5385_v60  ;;  %v1733_v9 = vld [vmem:[#allocation2 + $0x110] sm:$0xff] }
 0x264   : > { %v1780_v39 = vpop.f32.mrf.mxu2 }
 0x265   : > { %v1585_v18 = vpop.f32.mrf.mxu1  ;;  %v2168_v40 = vpop.f32.mrf.mxu0 }
 0x266   : > { %v1681_v12 = vadd.f32 %v1585_v18, %v5048_v41  ;;  %v5429_v41 = vld [vmem:[%s6294_s4] ss:$0 sm:$0xff] }
 0x267   : > { %2021 = vmatmul.f32.gmra.mxu3 %v1924_v5 }
 0x268   : > { %1632 = vmatmul.f32.gmra.mxu1 %v2116_v25  ;;  %2215 = vmatmul.f32.gmra.mxu0 %v2118_v49  ;;  %v1876_v22 = vadd.f32 %v1780_v39, %v1681_v12  ;;  %v2558_v25 = vld [vmem:[%s5230_s12 + $0xf8] sm:$0xff]  ;;  %v1926_v12 = vld [vmem:[#allocation2 + $0x109] sm:$0xff]  ;;  %s3586_s12 = sshll.u32 %s5953_s20, 4  ;;  %s3587_s12 = int_to_ptr.vmem [resolvable:$true] %s3586_s12 }
 0x269   : > { %1830 = vmatmul.f32.gmra.mxu2 %v1731_v46  ;;  %2653 = vrot.lane.b32.xlu0 %v2558_v25, %s4186_s14  ;;  %v2120_v46 = vld [vmem:[#allocation2 + $0x10a] sm:$0xff] }
 0x26a   : > { %v1974_v17 = vpop.f32.mrf.mxu3 }
 0x26b   : > { %v2070_v4 = vadd.f32 %v1974_v17, %v1876_v22  ;;  %v5448_v22 = vadd.f32 %v5390_v34, %v5400_v0  ;;  %v2121_v0 = vld [vmem:[#allocation2 + $0x112] sm:$0xff] }
 0x26c   : > { %v1783_v43 = vpop.f32.mrf.mxu2 }
 0x26d   : > { %v2264_v32 = vadd.f32 %v2168_v40, %v2070_v4  ;;  %v1588_v38 = vpop.f32.mrf.mxu1  ;;  %v2171_v6 = vpop.f32.mrf.mxu0 }
 0x26e   : > { %v1682_v54 = vadd.f32 %v1588_v38, %v5055_v16 }
 0x26f   : > { %v2300_v63 = vadd.f32 %v5429_v41, %v2264_v32  ;;  %2024 = vmatmul.f32.gmra.mxu3 %v1925_v50 }
 0x270   : > { %1635 = vmatmul.f32.gmra.mxu1 %v2117_v37  ;;  %2218 = vmatmul.f32.gmra.mxu0 %v2119_v10  ;;  %v1877_v28 = vadd.f32 %v1783_v43, %v1682_v54 }
 0x271   : > { %v2335_v15 = vmul.f32 0.5, %v2300_v63  ;;  %1833 = vmatmul.f32.gmra.mxu2 %v1732_v42 }
 0x272   : > { %v1977_v58 = vpop.f32.mrf.mxu3 }
 0x273   : > { %v2367_v16 = vsel %vm2334_vm2, %v2335_v15, %v2300_v63  ;;  %v2071_v39 = vadd.f32 %v1977_v58, %v1877_v28  ;;  %v1927_v63 = vld [vmem:[#allocation2 + $0x111] sm:$0xff]  ;;  %v1734_v15 = vld [vmem:[#allocation2 + $0x120] sm:$0xff] }
 0x274   : > { %3960 = vtanh.f32 %v2367_v16  ;;  %v1786_v21 = vpop.f32.mrf.mxu2 }
 0x275   : > { %v2265_v52 = vadd.f32 %v2171_v6, %v2071_v39  ;;  %v1591_v18 = vpop.f32.mrf.mxu1  ;;  %v2174_v40 = vpop.f32.mrf.mxu0 }
 0x276   : > { %v1683_v37 = vadd.f32 %v1591_v18, %v5068_v47 }
 0x277   : > { %v2301_v5 = vadd.f32 %v5429_v41, %v2265_v52  ;;  %2027 = vmatmul.f32.gmra.mxu3 %v1926_v12 }
 0x278   : > { %1638 = vmatmul.f32.gmra.mxu1 %v2118_v49  ;;  %2221 = vmatmul.f32.gmra.mxu0 %v2120_v46  ;;  %v1878_v53 = vadd.f32 %v1786_v21, %v1683_v37 }
 0x279   : > { %v2336_v60 = vmul.f32 0.5, %v2301_v5  ;;  %1836 = vmatmul.f32.gmra.mxu2 %v1733_v9 }
 0x27a   : > { %v3961_v17 = vpop.eup %3960  ;;  %v1980_v4 = vpop.f32.mrf.mxu3 }
 0x27b   : > { %v2368_v47 = vsel %vm2334_vm2, %v2336_v60, %v2301_v5  ;;  %v2072_v43 = vadd.f32 %v1980_v4, %v1878_v53  ;;  %v2431_v25 = vmul.f32 0.5, %v3961_v17  ;;  %v1928_v60 = vld [vmem:[#allocation2 + $0x121] sm:$0xff] }
 0x27c   : > { %3962 = vtanh.f32 %v2368_v47  ;;  %v1789_v32 = vpop.f32.mrf.mxu2 }
 0x27d   : > { %v2266_v38 = vadd.f32 %v2174_v40, %v2072_v43  ;;  %v1594_v49 = vpop.f32.mrf.mxu1  ;;  %v2177_v6 = vpop.f32.mrf.mxu0  ;;  %v2463_v54 = vadd.f32 0.5, %v2431_v25 }
 0x27e   : > { %v1684_v50 = vadd.f32 %v1594_v49, %v5077_v45  ;;  %v5462_v45 = vadd.f32 %v5405_v26, %v5415_v13  ;;  %v2122_v13 = vld [vmem:[#allocation2 + $0x122] sm:$0xff]  ;;  %v5476_v49 = vpop.permute.xlu2 %2591 }
 0x27f   : > { %v2302_v42 = vadd.f32 %v5429_v41, %v2266_v38  ;;  %v5456_v34 = vsel %vm2334_vm2, %v2463_v54, %v3961_v17  ;;  %2030 = vmatmul.f32.gmra.mxu3 %v1927_v63  ;;  %v1735_v17 = vld [vmem:[#allocation2 + $0x128] sm:$0xff] }
 0x280   : > { %1641 = vmatmul.f32.gmra.mxu1 %v2119_v10  ;;  %2224 = vmatmul.f32.gmra.mxu0 %v2121_v0  ;;  %v1879_v58 = vadd.f32 %v1789_v32, %v1684_v50 }
 0x281   : > { %v2337_v28 = vmul.f32 0.5, %v2302_v42  ;;  %1839 = vmatmul.f32.gmra.mxu2 %v1734_v15  ;;  %2751 = vrot.lane.b32.xlu1 %v5456_v34, %s4186_s14  ;;  %v1929_v15 = vld [vmem:[#allocation2 + $0x129] sm:$0xff] }
 0x282   : > { %v3963_v16 = vpop.eup %3962  ;;  %v1983_v39 = vpop.f32.mrf.mxu3 }
 0x283   : > { %v2369_v21 = vsel %vm2334_vm2, %v2337_v28, %v2302_v42  ;;  %v2073_v52 = vadd.f32 %v1983_v39, %v1879_v58  ;;  %v2432_v18 = vmul.f32 0.5, %v3963_v16  ;;  %v2123_v58 = vld [vmem:[#allocation2 + $0x12a] sm:$0xff]  ;;  %v1736_v39 = vld [vmem:[#allocation2 + $0x138] sm:$0xff] }
 0x284   : > { %3964 = vtanh.f32 %v2369_v21  ;;  %v1792_v10 = vpop.f32.mrf.mxu2 }
 0x285   : > { %v2267_v40 = vadd.f32 %v2177_v6, %v2073_v52  ;;  %v1597_v37 = vpop.f32.mrf.mxu1  ;;  %v2180_v12 = vpop.f32.mrf.mxu0  ;;  %v2464_v5 = vadd.f32 0.5, %v2432_v18 }
 0x286   : > { %v1685_v9 = vadd.f32 %v1597_v37, %v5120_v27 }
 0x287   : > { %v2303_v53 = vadd.f32 %v5429_v41, %v2267_v40  ;;  %v5470_v26 = vsel %vm2334_vm2, %v2464_v5, %v3963_v16  ;;  %2033 = vmatmul.f32.gmra.mxu3 %v1928_v60  ;;  %v5490_v5 = vpop.permute.xlu2 %2597 }
 0x288   : > { %1644 = vmatmul.f32.gmra.mxu1 %v2120_v46  ;;  %2227 = vmatmul.f32.gmra.mxu0 %v2122_v13  ;;  %v1880_v47 = vadd.f32 %v1792_v10, %v1685_v9 }
 0x289   : > { %v2338_v4 = vmul.f32 0.5, %v2303_v53  ;;  %1842 = vmatmul.f32.gmra.mxu2 %v1735_v17  ;;  %2753 = vrot.lane.b32.xlu2 %v5470_v26, %s4186_s14 }
 0x28a   : > { %v3965_v43 = vpop.eup %3964  ;;  %v1986_v27 = vpop.f32.mrf.mxu3 }
 0x28b   : > { %v2370_v25 = vsel %vm2334_vm2, %v2338_v4, %v2303_v53  ;;  %v2074_v32 = vadd.f32 %v1986_v27, %v1880_v47  ;;  %v2433_v38 = vmul.f32 0.5, %v3965_v43  ;;  %v1930_v47 = vld [vmem:[#allocation2 + $0x139] sm:$0xff] }
 0x28c   : > { %3966 = vtanh.f32 %v2370_v25  ;;  %v1795_v6 = vpop.f32.mrf.mxu2  ;;  %v2124_v25 = vld [vmem:[#allocation2 + $0x13a] sm:$0xff] }
 0x28d   : > { %v2268_v46 = vadd.f32 %v2180_v12, %v2074_v32  ;;  %v1600_v54 = vpop.f32.mrf.mxu1  ;;  %v2183_v50 = vpop.f32.mrf.mxu0  ;;  %v2465_v63 = vadd.f32 0.5, %v2433_v38  ;;  %v1737_v32 = vld [vmem:[#allocation2 + $0x140] sm:$0xff] }
 0x28e   : > { %v1686_v42 = vadd.f32 %v1600_v54, %v5137_v56  ;;  %v5486_v56 = vpop.permute.xlu1 %2595  ;;  %v5498_v38 = vpop.permute.xlu0 %2593 }
 0x28f   : > { %v2304_v28 = vadd.f32 %v5429_v41, %v2268_v46  ;;  %2036 = vmatmul.f32.gmra.mxu3 %v1929_v15  ;;  %v5482_v16 = vsel %vm2334_vm2, %v2465_v63, %v3965_v43 }
 0x290   : > { %1647 = vmatmul.f32.gmra.mxu1 %v2121_v0  ;;  %2230 = vmatmul.f32.gmra.mxu0 %v2123_v58  ;;  %v1881_v52 = vadd.f32 %v1795_v6, %v1686_v42 }
 0x291   : > { %v2339_v21 = vmul.f32 0.5, %v2304_v28  ;;  %1845 = vmatmul.f32.gmra.mxu2 %v1736_v39  ;;  %2755 = vrot.lane.b32.xlu0 %v5482_v16, %s4186_s14 }
 0x292   : > { %v3967_v18 = vpop.eup %3966  ;;  %v1989_v10 = vpop.f32.mrf.mxu3 }
 0x293   : > { %v2371_v40 = vsel %vm2334_vm2, %v2339_v21, %v2304_v28  ;;  %v2434_v37 = vmul.f32 0.5, %v3967_v18  ;;  %v2075_v12 = vadd.f32 %v1989_v10, %v1881_v52  ;;  %v1931_v10 = vld [vmem:[#allocation2 + $0x141] sm:$0xff] }
 0x294   : > { %3968 = vtanh.f32 %v2371_v40  ;;  %v1798_v0 = vpop.f32.mrf.mxu2  ;;  %v5507_v40 = vpop.permute.xlu2 %2603 }
 0x295   : > { %v2466_v9 = vadd.f32 0.5, %v2434_v37  ;;  %v2269_v60 = vadd.f32 %v2183_v50, %v2075_v12  ;;  %v1603_v53 = vpop.f32.mrf.mxu1  ;;  %v2186_v17 = vpop.f32.mrf.mxu0 }
 0x296   : > { %v1687_v4 = vadd.f32 %v1603_v53, %v5164_v31  ;;  %v5502_v50 = vpop.permute.xlu1 %2601  ;;  %v5514_v53 = vpop.permute.xlu0 %2599 }
 0x297   : > { %v5495_v43 = vsel %vm2334_vm2, %v2466_v9, %v3967_v18  ;;  %v2305_v27 = vadd.f32 %v5429_v41, %v2269_v60  ;;  %2039 = vmatmul.f32.gmra.mxu3 %v1930_v47  ;;  %v1738_v9 = vld [vmem:[#allocation2 + $0x150] sm:$0xff] }
 0x298   : > { %1650 = vmatmul.f32.gmra.mxu1 %v2122_v13  ;;  %2233 = vmatmul.f32.gmra.mxu0 %v2124_v25  ;;  %v1882_v31 = vadd.f32 %v1798_v0, %v1687_v4  ;;  %v2125_v0 = vld [vmem:[#allocation2 + $0x142] sm:$0xff] }
 0x299   : > { %v2340_v6 = vmul.f32 0.5, %v2305_v27  ;;  %1848 = vmatmul.f32.gmra.mxu2 %v1737_v32  ;;  %2757 = vrot.lane.b32.xlu1 %v5495_v43, %s4186_s14 }
 0x29a   : > { %v3969_v46 = vpop.eup %3968  ;;  %v1992_v54 = vpop.f32.mrf.mxu3 }
 0x29b   : > { %v2372_v63 = vsel %vm2334_vm2, %v2340_v6, %v2305_v27  ;;  %v2076_v42 = vadd.f32 %v1992_v54, %v1882_v31  ;;  %v2435_v15 = vmul.f32 0.5, %v3969_v46 }
 0x29c   : > { %3970 = vtanh.f32 %v2372_v63  ;;  %v1801_v13 = vpop.f32.mrf.mxu2 }
 0x29d   : > { %v2270_v28 = vadd.f32 %v2186_v17, %v2076_v42  ;;  %v1606_v39 = vpop.f32.mrf.mxu1  ;;  %v2189_v21 = vpop.f32.mrf.mxu0  ;;  %v2467_v52 = vadd.f32 0.5, %v2435_v15  ;;  %v1932_v15 = vld [vmem:[#allocation2 + $0x151] sm:$0xff] }
 0x29e   : > { %v1688_v18 = vadd.f32 %v1606_v39, %v5177_v14  ;;  %v5518_v47 = vpop.permute.xlu1 %2607 }
 0x29f   : > { %v2306_v37 = vadd.f32 %v5429_v41, %v2270_v28  ;;  %v5512_v12 = vsel %vm2334_vm2, %v2467_v52, %v3969_v46  ;;  %2042 = vmatmul.f32.gmra.mxu3 %v1931_v10  ;;  %v2126_v28 = vld [vmem:[#allocation2 + $0x152] sm:$0xff] }
 0x2a0   : > { %1653 = vmatmul.f32.gmra.mxu1 %v2123_v58  ;;  %2236 = vmatmul.f32.gmra.mxu0 %v2125_v0  ;;  %v1883_v14 = vadd.f32 %v1801_v13, %v1688_v18  ;;  %v1739_v52 = vld [vmem:[#allocation2 + $0x158] sm:$0xff]  ;;  %v5528_v18 = vpop.permute.xlu2 %2609 }
 0x2a1   : > { %v2341_v60 = vmul.f32 0.5, %v2306_v37  ;;  %1851 = vmatmul.f32.gmra.mxu2 %v1738_v9  ;;  %2759 = vrot.lane.b32.xlu2 %v5512_v12, %s4186_s14  ;;  %v5532_v9 = vpop.permute.xlu0 %2605 }
 0x2a2   : > { %v3971_v17 = vpop.eup %3970  ;;  %v1995_v4 = vpop.f32.mrf.mxu3 }
 0x2a3   : > { %v2373_v27 = vsel %vm2334_vm2, %v2341_v60, %v2306_v37  ;;  %v2077_v32 = vadd.f32 %v1995_v4, %v1883_v14  ;;  %v2436_v6 = vmul.f32 0.5, %v3971_v17 }
 0x2a4   : > { %3972 = vtanh.f32 %v2373_v27  ;;  %v1804_v58 = vpop.f32.mrf.mxu2 }
 0x2a5   : > { %v2271_v31 = vadd.f32 %v2189_v21, %v2077_v32  ;;  %v1609_v46 = vpop.f32.mrf.mxu1  ;;  %v2192_v54 = vpop.f32.mrf.mxu0  ;;  %v2468_v63 = vadd.f32 0.5, %v2436_v6 }
 0x2a6   : > { %v1689_v42 = vadd.f32 %v1609_v46, %v5185_v7  ;;  %v5536_v4 = vpop.permute.xlu1 %2613 }
 0x2a7   : > { %v2307_v13 = vadd.f32 %v5429_v41, %v2271_v31  ;;  %2045 = vmatmul.f32.gmra.mxu3 %v1932_v15  ;;  %v5526_v39 = vsel %vm2334_vm2, %v2468_v63, %v3971_v17  ;;  %6300 = vst [vmem:[#allocation9_spill] sm:$0xff] %v5536_v4  ;;  %v2132_v4 = vld [vmem:[#allocation2 + $0x19a] sm:$0xff] }
 0x2a8   : > { %1656 = vmatmul.f32.gmra.mxu1 %v2124_v25  ;;  %2239 = vmatmul.f32.gmra.mxu0 %v2126_v28  ;;  %v1884_v7 = vadd.f32 %v1804_v58, %v1689_v42  ;;  %v1933_v58 = vld [vmem:[#allocation2 + $0x159] sm:$0xff] }
 0x2a9   : > { %v2342_v21 = vmul.f32 0.5, %v2307_v13  ;;  %1854 = vmatmul.f32.gmra.mxu2 %v1739_v52  ;;  %2761 = vrot.lane.b32.xlu0 %v5526_v39, %s4186_s14  ;;  %v2127_v42 = vld [vmem:[#allocation2 + $0x15a] sm:$0xff] }
 0x2aa   : > { %v3973_v10 = vpop.eup %3972  ;;  %v1998_v37 = vpop.f32.mrf.mxu3 }
 0x2ab   : > { %v2374_v60 = vsel %vm2334_vm2, %v2342_v21, %v2307_v13  ;;  %v2078_v14 = vadd.f32 %v1998_v37, %v1884_v7  ;;  %v2437_v17 = vmul.f32 0.5, %v3973_v10  ;;  %v1740_v13 = vld [vmem:[#allocation2 + $0x168] sm:$0xff]  ;;  %v5546_v7 = vpop.permute.xlu0 %2611 }
 0x2ac   : > { %3974 = vtanh.f32 %v2374_v60  ;;  %v1807_v25 = vpop.f32.mrf.mxu2 }
 0x2ad   : > { %v2272_v27 = vadd.f32 %v2192_v54, %v2078_v14  ;;  %v1612_v32 = vpop.f32.mrf.mxu1  ;;  %v2195_v6 = vpop.f32.mrf.mxu0  ;;  %v2469_v31 = vadd.f32 0.5, %v2437_v17 }
 0x2ae   : > { %v1690_v46 = vadd.f32 %v1612_v32, %v5192_v55 }
 0x2af   : > { %v2308_v63 = vadd.f32 %v5429_v41, %v2272_v27  ;;  %2048 = vmatmul.f32.gmra.mxu3 %v1933_v58  ;;  %v5542_v15 = vsel %vm2334_vm2, %v2469_v31, %v3973_v10  ;;  %v5550_v10 = vpop.permute.xlu2 %2615 }
 0x2b0   : > { %1659 = vmatmul.f32.gmra.mxu1 %v2125_v0  ;;  %2242 = vmatmul.f32.gmra.mxu0 %v2127_v42  ;;  %v1885_v54 = vadd.f32 %v1807_v25, %v1690_v46  ;;  %6301 = vst [vmem:[#allocation10_spill] sm:$0xff] %v5550_v10  ;;  %v1934_v25 = vld [vmem:[#allocation2 + $0x169] sm:$0xff]  ;;  %v5553_v46 = vpop.permute.xlu1 %2619 }
 0x2b1   : > { %v2343_v52 = vmul.f32 0.5, %v2308_v63  ;;  %1857 = vmatmul.f32.gmra.mxu2 %v1740_v13  ;;  %2763 = vrot.lane.b32.xlu1 %v5542_v15, %s4186_s14  ;;  %6302 = vst [vmem:[#allocation11_spill] sm:$0xff] %v5553_v46 }
 0x2b2   : > { %v3975_v21 = vpop.eup %3974  ;;  %v2001_v55 = vpop.f32.mrf.mxu3 }
 0x2b3   : > { %v2375_v37 = vsel %vm2334_vm2, %v2343_v52, %v2308_v63  ;;  %v2079_v60 = vadd.f32 %v2001_v55, %v1885_v54  ;;  %v2438_v14 = vmul.f32 0.5, %v3975_v21  ;;  %v2128_v52 = vld [vmem:[#allocation2 + $0x16a] sm:$0xff] }
 0x2b4   : > { %3976 = vtanh.f32 %v2375_v37  ;;  %v1810_v0 = vpop.f32.mrf.mxu2  ;;  %v1741_v54 = vld [vmem:[#allocation2 + $0x170] sm:$0xff] }
 0x2b5   : > { %v2273_v17 = vadd.f32 %v2195_v6, %v2079_v60  ;;  %v1615_v27 = vpop.f32.mrf.mxu1  ;;  %v2198_v32 = vpop.f32.mrf.mxu0  ;;  %v2470_v31 = vadd.f32 0.5, %v2438_v14 }
 0x2b6   : > { %v1691_v58 = vadd.f32 %v1615_v27, %v5198_v62  ;;  %v5564_v27 = vpop.permute.xlu0 %2617 }
 0x2b7   : > { %v2309_v13 = vadd.f32 %v5429_v41, %v2273_v17  ;;  %v5558_v63 = vsel %vm2334_vm2, %v2470_v31, %v3975_v21  ;;  %2051 = vmatmul.f32.gmra.mxu3 %v1934_v25  ;;  %6303 = vst [vmem:[#allocation12_spill] sm:$0xff] %v5564_v27 }
 0x2b8   : > { %1662 = vmatmul.f32.gmra.mxu1 %v2126_v28  ;;  %2245 = vmatmul.f32.gmra.mxu0 %v2128_v52  ;;  %v1886_v62 = vadd.f32 %v1810_v0, %v1691_v58  ;;  %v1935_v0 = vld [vmem:[#allocation2 + $0x171] sm:$0xff] }
 0x2b9   : > { %v2344_v6 = vmul.f32 0.5, %v2309_v13  ;;  %1860 = vmatmul.f32.gmra.mxu2 %v1741_v54  ;;  %2765 = vrot.lane.b32.xlu2 %v5558_v63, %s4186_s14  ;;  %v5566_v54 = vpop.permute.xlu2 %2621 }
 0x2ba   : > { %v3977_v55 = vpop.eup %3976  ;;  %v2004_v37 = vpop.f32.mrf.mxu3  ;;  %6304 = vst [vmem:[#allocation13_spill] sm:$0xff] %v5566_v54 }
 0x2bb   : > { %v2376_v60 = vsel %vm2334_vm2, %v2344_v6, %v2309_v13  ;;  %v2439_v14 = vmul.f32 0.5, %v3977_v55  ;;  %v2080_v17 = vadd.f32 %v2004_v37, %v1886_v62  ;;  %v2129_v6 = vld [vmem:[#allocation2 + $0x172] sm:$0xff]  ;;  %v1742_v62 = vld [vmem:[#allocation2 + $0x180] sm:$0xff]  ;;  %v5574_v37 = vpop.permute.xlu1 %2625 }
 0x2bc   : > { %3978 = vtanh.f32 %v2376_v60  ;;  %v1813_v21 = vpop.f32.mrf.mxu2  ;;  %6305 = vst [vmem:[#allocation14_spill] sm:$0xff] %v5574_v37 }
 0x2bd   : > { %v2471_v28 = vadd.f32 0.5, %v2439_v14  ;;  %v2274_v31 = vadd.f32 %v2198_v32, %v2080_v17  ;;  %v1618_v25 = vpop.f32.mrf.mxu1  ;;  %v2201_v46 = vpop.f32.mrf.mxu0 }
 0x2be   : > { %v1692_v10 = vadd.f32 %v1618_v25, %v5205_v61  ;;  %v5581_v27 = vpop.permute.xlu0 %2623 }
 0x2bf   : > { %v5571_v58 = vsel %vm2334_vm2, %v2471_v28, %v3977_v55  ;;  %v2310_v13 = vadd.f32 %v5429_v41, %v2274_v31  ;;  %2054 = vmatmul.f32.gmra.mxu3 %v1935_v0  ;;  %6306 = vst [vmem:[#allocation15_spill] sm:$0xff] %v5581_v27  ;;  %v1937_v27 = vld [vmem:[#allocation2 + $0x189] sm:$0xff] }
 0x2c0   : > { %1665 = vmatmul.f32.gmra.mxu1 %v2127_v42  ;;  %2248 = vmatmul.f32.gmra.mxu0 %v2129_v6  ;;  %v1887_v61 = vadd.f32 %v1813_v21, %v1692_v10  ;;  %v2130_v21 = vld [vmem:[#allocation2 + $0x182] sm:$0xff] }
 0x2c1   : > { %v2345_v32 = vmul.f32 0.5, %v2310_v13  ;;  %1863 = vmatmul.f32.gmra.mxu2 %v1742_v62  ;;  %2767 = vrot.lane.b32.xlu0 %v5571_v58, %s4186_s14  ;;  %v1936_v62 = vld [vmem:[#allocation2 + $0x181] sm:$0xff] }
 0x2c2   : > { %v3979_v60 = vpop.eup %3978  ;;  %v2007_v14 = vpop.f32.mrf.mxu3 }
 0x2c3   : > { %v2377_v55 = vsel %vm2334_vm2, %v2345_v32, %v2310_v13  ;;  %v2081_v17 = vadd.f32 %v2007_v14, %v1887_v61  ;;  %v2440_v28 = vmul.f32 0.5, %v3979_v60  ;;  %v5588_v32 = vpop.permute.xlu2 %2627 }
 0x2c4   : > { %3980 = vtanh.f32 %v2377_v55  ;;  %v1816_v31 = vpop.f32.mrf.mxu2  ;;  %6307 = vst [vmem:[#allocation16_spill] sm:$0xff] %v5588_v32 }
 0x2c5   : > { %v2275_v42 = vadd.f32 %v2201_v46, %v2081_v17  ;;  %v1621_v25 = vpop.f32.mrf.mxu1  ;;  %v2204_v0 = vpop.f32.mrf.mxu0  ;;  %v2472_v54 = vadd.f32 0.5, %v2440_v28  ;;  %v1743_v46 = vld [vmem:[#allocation2 + $0x188] sm:$0xff] }
 0x2c6   : > { %v1693_v37 = vadd.f32 %v1621_v25, %v5213_v19  ;;  %v5592_v17 = vpop.permute.xlu1 %2631 }
 0x2c7   : > { %v2311_v10 = vadd.f32 %v5429_v41, %v2275_v42  ;;  %2057 = vmatmul.f32.gmra.mxu3 %v1936_v62  ;;  %v5586_v13 = vsel %vm2334_vm2, %v2472_v54, %v3979_v60  ;;  %6308 = vst [vmem:[#allocation17_spill] sm:$0xff] %v5592_v17  ;;  %v2131_v17 = vld [vmem:[#allocation2 + $0x18a] sm:$0xff] }
 0x2c8   : > { %1668 = vmatmul.f32.gmra.mxu1 %v2128_v52  ;;  %2251 = vmatmul.f32.gmra.mxu0 %v2130_v21  ;;  %v1888_v19 = vadd.f32 %v1816_v31, %v1693_v37 }
 0x2c9   : > { %v2346_v61 = vmul.f32 0.5, %v2311_v10  ;;  %1866 = vmatmul.f32.gmra.mxu2 %v1743_v46  ;;  %2769 = vrot.lane.b32.xlu1 %v5586_v13, %s4186_s14 }
 0x2ca   : > { %v3981_v14 = vpop.eup %3980  ;;  %v2010_v55 = vpop.f32.mrf.mxu3 }
 0x2cb   : > { %v2441_v28 = vmul.f32 0.5, %v3981_v14  ;;  %v2378_v54 = vsel %vm2334_vm2, %v2346_v61, %v2311_v10  ;;  %v2082_v60 = vadd.f32 %v2010_v55, %v1888_v19  ;;  %v5602_v10 = vpop.permute.xlu0 %2629  ;;  %v4088_v19 = vld [vmem:[#allocation2] sm:$0xff]  ;;  %v5606_v55 = vpop.permute.xlu2 %2633 }
 0x2cc   : > { %3982 = vtanh.f32 %v2378_v54  ;;  %v1819_v42 = vpop.f32.mrf.mxu2  ;;  %6309 = vst [vmem:[#allocation18_spill] sm:$0xff] %v5602_v10 }
 0x2cd   : > { %v2473_v52 = vadd.f32 0.5, %v2441_v28  ;;  %v2276_v25 = vadd.f32 %v2204_v0, %v2082_v60  ;;  %v1624_v62 = vpop.f32.mrf.mxu1  ;;  %v2207_v32 = vpop.f32.mrf.mxu0  ;;  %6310 = vst [vmem:[#allocation19_spill] sm:$0xff] %v5606_v55  ;;  %v1938_v60 = vld [vmem:[#allocation2 + $0x199] sm:$0xff] }
 0x2ce   : > { %v1694_v46 = vadd.f32 %v1624_v62, %v5222_v59 }
 0x2cf   : > { %v5599_v37 = vsel %vm2334_vm2, %v2473_v52, %v3981_v14  ;;  %v2312_v31 = vadd.f32 %v5429_v41, %v2276_v25  ;;  %2060 = vmatmul.f32.gmra.mxu3 %v1937_v27  ;;  %v5610_v52 = vpop.permute.xlu1 %2637 }
 0x2d0   : > { %1671 = vmatmul.f32.gmra.mxu1 %v2129_v6  ;;  %2254 = vmatmul.f32.gmra.mxu0 %v2131_v17  ;;  %v1889_v0 = vadd.f32 %v1819_v42, %v1694_v46 }
 0x2d1   : > { %v2347_v61 = vmul.f32 0.5, %v2312_v31  ;;  %2771 = vrot.lane.b32.xlu2 %v5599_v37, %s4186_s14  ;;  %1869 = vmatmul.f32.gmra.mxu2 %v4088_v19 }
 0x2d2   : > { %v3983_v59 = vpop.eup %3982  ;;  %v2013_v14 = vpop.f32.mrf.mxu3 }
 0x2d3   : > { %v2379_v28 = vsel %vm2334_vm2, %v2347_v61, %v2312_v31  ;;  %v2083_v27 = vadd.f32 %v2013_v14, %v1889_v0  ;;  %v2442_v54 = vmul.f32 0.5, %v3983_v59 }
 0x2d4   : > { %3984 = vtanh.f32 %v2379_v28  ;;  %v1822_v6 = vpop.f32.mrf.mxu2  ;;  %v5620_v28 = vpop.permute.xlu0 %2635 }
 0x2d5   : > { %v2277_v25 = vadd.f32 %v2207_v32, %v2083_v27  ;;  %v1627_v62 = vpop.f32.mrf.mxu1  ;;  %v2210_v10 = vpop.f32.mrf.mxu0  ;;  %v2474_v42 = vadd.f32 0.5, %v2442_v54 }
 0x2d6   : > { %v1695_v46 = vadd.f32 %v1627_v62, %v5239_v11 }
 0x2d7   : > { %v2313_v55 = vadd.f32 %v5429_v41, %v2277_v25  ;;  %2063 = vmatmul.f32.gmra.mxu3 %v1938_v60  ;;  %v5616_v31 = vsel %vm2334_vm2, %v2474_v42, %v3983_v59  ;;  %v5624_v60 = vpop.permute.xlu2 %2639  ;;  %v1939_v59 = vld [vmem:[#allocation2 + $0x1a1] sm:$0xff] }
 0x2d8   : > { %1674 = vmatmul.f32.gmra.mxu1 %v2130_v21  ;;  %2773 = vrot.lane.b32.xlu0 %v5616_v31, %s4186_s14  ;;  %v1890_v0 = vadd.f32 %v1822_v6, %v1695_v46  ;;  %6311 = vst [vmem:[#allocation20_spill] sm:$0xff] %v5624_v60 }
 0x2d9   : > { %v2348_v61 = vmul.f32 0.5, %v2313_v55  ;;  %1872 = vmatmul.f32.gmra.mxu2 %v4088_v19  ;;  %2257 = vmatmul.f32.gmra.mxu0 %v2132_v4  ;;  %v2133_v19 = vld [vmem:[#allocation2 + $0x1a2] sm:$0xff] }
 0x2da   : > { %v3985_v32 = vpop.eup %3984  ;;  %v2016_v14 = vpop.f32.mrf.mxu3 }
 0x2db   : > { %v2380_v11 = vsel %vm2334_vm2, %v2348_v61, %v2313_v55  ;;  %v2084_v27 = vadd.f32 %v2016_v14, %v1890_v0  ;;  %v2443_v54 = vmul.f32 0.5, %v3985_v32  ;;  %v5632_v61 = vpop.permute.xlu1 %2643 }
 0x2dc   : > { %3986 = vtanh.f32 %v2380_v11  ;;  %v1825_v21 = vpop.f32.mrf.mxu2  ;;  %6312 = vst [vmem:[#allocation21_spill] sm:$0xff] %v5632_v61 }
 0x2dd   : > { %v2278_v25 = vadd.f32 %v2210_v10, %v2084_v27  ;;  %v1630_v62 = vpop.f32.mrf.mxu1  ;;  %v2213_v42 = vpop.f32.mrf.mxu0  ;;  %v2475_v6 = vadd.f32 0.5, %v2443_v54 }
 0x2de   : > { %v1696_v4 = vadd.f32 %v1630_v62, %v5250_v30 }
 0x2df   : > { %v2314_v46 = vadd.f32 %v5429_v41, %v2278_v25  ;;  %2066 = vmatmul.f32.gmra.mxu3 %v1939_v59  ;;  %v5630_v55 = vsel %vm2334_vm2, %v2475_v6, %v3985_v32  ;;  %v5638_v32 = vpop.permute.xlu0 %2641  ;;  %v5641_v60 = vpop.permute.xlu2 %2645 }
 0x2e0   : > { %1677 = vmatmul.f32.gmra.mxu1 %v2131_v17  ;;  %2775 = vrot.lane.b32.xlu1 %v5630_v55, %s4186_s14  ;;  %v1891_v0 = vadd.f32 %v1825_v21, %v1696_v4  ;;  %6313 = vst [vmem:[#allocation22_spill] sm:$0xff] %v5638_v32 }
 0x2e1   : > { %v2349_v10 = vmul.f32 0.5, %v2314_v46  ;;  %2260 = vmatmul.f32.gmra.mxu0 %v2133_v19  ;;  %6314 = vst [vmem:[#allocation23_spill] sm:$0xff] %v5641_v60 }
 0x2e2   : > { %v3987_v14 = vpop.eup %3986  ;;  %v2019_v11 = vpop.f32.mrf.mxu3 }
 0x2e3   : > { %v2381_v30 = vsel %vm2334_vm2, %v2349_v10, %v2314_v46  ;;  %v2085_v27 = vadd.f32 %v2019_v11, %v1891_v0  ;;  %v2444_v54 = vmul.f32 0.5, %v3987_v14  ;;  %v5650_v10 = vpop.permute.xlu1 %2649 }
 0x2e4   : > { %3988 = vtanh.f32 %v2381_v30  ;;  %v1828_v59 = vpop.f32.mrf.mxu2  ;;  %6315 = vst [vmem:[#allocation24_spill] sm:$0xff] %v5650_v10 }
 0x2e5   : > { %v2279_v25 = vadd.f32 %v2213_v42, %v2085_v27  ;;  %v1633_v62 = vpop.f32.mrf.mxu1  ;;  %v2216_v17 = vpop.f32.mrf.mxu0  ;;  %v2476_v6 = vadd.f32 0.5, %v2444_v54 }
 0x2e6   : > { %v1697_v61 = vadd.f32 %v1633_v62, %v5261_v23 }
 0x2e7   : > { %v2315_v21 = vadd.f32 %v5429_v41, %v2279_v25  ;;  %v5646_v4 = vsel %vm2334_vm2, %v2476_v6, %v3987_v14 }
 0x2e8   : > { %2777 = vrot.lane.b32.xlu2 %v5646_v4, %s4186_s14  ;;  %v1892_v46 = vadd.f32 %v1828_v59, %v1697_v61  ;;  %v5660_v59 = vpop.permute.xlu0 %2647 }
 0x2e9   : > { %v2350_v19 = vmul.f32 0.5, %v2315_v21  ;;  %6316 = vst [vmem:[#allocation25_spill] sm:$0xff] %v5660_v59 }
 0x2ea   : > { %v3989_v42 = vpop.eup %3988  ;;  %v2022_v0 = vpop.f32.mrf.mxu3 }
 0x2eb   : > { %v2382_v23 = vsel %vm2334_vm2, %v2350_v19, %v2315_v21  ;;  %v2086_v11 = vadd.f32 %v2022_v0, %v1892_v46  ;;  %v2445_v30 = vmul.f32 0.5, %v3989_v42  ;;  %v5664_v21 = vpop.permute.xlu2 %2651 }
 0x2ec   : > { %3990 = vtanh.f32 %v2382_v23  ;;  %v1831_v27 = vpop.f32.mrf.mxu2  ;;  %6317 = vst [vmem:[#allocation26_spill] sm:$0xff] %v5664_v21 }
 0x2ed   : > { %v2280_v54 = vadd.f32 %v2216_v17, %v2086_v11  ;;  %v1636_v25 = vpop.f32.mrf.mxu1  ;;  %v2219_v14 = vpop.f32.mrf.mxu0  ;;  %v2477_v62 = vadd.f32 0.5, %v2445_v30 }
 0x2ee   : > { %v1698_v6 = vadd.f32 %v1636_v25, %v5273_v44 }
 0x2ef   : > { %v2316_v60 = vadd.f32 %v5429_v41, %v2280_v54  ;;  %v5658_v61 = vsel %vm2334_vm2, %v2477_v62, %v3989_v42 }
 0x2f0   : > { %2779 = vrot.lane.b32.xlu0 %v5658_v61, %s4186_s14  ;;  %v1893_v17 = vadd.f32 %v1831_v27, %v1698_v6 }
 0x2f1   : > { %v2351_v19 = vmul.f32 0.5, %v2316_v60 }
 0x2f2   : > { %v3991_v46 = vpop.eup %3990  ;;  %v2025_v0 = vpop.f32.mrf.mxu3 }
 0x2f3   : > { %v2383_v44 = vsel %vm2334_vm2, %v2351_v19, %v2316_v60  ;;  %v2087_v23 = vadd.f32 %v2025_v0, %v1893_v17  ;;  %v2752_v11 = vpop.permute.xlu1 %2751  ;;  %v2446_v30 = vmul.f32 0.5, %v3991_v46 }
 0x2f4   : > { %3992 = vtanh.f32 %v2383_v44  ;;  %v1834_v42 = vpop.f32.mrf.mxu2  ;;  %v2847_v59 = vmul.f32 %v2752_v11, %v5456_v34  ;;  %v2754_v44 = vpop.permute.xlu2 %2753 }
 0x2f5   : > { %v2281_v54 = vadd.f32 %v2219_v14, %v2087_v23  ;;  %v1639_v25 = vpop.f32.mrf.mxu1  ;;  %v2222_v62 = vpop.f32.mrf.mxu0  ;;  %v2478_v10 = vadd.f32 0.5, %v2446_v30 }
 0x2f6   : > { %v1699_v21 = vadd.f32 %v1639_v25, %v5285_v35  ;;  %v5678_v14 = vpop.permute.xlu0 %2653 }
 0x2f7   : > { %v2317_v27 = vadd.f32 %v5429_v41, %v2281_v54  ;;  %v5673_v6 = vsel %vm2334_vm2, %v2478_v10, %v3991_v46 }
 0x2f8   : > { %2781 = vrot.lane.b32.xlu1 %v5673_v6, %s4186_s14  ;;  %2911 = vrot.lane.b32.xlu0 %v2847_v59, %s4186_s14  ;;  %v1894_v19 = vadd.f32 %v1834_v42, %v1699_v21  ;;  %v2848_v59 = vmul.f32 %v2754_v44, %v5470_v26 }
 0x2f9   : > { %v2352_v60 = vmul.f32 0.5, %v2317_v27 }
 0x2fa   : > { %v3993_v17 = vpop.eup %3992  ;;  %v2028_v0 = vpop.f32.mrf.mxu3 }
 0x2fb   : > { %v2384_v35 = vsel %vm2334_vm2, %v2352_v60, %v2317_v27  ;;  %v2088_v23 = vadd.f32 %v2028_v0, %v1894_v19  ;;  %v2447_v11 = vmul.f32 0.5, %v3993_v17 }
 0x2fc   : > { %3994 = vtanh.f32 %v2384_v35  ;;  %v1837_v10 = vpop.f32.mrf.mxu2 }
 0x2fd   : > { %v2282_v46 = vadd.f32 %v2222_v62, %v2088_v23  ;;  %v1642_v30 = vpop.f32.mrf.mxu1  ;;  %v2225_v54 = vpop.f32.mrf.mxu0  ;;  %v2479_v25 = vadd.f32 0.5, %v2447_v11 }
 0x2fe   : > { %v1700_v32 = vadd.f32 %v1642_v30, %v5297_v51 }
 0x2ff   : > { %v2318_v21 = vadd.f32 %v5429_v41, %v2282_v46  ;;  %v5687_v42 = vsel %vm2334_vm2, %v2479_v25, %v3993_v17 }
 0x300   : > { %2913 = vrot.lane.b32.xlu1 %v2848_v59, %s4186_s14  ;;  %2783 = vrot.lane.b32.xlu2 %v5687_v42, %s4186_s14  ;;  %v1895_v62 = vadd.f32 %v1837_v10, %v1700_v32 }
 0x301   : > { %v2353_v27 = vmul.f32 0.5, %v2318_v21 }
 0x302   : > { %v3995_v60 = vpop.eup %3994  ;;  %v2031_v19 = vpop.f32.mrf.mxu3 }
 0x303   : > { %v2385_v0 = vsel %vm2334_vm2, %v2353_v27, %v2318_v21  ;;  %v2756_v44 = vpop.permute.xlu0 %2755  ;;  %v2089_v51 = vadd.f32 %v2031_v19, %v1895_v62  ;;  %v2448_v35 = vmul.f32 0.5, %v3995_v60 }
 0x304   : > { %3996 = vtanh.f32 %v2385_v0  ;;  %v1840_v23 = vpop.f32.mrf.mxu2  ;;  %v2849_v25 = vmul.f32 %v2756_v44, %v5482_v16 }
 0x305   : > { %v2283_v11 = vadd.f32 %v2225_v54, %v2089_v51  ;;  %v1645_v17 = vpop.f32.mrf.mxu1  ;;  %v2228_v46 = vpop.f32.mrf.mxu0  ;;  %v2480_v30 = vadd.f32 0.5, %v2448_v35 }
 0x306   : > { %v1701_v59 = vadd.f32 %v1645_v17, %v5312_v36 }
 0x307   : > { %v2319_v32 = vadd.f32 %v5429_v41, %v2283_v11  ;;  %v5699_v10 = vsel %vm2334_vm2, %v2480_v30, %v3995_v60 }
 0x308   : > { %2915 = vrot.lane.b32.xlu2 %v2849_v25, %s4186_s14  ;;  %2785 = vrot.lane.b32.xlu0 %v5699_v10, %s4186_s14  ;;  %v1896_v54 = vadd.f32 %v1840_v23, %v1701_v59 }
 0x309   : > { %v2354_v21 = vmul.f32 0.5, %v2319_v32 }
 0x30a   : > { %v3997_v27 = vpop.eup %3996  ;;  %v2034_v62 = vpop.f32.mrf.mxu3 }
 0x30b   : > { %v2386_v19 = vsel %vm2334_vm2, %v2354_v21, %v2319_v32  ;;  %v2090_v0 = vadd.f32 %v2034_v62, %v1896_v54  ;;  %v2758_v36 = vpop.permute.xlu1 %2757  ;;  %v2449_v44 = vmul.f32 0.5, %v3997_v27  ;;  %v2760_v62 = vpop.permute.xlu2 %2759 }
 0x30c   : > { %3998 = vtanh.f32 %v2386_v19  ;;  %v1843_v51 = vpop.f32.mrf.mxu2  ;;  %v2850_v30 = vmul.f32 %v2758_v36, %v5495_v43 }
 0x30d   : > { %v2284_v35 = vadd.f32 %v2228_v46, %v2090_v0  ;;  %v1648_v60 = vpop.f32.mrf.mxu1  ;;  %v2231_v11 = vpop.f32.mrf.mxu0  ;;  %v2481_v17 = vadd.f32 0.5, %v2449_v44 }
 0x30e   : > { %v1702_v25 = vadd.f32 %v1648_v60, %v5326_v3 }
 0x30f   : > { %v2320_v23 = vadd.f32 %v5429_v41, %v2284_v35  ;;  %v5711_v59 = vsel %vm2334_vm2, %v2481_v17, %v3997_v27  ;;  %v2851_v17 = vmul.f32 %v2760_v62, %v5512_v12 }
 0x310   : > { %2787 = vrot.lane.b32.xlu1 %v5711_v59, %s4186_s14  ;;  %2917 = vrot.lane.b32.xlu0 %v2850_v30, %s4186_s14  ;;  %v1897_v46 = vadd.f32 %v1843_v51, %v1702_v25 }
 0x311   : > { %v2355_v32 = vmul.f32 0.5, %v2320_v23 }
 0x312   : > { %v3999_v21 = vpop.eup %3998  ;;  %v2037_v54 = vpop.f32.mrf.mxu3 }
 0x313   : > { %v2387_v19 = vsel %vm2334_vm2, %v2355_v32, %v2320_v23  ;;  %v2091_v3 = vadd.f32 %v2037_v54, %v1897_v46  ;;  %v2450_v0 = vmul.f32 0.5, %v3999_v21 }
 0x314   : > { %4000 = vtanh.f32 %v2387_v19  ;;  %v1846_v36 = vpop.f32.mrf.mxu2 }
 0x315   : > { %v2285_v44 = vadd.f32 %v2231_v11, %v2091_v3  ;;  %v1651_v27 = vpop.f32.mrf.mxu1  ;;  %v2234_v35 = vpop.f32.mrf.mxu0  ;;  %v2482_v60 = vadd.f32 0.5, %v2450_v0 }
 0x316   : > { %v1703_v30 = vadd.f32 %v1651_v27, %v5341_v1 }
 0x317   : > { %v2321_v51 = vadd.f32 %v5429_v41, %v2285_v44  ;;  %v5723_v25 = vsel %vm2334_vm2, %v2482_v60, %v3999_v21 }
 0x318   : > { %2919 = vrot.lane.b32.xlu1 %v2851_v17, %s4186_s14  ;;  %2789 = vrot.lane.b32.xlu2 %v5723_v25, %s4186_s14  ;;  %v1898_v11 = vadd.f32 %v1846_v36, %v1703_v30  ;;  %v5735_v36 = vld [vmem:[%s6294_s4] ss:$0 sm:$0xff] }
 0x319   : > { %v2356_v23 = vmul.f32 0.5, %v2321_v51 }
 0x31a   : > { %v4001_v32 = vpop.eup %4000  ;;  %v2040_v46 = vpop.f32.mrf.mxu3 }
 0x31b   : > { %v2388_v54 = vsel %vm2334_vm2, %v2356_v23, %v2321_v51  ;;  %v2762_v62 = vpop.permute.xlu0 %2761  ;;  %v2092_v1 = vadd.f32 %v2040_v46, %v1898_v11  ;;  %v2451_v19 = vmul.f32 0.5, %v4001_v32 }
 0x31c   : > { %4002 = vtanh.f32 %v2388_v54  ;;  %v1849_v41 = vpop.f32.mrf.mxu2  ;;  %v2852_v27 = vmul.f32 %v2762_v62, %v5526_v39 }
 0x31d   : > { %v2286_v3 = vadd.f32 %v2234_v35, %v2092_v1  ;;  %v1654_v21 = vpop.f32.mrf.mxu1  ;;  %v2237_v0 = vpop.f32.mrf.mxu0  ;;  %v2483_v44 = vadd.f32 0.5, %v2451_v19 }
 0x31e   : > { %v1704_v60 = vadd.f32 %v1654_v21, %v5356_v33 }
 0x31f   : > { %v2322_v17 = vadd.f32 %v5735_v36, %v2286_v3  ;;  %v5740_v30 = vsel %vm2334_vm2, %v2483_v44, %v4001_v32 }
 0x320   : > { %2921 = vrot.lane.b32.xlu2 %v2852_v27, %s4186_s14  ;;  %2791 = vrot.lane.b32.xlu0 %v5740_v30, %s4186_s14  ;;  %v1899_v51 = vadd.f32 %v1849_v41, %v1704_v60 }
 0x321   : > { %v2357_v35 = vmul.f32 0.5, %v2322_v17 }
 0x322   : > { %v4003_v23 = vpop.eup %4002  ;;  %v2043_v33 = vpop.f32.mrf.mxu3 }
 0x323   : > { %v2389_v11 = vsel %vm2334_vm2, %v2357_v35, %v2322_v17  ;;  %v2093_v46 = vadd.f32 %v2043_v33, %v1899_v51  ;;  %v2764_v54 = vpop.permute.xlu1 %2763  ;;  %v2452_v62 = vmul.f32 0.5, %v4003_v23  ;;  %v2766_v33 = vpop.permute.xlu2 %2765 }
 0x324   : > { %4004 = vtanh.f32 %v2389_v11  ;;  %v1852_v1 = vpop.f32.mrf.mxu2  ;;  %v2853_v44 = vmul.f32 %v2764_v54, %v5542_v15 }
 0x325   : > { %v2287_v19 = vadd.f32 %v2237_v0, %v2093_v46  ;;  %v1657_v32 = vpop.f32.mrf.mxu1  ;;  %v2240_v3 = vpop.f32.mrf.mxu0  ;;  %v2484_v21 = vadd.f32 0.5, %v2452_v62 }
 0x326   : > { %v1705_v27 = vadd.f32 %v1657_v32, %v5371_v24 }
 0x327   : > { %v2323_v41 = vadd.f32 %v5735_v36, %v2287_v19  ;;  %v5752_v60 = vsel %vm2334_vm2, %v2484_v21, %v4003_v23  ;;  %v2854_v21 = vmul.f32 %v2766_v33, %v5558_v63 }
 0x328   : > { %2793 = vrot.lane.b32.xlu1 %v5752_v60, %s4186_s14  ;;  %2923 = vrot.lane.b32.xlu0 %v2853_v44, %s4186_s14  ;;  %v1900_v0 = vadd.f32 %v1852_v1, %v1705_v27 }
 0x329   : > { %v2358_v17 = vmul.f32 0.5, %v2323_v41 }
 0x32a   : > { %v4005_v35 = vpop.eup %4004  ;;  %v2046_v51 = vpop.f32.mrf.mxu3 }
 0x32b   : > { %v2390_v11 = vsel %vm2334_vm2, %v2358_v17, %v2323_v41  ;;  %v2094_v24 = vadd.f32 %v2046_v51, %v1900_v0  ;;  %v2453_v46 = vmul.f32 0.5, %v4005_v35 }
 0x32c   : > { %4006 = vtanh.f32 %v2390_v11  ;;  %v1855_v54 = vpop.f32.mrf.mxu2 }
 0x32d   : > { %v2288_v62 = vadd.f32 %v2240_v3, %v2094_v24  ;;  %v1660_v23 = vpop.f32.mrf.mxu1  ;;  %v2243_v19 = vpop.f32.mrf.mxu0  ;;  %v2485_v32 = vadd.f32 0.5, %v2453_v46 }
 0x32e   : > { %v1706_v44 = vadd.f32 %v1660_v23, %v5383_v8 }
 0x32f   : > { %v2324_v1 = vadd.f32 %v5735_v36, %v2288_v62  ;;  %v5764_v27 = vsel %vm2334_vm2, %v2485_v32, %v4005_v35 }
 0x330   : > { %2925 = vrot.lane.b32.xlu1 %v2854_v21, %s4186_s14  ;;  %2795 = vrot.lane.b32.xlu2 %v5764_v27, %s4186_s14  ;;  %v1901_v3 = vadd.f32 %v1855_v54, %v1706_v44 }
 0x331   : > { %v2359_v41 = vmul.f32 0.5, %v2324_v1 }
 0x332   : > { %v4007_v17 = vpop.eup %4006  ;;  %v2049_v0 = vpop.f32.mrf.mxu3 }
 0x333   : > { %v2391_v51 = vsel %vm2334_vm2, %v2359_v41, %v2324_v1  ;;  %v2768_v33 = vpop.permute.xlu0 %2767  ;;  %v2095_v8 = vadd.f32 %v2049_v0, %v1901_v3  ;;  %v2454_v11 = vmul.f32 0.5, %v4007_v17 }
 0x334   : > { %4008 = vtanh.f32 %v2391_v51  ;;  %v1858_v24 = vpop.f32.mrf.mxu2  ;;  %v2855_v32 = vmul.f32 %v2768_v33, %v5571_v58 }
 0x335   : > { %v2289_v46 = vadd.f32 %v2243_v19, %v2095_v8  ;;  %v1663_v35 = vpop.f32.mrf.mxu1  ;;  %v2246_v62 = vpop.f32.mrf.mxu0  ;;  %v2486_v23 = vadd.f32 0.5, %v2454_v11 }
 0x336   : > { %v1707_v21 = vadd.f32 %v1663_v35, %v5398_v57 }
 0x337   : > { %v2325_v54 = vadd.f32 %v5735_v36, %v2289_v46  ;;  %v5776_v44 = vsel %vm2334_vm2, %v2486_v23, %v4007_v17 }
 0x338   : > { %2927 = vrot.lane.b32.xlu2 %v2855_v32, %s4186_s14  ;;  %2797 = vrot.lane.b32.xlu0 %v5776_v44, %s4186_s14  ;;  %v1902_v19 = vadd.f32 %v1858_v24, %v1707_v21 }
 0x339   : > { %v2360_v1 = vmul.f32 0.5, %v2325_v54 }
 0x33a   : > { %v4009_v41 = vpop.eup %4008  ;;  %v2052_v3 = vpop.f32.mrf.mxu3 }
 0x33b   : > { %v2392_v0 = vsel %vm2334_vm2, %v2360_v1, %v2325_v54  ;;  %v2096_v51 = vadd.f32 %v2052_v3, %v1902_v19  ;;  %v2770_v57 = vpop.permute.xlu1 %2769  ;;  %v2455_v33 = vmul.f32 0.5, %v4009_v41  ;;  %v2772_v3 = vpop.permute.xlu2 %2771 }
 0x33c   : > { %4010 = vtanh.f32 %v2392_v0  ;;  %v1861_v8 = vpop.f32.mrf.mxu2  ;;  %v2856_v23 = vmul.f32 %v2770_v57, %v5586_v13 }
 0x33d   : > { %v2290_v11 = vadd.f32 %v2246_v62, %v2096_v51  ;;  %v1666_v17 = vpop.f32.mrf.mxu1  ;;  %v2249_v46 = vpop.f32.mrf.mxu0  ;;  %v2487_v35 = vadd.f32 0.5, %v2455_v33 }
 0x33e   : > { %v1708_v32 = vadd.f32 %v1666_v17, %v5413_v2  ;;  %v2857_v17 = vmul.f32 %v2772_v3, %v5599_v37 }
 0x33f   : > { %v2326_v24 = vadd.f32 %v5735_v36, %v2290_v11  ;;  %v5788_v21 = vsel %vm2334_vm2, %v2487_v35, %v4009_v41 }
 0x340   : > { %2799 = vrot.lane.b32.xlu1 %v5788_v21, %s4186_s14  ;;  %2929 = vrot.lane.b32.xlu0 %v2856_v23, %s4186_s14  ;;  %v1903_v62 = vadd.f32 %v1861_v8, %v1708_v32 }
 0x341   : > { %v2361_v54 = vmul.f32 0.5, %v2326_v24 }
 0x342   : > { %v4011_v1 = vpop.eup %4010  ;;  %v2055_v19 = vpop.f32.mrf.mxu3 }
 0x343   : > { %v2393_v0 = vsel %vm2334_vm2, %v2361_v54, %v2326_v24  ;;  %v2097_v2 = vadd.f32 %v2055_v19, %v1903_v62  ;;  %v2456_v51 = vmul.f32 0.5, %v4011_v1 }
 0x344   : > { %4012 = vtanh.f32 %v2393_v0  ;;  %v1864_v57 = vpop.f32.mrf.mxu2 }
 0x345   : > { %v2291_v33 = vadd.f32 %v2249_v46, %v2097_v2  ;;  %v1669_v41 = vpop.f32.mrf.mxu1  ;;  %v2488_v11 = vadd.f32 0.5, %v2456_v51  ;;  %v2252_v8 = vpop.f32.mrf.mxu0 }
 0x346   : > { %v1709_v35 = vadd.f32 %v1669_v41, %v5424_v20 }
 0x347   : > { %v2327_v23 = vadd.f32 %v5735_v36, %v2291_v33  ;;  %v5800_v32 = vsel %vm2334_vm2, %v2488_v11, %v4011_v1 }
 0x348   : > { %2931 = vrot.lane.b32.xlu1 %v2857_v17, %s4186_s14  ;;  %2801 = vrot.lane.b32.xlu2 %v5800_v32, %s4186_s14  ;;  %v1904_v46 = vadd.f32 %v1864_v57, %v1709_v35 }
 0x349   : > { %v2362_v24 = vmul.f32 0.5, %v2327_v23 }
 0x34a   : > { %v4013_v54 = vpop.eup %4012  ;;  %v2058_v62 = vpop.f32.mrf.mxu3 }
 0x34b   : > { %v2394_v19 = vsel %vm2334_vm2, %v2362_v24, %v2327_v23  ;;  %v2774_v20 = vpop.permute.xlu0 %2773  ;;  %v2098_v3 = vadd.f32 %v2058_v62, %v1904_v46  ;;  %v2457_v0 = vmul.f32 0.5, %v4013_v54 }
 0x34c   : > { %4014 = vtanh.f32 %v2394_v19  ;;  %v1867_v2 = vpop.f32.mrf.mxu2  ;;  %v2858_v41 = vmul.f32 %v2774_v20, %v5616_v31 }
 0x34d   : > { %v2292_v51 = vadd.f32 %v2252_v8, %v2098_v3  ;;  %v1672_v1 = vpop.f32.mrf.mxu1  ;;  %v2489_v33 = vadd.f32 0.5, %v2457_v0  ;;  %v2255_v23 = vpop.f32.mrf.mxu0 }
 0x34e   : > { %v1710_v11 = vadd.f32 %v1672_v1, %v5440_v29 }
 0x34f   : > { %v2328_v17 = vadd.f32 %v5735_v36, %v2292_v51  ;;  %v5812_v57 = vsel %vm2334_vm2, %v2489_v33, %v4013_v54 }
 0x350   : > { %2933 = vrot.lane.b32.xlu2 %v2858_v41, %s4186_s14  ;;  %2803 = vrot.lane.b32.xlu0 %v5812_v57, %s4186_s14  ;;  %v1905_v8 = vadd.f32 %v1867_v2, %v1710_v11 }
 0x351   : > { %v2363_v35 = vmul.f32 0.5, %v2328_v17 }
 0x352   : > { %v4015_v24 = vpop.eup %4014  ;;  %v2061_v46 = vpop.f32.mrf.mxu3 }
 0x353   : > { %v2395_v62 = vsel %vm2334_vm2, %v2363_v35, %v2328_v17  ;;  %v2099_v29 = vadd.f32 %v2061_v46, %v1905_v8  ;;  %v2776_v19 = vpop.permute.xlu1 %2775  ;;  %v2458_v20 = vmul.f32 0.5, %v4015_v24  ;;  %v2778_v46 = vpop.permute.xlu2 %2777 }
 0x354   : > { %4016 = vtanh.f32 %v2395_v62  ;;  %v1870_v0 = vpop.f32.mrf.mxu2  ;;  %v2859_v1 = vmul.f32 %v2776_v19, %v5630_v55 }
 0x355   : > { %v2293_v3 = vadd.f32 %v2255_v23, %v2099_v29  ;;  %v1675_v54 = vpop.f32.mrf.mxu1  ;;  %v2490_v51 = vadd.f32 0.5, %v2458_v20 }
 0x356   : > { %v1711_v33 = vadd.f32 %v1675_v54, %v5448_v22  ;;  %v2258_v35 = vpop.f32.mrf.mxu0 }
 0x357   : > { %v2329_v41 = vadd.f32 %v5735_v36, %v2293_v3  ;;  %v5824_v2 = vsel %vm2334_vm2, %v2490_v51, %v4015_v24  ;;  %v2860_v3 = vmul.f32 %v2778_v46, %v5646_v4 }
 0x358   : > { %2805 = vrot.lane.b32.xlu1 %v5824_v2, %s4186_s14  ;;  %2935 = vrot.lane.b32.xlu0 %v2859_v1, %s4186_s14  ;;  %v1906_v17 = vadd.f32 %v1870_v0, %v1711_v33 }
 0x359   : > { %v2364_v11 = vmul.f32 0.5, %v2329_v41 }
 0x35a   : > { %v4017_v23 = vpop.eup %4016  ;;  %v2064_v8 = vpop.f32.mrf.mxu3 }
 0x35b   : > { %v2396_v22 = vsel %vm2334_vm2, %v2364_v11, %v2329_v41  ;;  %v2100_v62 = vadd.f32 %v2064_v8, %v1906_v17  ;;  %v2459_v29 = vmul.f32 0.5, %v4017_v23 }
 0x35c   : > { %4018 = vtanh.f32 %v2396_v22  ;;  %v1873_v0 = vpop.f32.mrf.mxu2 }
 0x35d   : > { %v1678_v19 = vpop.f32.mrf.mxu1  ;;  %v2294_v24 = vadd.f32 %v2258_v35, %v2100_v62  ;;  %v2491_v20 = vadd.f32 0.5, %v2459_v29 }
 0x35e   : > { %v1712_v54 = vadd.f32 %v1678_v19, %v5462_v45  ;;  %v2261_v8 = vpop.f32.mrf.mxu0 }
 0x35f   : > { %v2330_v51 = vadd.f32 %v5735_v36, %v2294_v24  ;;  %v5836_v1 = vsel %vm2334_vm2, %v2491_v20, %v4017_v23  ;;  %v2687_v20 = vmul.f32 %v5476_v49, %v5456_v34  ;;  %v2688_v49 = vmul.f32 %v5498_v38, %v5470_v26 }
 0x360   : > { %2937 = vrot.lane.b32.xlu1 %v2860_v3, %s4186_s14  ;;  %2807 = vrot.lane.b32.xlu2 %v5836_v1, %s4186_s14  ;;  %v1907_v11 = vadd.f32 %v1873_v0, %v1712_v54 }
 0x361   : > { %v2365_v33 = vmul.f32 0.5, %v2330_v51 }
 0x362   : > { %v4019_v41 = vpop.eup %4018  ;;  %v2780_v17 = vpop.permute.xlu0 %2779 }
 0x363   : > { %v2397_v35 = vsel %vm2334_vm2, %v2365_v33, %v2330_v51  ;;  %v2067_v45 = vpop.f32.mrf.mxu3  ;;  %v2460_v46 = vmul.f32 0.5, %v4019_v41  ;;  %v2861_v23 = vmul.f32 %v2780_v17, %v5658_v61  ;;  %v2784_v17 = vpop.permute.xlu2 %2783 }
 0x364   : > { %4020 = vtanh.f32 %v2397_v35  ;;  %v2101_v22 = vadd.f32 %v2067_v45, %v1907_v11 }
 0x365   : > { %v2492_v62 = vadd.f32 0.5, %v2460_v46 }
 0x366   : > { %v2295_v29 = vadd.f32 %v2261_v8, %v2101_v22 }
 0x367   : > { %v5846_v19 = vsel %vm2334_vm2, %v2492_v62, %v4019_v41 }
 0x368   : > { %v2331_v24 = vadd.f32 %v5735_v36, %v2295_v29  ;;  %2939 = vrot.lane.b32.xlu2 %v2861_v23, %s4186_s14  ;;  %2809 = vrot.lane.b32.xlu0 %v5846_v19, %s4186_s14  ;;  %v2689_v23 = vmul.f32 %v5486_v56, %v5482_v16 }
 0x36a   : > { %v4021_v3 = vpop.eup %4020  ;;  %v2912_v54 = vpop.permute.xlu0 %2911  ;;  %v2366_v33 = vmul.f32 0.5, %v2331_v24 }
 0x36b   : > { %v2782_v51 = vpop.permute.xlu1 %2781  ;;  %v3007_v0 = vadd.f32 %v2912_v54, %v2687_v20  ;;  %v2461_v11 = vmul.f32 0.5, %v4021_v3  ;;  %v2916_v62 = vpop.permute.xlu2 %2915  ;;  %v2863_v20 = vmul.f32 %v2784_v17, %v5687_v42 }
 0x36c   : > { %v2862_v36 = vmul.f32 %v2782_v51, %v5673_v6  ;;  %v2398_v41 = vsel %vm2334_vm2, %v2366_v33, %v2331_v24  ;;  %v3009_v38 = vadd.f32 %v2916_v62, %v2689_v23 }
 0x36d   : > { %3263 = vrot.lane.b32.xlu1 %v3007_v0, %s4188_s17  ;;  %4022 = vtanh.f32 %v3007_v0  ;;  %v2493_v35 = vadd.f32 0.5, %v2461_v11 }
 0x36e   : > { %4024 = vtanh.f32 %v2398_v41  ;;  %v2691_v41 = vmul.f32 %v5514_v53, %v5512_v12 }
 0x36f   : > { %v5863_v22 = vsel %vm2334_vm2, %v2493_v35, %v4021_v3 }
 0x370   : > { %2941 = vrot.lane.b32.xlu0 %v2862_v36, %s4186_s14  ;;  %v2690_v36 = vmul.f32 %v5490_v5, %v5495_v43  ;;  %v2692_v5 = vmul.f32 %v5502_v50, %v5526_v39 }
 0x373   : > { %v2914_v45 = vpop.permute.xlu1 %2913  ;;  %v4023_v46 = vpop.eup %4022 }
 0x374   : > { %v3008_v8 = vadd.f32 %v2914_v45, %v2688_v49  ;;  %3103 = vrot.lane.b32.xlu2 %v4023_v46, %s4186_s14  ;;  %v4025_v29 = vpop.eup %4024  ;;  %v2790_v11 = vpop.permute.xlu2 %2789 }
 0x375   : > { %2811 = vrot.lane.b32.xlu1 %v5863_v22, %s4186_s14  ;;  %v2462_v54 = vmul.f32 0.5, %v4025_v29  ;;  %v2866_v23 = vmul.f32 %v2790_v11, %v5723_v25 }
 0x376   : > { %4026 = vtanh.f32 %v3008_v8 }
 0x377   : > { %4028 = vtanh.f32 %v3009_v38  ;;  %v2494_v51 = vadd.f32 0.5, %v2462_v54 }
 0x379   : > { %v5876_v56 = vsel %vm2334_vm2, %v2494_v51, %v4025_v29  ;;  %v2694_v51 = vmul.f32 %v5532_v9, %v5558_v63 }
 0x37a   : > { %v2786_v3 = vpop.permute.xlu0 %2785 }
 0x37b   : > { %v2864_v45 = vmul.f32 %v2786_v3, %v5699_v10  ;;  %v2693_v3 = vmul.f32 %v5507_v40, %v5542_v15  ;;  %v2695_v40 = vmul.f32 %v5518_v47, %v5571_v58 }
 0x37c   : > { %v4027_v24 = vpop.eup %4026  ;;  %3265 = vrot.lane.b32.xlu2 %v3008_v8, %s4188_s17  ;;  %v2922_v46 = vpop.permute.xlu2 %2921 }
 0x37d   : > { %3105 = vrot.lane.b32.xlu0 %v4027_v24, %s4186_s14  ;;  %2943 = vrot.lane.b32.xlu1 %v2863_v20, %s4186_s14  ;;  %v4029_v33 = vpop.eup %4028  ;;  %v3012_v53 = vadd.f32 %v2922_v46, %v2692_v5 }
 0x382   : > { %v2788_v0 = vpop.permute.xlu1 %2787  ;;  %v2918_v17 = vpop.permute.xlu0 %2917 }
 0x383   : > { %v3010_v35 = vadd.f32 %v2918_v17, %v2690_v36  ;;  %v2865_v48 = vmul.f32 %v2788_v0, %v5711_v59 }
 0x384   : > { %2813 = vrot.lane.b32.xlu2 %v5876_v56, %s4186_s14 }
 0x385   : > { %3267 = vrot.lane.b32.xlu0 %v3009_v38, %s4188_s17  ;;  %3107 = vrot.lane.b32.xlu1 %v4029_v33, %s4186_s14 }
 0x38a   : > { %v2920_v49 = vpop.permute.xlu1 %2919  ;;  %v2796_v24 = vpop.permute.xlu2 %2795 }
 0x38b   : > { %v3011_v8 = vadd.f32 %v2920_v49, %v2691_v41 }
 0x38c   : > { %2945 = vrot.lane.b32.xlu2 %v2864_v45, %s4186_s14 }
 0x38d   : > { %2947 = vrot.lane.b32.xlu0 %v2865_v48, %s4186_s14  ;;  %4030 = vtanh.f32 %v3011_v8  ;;  %3269 = vrot.lane.b32.xlu1 %v3010_v35, %s4188_s17  ;;  %v2869_v48 = vmul.f32 %v2796_v24, %v5764_v27 }
 0x38e   : > { %4032 = vtanh.f32 %v3010_v35 }
 0x38f   : > { %4034 = vtanh.f32 %v3012_v53 }
 0x392   : > { %v2792_v38 = vpop.permute.xlu0 %2791  ;;  %v2928_v17 = vpop.permute.xlu2 %2927 }
 0x393   : > { %v4031_v62 = vpop.eup %4030  ;;  %v2867_v36 = vmul.f32 %v2792_v38, %v5740_v30  ;;  %v3015_v9 = vadd.f32 %v2928_v17, %v2695_v40 }
 0x394   : > { %v4033_v29 = vpop.eup %4032 }
 0x395   : > { %3111 = vrot.lane.b32.xlu0 %v4031_v62, %s4186_s14  ;;  %3109 = vrot.lane.b32.xlu2 %v4033_v29, %s4186_s14  ;;  %v4035_v54 = vpop.eup %4034  ;;  %v2696_v62 = vmul.f32 %v5528_v18, %v5586_v13  ;;  %v6318_v18 = vld [vmem:[#allocation9_spill] sm:$0xff] }
 0x396   : > { %2949 = vrot.lane.b32.xlu1 %v2866_v23, %s4186_s14  ;;  %v2697_v23 = vmul.f32 %v5546_v7, %v5599_v37 }
 0x39a   : > { %v2794_v20 = vpop.permute.xlu1 %2793  ;;  %v2924_v50 = vpop.permute.xlu0 %2923 }
 0x39b   : > { %v3013_v0 = vadd.f32 %v2924_v50, %v2693_v3  ;;  %v2868_v33 = vmul.f32 %v2794_v20, %v5752_v60  ;;  %v2698_v3 = vmul.f32 %v6318_v18, %v5616_v31 }
 0x39d   : > { %3273 = vrot.lane.b32.xlu0 %v3012_v53, %s4188_s17  ;;  %3271 = vrot.lane.b32.xlu2 %v3011_v8, %s4188_s17 }
 0x39e   : > { %3113 = vrot.lane.b32.xlu1 %v4035_v54, %s4186_s14 }
 0x3a2   : > { %v2926_v11 = vpop.permute.xlu1 %2925  ;;  %v2802_v49 = vpop.permute.xlu2 %2801 }
 0x3a3   : > { %v3014_v41 = vadd.f32 %v2926_v11, %v2694_v51 }
 0x3a5   : > { %2953 = vrot.lane.b32.xlu0 %v2868_v33, %s4186_s14  ;;  %4036 = vtanh.f32 %v3014_v41  ;;  %2951 = vrot.lane.b32.xlu2 %v2867_v36, %s4186_s14 }
 0x3a6   : > { %3275 = vrot.lane.b32.xlu1 %v3013_v0, %s4188_s17  ;;  %4038 = vtanh.f32 %v3013_v0  ;;  %v2872_v0 = vmul.f32 %v2802_v49, %v5800_v32  ;;  %v6320_v49 = vld [vmem:[#allocation12_spill] sm:$0xff] }
 0x3a7   : > { %4040 = vtanh.f32 %v3015_v9 }
 0x3aa   : > { %v2798_v8 = vpop.permute.xlu0 %2797  ;;  %v2934_v53 = vpop.permute.xlu2 %2933 }
 0x3ab   : > { %v4037_v35 = vpop.eup %4036  ;;  %v2870_v20 = vmul.f32 %v2798_v8, %v5776_v44  ;;  %v3018_v7 = vadd.f32 %v2934_v53, %v2698_v3 }
 0x3ac   : > { %v4039_v45 = vpop.eup %4038 }
 0x3ad   : > { %3117 = vrot.lane.b32.xlu0 %v4037_v35, %s4186_s14  ;;  %3115 = vrot.lane.b32.xlu2 %v4039_v45, %s4186_s14  ;;  %v4041_v5 = vpop.eup %4040  ;;  %v6319_v35 = vld [vmem:[#allocation10_spill] sm:$0xff]  ;;  %v2700_v45 = vmul.f32 %v6320_v49, %v5646_v4  ;;  %v6323_v49 = vld [vmem:[#allocation15_spill] sm:$0xff] }
 0x3ae   : > { %2955 = vrot.lane.b32.xlu1 %v2869_v48, %s4186_s14  ;;  %v2699_v48 = vmul.f32 %v6319_v35, %v5630_v55 }
 0x3b2   : > { %v2800_v46 = vpop.permute.xlu1 %2799  ;;  %v2930_v47 = vpop.permute.xlu0 %2929 }
 0x3b3   : > { %v3016_v29 = vadd.f32 %v2930_v47, %v2696_v62  ;;  %v2871_v38 = vmul.f32 %v2800_v46, %v5788_v21 }
 0x3b5   : > { %3279 = vrot.lane.b32.xlu0 %v3015_v9, %s4188_s17  ;;  %3277 = vrot.lane.b32.xlu2 %v3014_v41, %s4188_s17 }
 0x3b6   : > { %3119 = vrot.lane.b32.xlu1 %v4041_v5, %s4186_s14 }
 0x3ba   : > { %v2932_v24 = vpop.permute.xlu1 %2931  ;;  %v2808_v50 = vpop.permute.xlu2 %2807 }
 0x3bb   : > { %v3017_v54 = vadd.f32 %v2932_v24, %v2697_v23  ;;  %v6321_v23 = vld [vmem:[#allocation11_spill] sm:$0xff] }
 0x3bd   : > { %2959 = vrot.lane.b32.xlu0 %v2871_v38, %s4186_s14  ;;  %4042 = vtanh.f32 %v3017_v54  ;;  %2957 = vrot.lane.b32.xlu2 %v2870_v20, %s4186_s14  ;;  %v2875_v20 = vmul.f32 %v2808_v50, %v5836_v1 }
 0x3be   : > { %3281 = vrot.lane.b32.xlu1 %v3016_v29, %s4188_s17  ;;  %4044 = vtanh.f32 %v3016_v29  ;;  %v2701_v29 = vmul.f32 %v6321_v23, %v5658_v61 }
 0x3bf   : > { %4046 = vtanh.f32 %v3018_v7 }
 0x3c2   : > { %v2804_v11 = vpop.permute.xlu0 %2803  ;;  %v2940_v17 = vpop.permute.xlu2 %2939 }
 0x3c3   : > { %v4043_v51 = vpop.eup %4042  ;;  %v2873_v53 = vmul.f32 %v2804_v11, %v5812_v57  ;;  %v3021_v38 = vadd.f32 %v2940_v17, %v2701_v29  ;;  %v6322_v11 = vld [vmem:[#allocation13_spill] sm:$0xff] }
 0x3c4   : > { %v4045_v33 = vpop.eup %4044  ;;  %v2702_v17 = vmul.f32 %v6322_v11, %v5673_v6 }
 0x3c5   : > { %3123 = vrot.lane.b32.xlu0 %v4043_v51, %s4186_s14  ;;  %3121 = vrot.lane.b32.xlu2 %v4045_v33, %s4186_s14  ;;  %v4047_v41 = vpop.eup %4046 }
 0x3c6   : > { %2961 = vrot.lane.b32.xlu1 %v2872_v0, %s4186_s14 }
 0x3ca   : > { %v2806_v36 = vpop.permute.xlu1 %2805  ;;  %v2936_v40 = vpop.permute.xlu0 %2935 }
 0x3cb   : > { %v3019_v8 = vadd.f32 %v2936_v40, %v2699_v48  ;;  %v2874_v46 = vmul.f32 %v2806_v36, %v5824_v2 }
 0x3cd   : > { %3285 = vrot.lane.b32.xlu0 %v3018_v7, %s4188_s17  ;;  %3283 = vrot.lane.b32.xlu2 %v3017_v54, %s4188_s17 }
 0x3ce   : > { %3125 = vrot.lane.b32.xlu1 %v4047_v41, %s4186_s14  ;;  %v3104_v9 = vpop.permute.xlu2 %3103 }
 0x3d2   : > { %v2938_v5 = vpop.permute.xlu1 %2937 }
 0x3d3   : > { %v3020_v47 = vadd.f32 %v2938_v5, %v2700_v45  ;;  %v2703_v45 = vmul.f32 %v6323_v49, %v5687_v42  ;;  %v3199_v5 = vmul.f32 %v3104_v9, %v5456_v34 }
 0x3d5   : > { %2965 = vrot.lane.b32.xlu0 %v2874_v46, %s4186_s14  ;;  %4048 = vtanh.f32 %v3020_v47  ;;  %2963 = vrot.lane.b32.xlu2 %v2873_v53, %s4186_s14 }
 0x3d6   : > { %3287 = vrot.lane.b32.xlu1 %v3019_v8, %s4188_s17  ;;  %4050 = vtanh.f32 %v3019_v8  ;;  %v3266_v62 = vpop.permute.xlu2 %3265 }
 0x3d7   : > { %3360 = vst.msk [vmem:[%s5953_s20 + $0x8] sm:$0xff] %vm388_vm0, %v3266_v62  ;;  %4052 = vtanh.f32 %v3021_v38 }
 0x3da   : > { %v2810_v18 = vpop.permute.xlu0 %2809 }
 0x3db   : > { %v4049_v24 = vpop.eup %4048  ;;  %v2876_v40 = vmul.f32 %v2810_v18, %v5846_v19 }
 0x3dc   : > { %v4051_v54 = vpop.eup %4050 }
 0x3dd   : > { %3129 = vrot.lane.b32.xlu0 %v4049_v24, %s4186_s14  ;;  %3127 = vrot.lane.b32.xlu2 %v4051_v54, %s4186_s14  ;;  %v4053_v51 = vpop.eup %4052 }
 0x3de   : > { %2967 = vrot.lane.b32.xlu1 %v2875_v20, %s4186_s14  ;;  %v2814_v3 = vpop.permute.xlu2 %2813 }
 0x3df   : > { %v3264_v7 = vpop.permute.xlu1 %3263  ;;  %v2878_v53 = vmul.f32 %v2814_v3, %v5876_v56 }
 0x3e0   : > { %3359 = vst.msk [vmem:[%s5953_s20] sm:$0xff] %vm388_vm0, %v3264_v7  ;;  %v6325_v7 = vld [vmem:[#allocation16_spill] sm:$0xff] }
 0x3e2   : > { %v2942_v50 = vpop.permute.xlu0 %2941 }
 0x3e3   : > { %v3022_v36 = vadd.f32 %v2942_v50, %v2702_v17  ;;  %v6326_v17 = vld [vmem:[#allocation18_spill] sm:$0xff] }
 0x3e5   : > { %3291 = vrot.lane.b32.xlu0 %v3021_v38, %s4188_s17  ;;  %3289 = vrot.lane.b32.xlu2 %v3020_v47, %s4188_s17  ;;  %4054 = vtanh.f32 %v3022_v36  ;;  %v6324_v38 = vld [vmem:[#allocation14_spill] sm:$0xff] }
 0x3e6   : > { %3131 = vrot.lane.b32.xlu1 %v4053_v51, %s4186_s14  ;;  %v2946_v0 = vpop.permute.xlu2 %2945  ;;  %v2704_v34 = vmul.f32 %v6324_v38, %v5699_v10  ;;  %v2705_v51 = vmul.f32 %v6325_v7, %v5711_v59 }
 0x3e7   : > { %v2812_v33 = vpop.permute.xlu1 %2811 }
 0x3e8   : > { %v2877_v41 = vmul.f32 %v2812_v33, %v5863_v22  ;;  %v3024_v9 = vadd.f32 %v2946_v0, %v2704_v34 }
 0x3eb   : > { %v4055_v47 = vpop.eup %4054 }
 0x3ed   : > { %2971 = vrot.lane.b32.xlu0 %v2877_v41, %s4186_s14  ;;  %2969 = vrot.lane.b32.xlu2 %v2876_v40, %s4186_s14 }
 0x3ee   : > { %3293 = vrot.lane.b32.xlu1 %v3022_v36, %s4188_s17  ;;  %v2706_v36 = vmul.f32 %v6326_v17, %v5723_v25 }
 0x3ef   : > { %v3106_v35 = vpop.permute.xlu0 %3105  ;;  %v3110_v48 = vpop.permute.xlu2 %3109 }
 0x3f0   : > { %v2944_v8 = vpop.permute.xlu1 %2943  ;;  %v3200_v20 = vmul.f32 %v3106_v35, %v5470_v26  ;;  %v3202_v35 = vmul.f32 %v3110_v48, %v5495_v43 }
 0x3f1   : > { %v3023_v46 = vadd.f32 %v2944_v8, %v2703_v45 }
 0x3f3   : > { %4056 = vtanh.f32 %v3023_v46 }
 0x3f4   : > { %4058 = vtanh.f32 %v3024_v9 }
 0x3f5   : > { %3423 = vrot.lane.b32.xlu0 %v3199_v5, %s4189_s13  ;;  %3133 = vrot.lane.b32.xlu2 %v4055_v47, %s4186_s14 }
 0x3f6   : > { %2973 = vrot.lane.b32.xlu1 %v2878_v53, %s4186_s14 }
 0x3f7   : > { %v3268_v62 = vpop.permute.xlu0 %3267  ;;  %v3272_v23 = vpop.permute.xlu2 %3271 }
 0x3f8   : > { %3361 = vst.msk [vmem:[%s5953_s20 + $0x10] sm:$0xff] %vm388_vm0, %v3268_v62  ;;  %v3108_v29 = vpop.permute.xlu1 %3107 }
 0x3f9   : > { %3363 = vst.msk [vmem:[%s5953_s20 + $0x20] sm:$0xff] %vm388_vm0, %v3272_v23  ;;  %v4057_v24 = vpop.eup %4056  ;;  %v3201_v0 = vmul.f32 %v3108_v29, %v5482_v16  ;;  %v6328_v29 = vld [vmem:[#allocation19_spill] sm:$0xff] }
 0x3fa   : > { %v4059_v33 = vpop.eup %4058  ;;  %v2708_v38 = vmul.f32 %v6328_v29, %v5752_v60 }
 0x3fd   : > { %3135 = vrot.lane.b32.xlu0 %v4057_v24, %s4186_s14  ;;  %3295 = vrot.lane.b32.xlu2 %v3023_v46, %s4188_s17  ;;  %v6327_v46 = vld [vmem:[#allocation17_spill] sm:$0xff] }
 0x3fe   : > { %3425 = vrot.lane.b32.xlu1 %v3200_v20, %s4189_s13  ;;  %v2707_v5 = vmul.f32 %v6327_v46, %v5740_v30 }
 0x3ff   : > { %v2948_v54 = vpop.permute.xlu0 %2947  ;;  %v2952_v18 = vpop.permute.xlu2 %2951 }
 0x400   : > { %v3270_v3 = vpop.permute.xlu1 %3269  ;;  %v3025_v50 = vadd.f32 %v2948_v54, %v2705_v51  ;;  %v3027_v43 = vadd.f32 %v2952_v18, %v2707_v5  ;;  %v2709_v54 = vmul.f32 %v5620_v28, %v5764_v27  ;;  %v2710_v28 = vmul.f32 %v5610_v52, %v5776_v44 }
 0x401   : > { %3362 = vst.msk [vmem:[%s5953_s20 + $0x18] sm:$0xff] %vm388_vm0, %v3270_v3 }
 0x402   : > { %4060 = vtanh.f32 %v3025_v50 }
 0x405   : > { %3297 = vrot.lane.b32.xlu0 %v3024_v9, %s4188_s17  ;;  %3427 = vrot.lane.b32.xlu2 %v3201_v0, %s4189_s13 }
 0x406   : > { %3137 = vrot.lane.b32.xlu1 %v4059_v33, %s4186_s14 }
 0x407   : > { %v3112_v26 = vpop.permute.xlu0 %3111  ;;  %v3116_v11 = vpop.permute.xlu2 %3115 }
 0x408   : > { %v2950_v41 = vpop.permute.xlu1 %2949  ;;  %v4061_v16 = vpop.eup %4060  ;;  %v3203_v53 = vmul.f32 %v3112_v26, %v5512_v12  ;;  %v3205_v7 = vmul.f32 %v3116_v11, %v5542_v15 }
 0x409   : > { %v3026_v40 = vadd.f32 %v2950_v41, %v2706_v36  ;;  %v6329_v41 = vld [vmem:[#allocation20_spill] sm:$0xff] }
 0x40b   : > { %4062 = vtanh.f32 %v3026_v40 }
 0x40c   : > { %4064 = vtanh.f32 %v3027_v43 }
 0x40d   : > { %3429 = vrot.lane.b32.xlu0 %v3202_v35, %s4189_s13  ;;  %3139 = vrot.lane.b32.xlu2 %v4061_v16, %s4186_s14 }
 0x40e   : > { %3299 = vrot.lane.b32.xlu1 %v3025_v50, %s4188_s17 }
 0x40f   : > { %v3274_v49 = vpop.permute.xlu0 %3273  ;;  %v3278_v45 = vpop.permute.xlu2 %3277 }
 0x410   : > { %3364 = vst.msk [vmem:[%s5953_s20 + $0x28] sm:$0xff] %vm388_vm0, %v3274_v49  ;;  %v3114_v8 = vpop.permute.xlu1 %3113 }
 0x411   : > { %3366 = vst.msk [vmem:[%s5953_s20 + $0x38] sm:$0xff] %vm388_vm0, %v3278_v45  ;;  %v4063_v48 = vpop.eup %4062  ;;  %v3204_v9 = vmul.f32 %v3114_v8, %v5526_v39  ;;  %v6330_v45 = vld [vmem:[#allocation22_spill] sm:$0xff] }
 0x412   : > { %v4065_v24 = vpop.eup %4064  ;;  %v2712_v8 = vmul.f32 %v6330_v45, %v5800_v32 }
 0x415   : > { %3141 = vrot.lane.b32.xlu0 %v4063_v48, %s4186_s14  ;;  %3301 = vrot.lane.b32.xlu2 %v3026_v40, %s4188_s17  ;;  %v2711_v40 = vmul.f32 %v6329_v41, %v5788_v21 }
 0x416   : > { %3431 = vrot.lane.b32.xlu1 %v3203_v53, %s4189_s13 }
 0x417   : > { %v2954_v47 = vpop.permute.xlu0 %2953  ;;  %v2958_v62 = vpop.permute.xlu2 %2957 }
 0x418   : > { %v3276_v23 = vpop.permute.xlu1 %3275  ;;  %v3028_v34 = vadd.f32 %v2954_v47, %v2708_v38  ;;  %v3030_v15 = vadd.f32 %v2958_v62, %v2710_v28  ;;  %v6331_v62 = vld [vmem:[#allocation21_spill] sm:$0xff] }
 0x419   : > { %3365 = vst.msk [vmem:[%s5953_s20 + $0x30] sm:$0xff] %vm388_vm0, %v3276_v23  ;;  %v2713_v23 = vmul.f32 %v6331_v62, %v5812_v57 }
 0x41a   : > { %4066 = vtanh.f32 %v3028_v34 }
 0x41d   : > { %3303 = vrot.lane.b32.xlu0 %v3027_v43, %s4188_s17  ;;  %3433 = vrot.lane.b32.xlu2 %v3204_v9, %s4189_s13 }
 0x41e   : > { %3143 = vrot.lane.b32.xlu1 %v4065_v24, %s4186_s14 }
 0x41f   : > { %v3118_v12 = vpop.permute.xlu0 %3117  ;;  %v3122_v20 = vpop.permute.xlu2 %3121 }
 0x420   : > { %v2956_v18 = vpop.permute.xlu1 %2955  ;;  %v4067_v39 = vpop.eup %4066  ;;  %v3206_v26 = vmul.f32 %v3118_v12, %v5558_v63  ;;  %v3208_v43 = vmul.f32 %v3122_v20, %v5586_v13  ;;  %v6332_v12 = vld [vmem:[#allocation23_spill] sm:$0xff] }
 0x421   : > { %v3029_v3 = vadd.f32 %v2956_v18, %v2709_v54  ;;  %v2714_v20 = vmul.f32 %v6332_v12, %v5824_v2 }
 0x423   : > { %4068 = vtanh.f32 %v3029_v3 }
 0x424   : > { %4070 = vtanh.f32 %v3030_v15 }
 0x425   : > { %3435 = vrot.lane.b32.xlu0 %v3205_v7, %s4189_s13  ;;  %3145 = vrot.lane.b32.xlu2 %v4067_v39, %s4186_s14  ;;  %v6333_v39 = vld [vmem:[#allocation25_spill] sm:$0xff] }
 0x426   : > { %3305 = vrot.lane.b32.xlu1 %v3028_v34, %s4188_s17 }
 0x427   : > { %v3280_v51 = vpop.permute.xlu0 %3279  ;;  %v3284_v50 = vpop.permute.xlu2 %3283 }
 0x428   : > { %3367 = vst.msk [vmem:[%s5953_s20 + $0x40] sm:$0xff] %vm388_vm0, %v3280_v51  ;;  %v3120_v0 = vpop.permute.xlu1 %3119  ;;  %v2715_v51 = vmul.f32 %v6333_v39, %v5836_v1 }
 0x429   : > { %3369 = vst.msk [vmem:[%s5953_s20 + $0x50] sm:$0xff] %vm388_vm0, %v3284_v50  ;;  %v4069_v33 = vpop.eup %4068  ;;  %v3207_v35 = vmul.f32 %v3120_v0, %v5571_v58 }
 0x42a   : > { %v4071_v16 = vpop.eup %4070 }
 0x42d   : > { %3147 = vrot.lane.b32.xlu0 %v4069_v33, %s4186_s14  ;;  %3307 = vrot.lane.b32.xlu2 %v3029_v3, %s4188_s17 }
 0x42e   : > { %3437 = vrot.lane.b32.xlu1 %v3206_v26, %s4189_s13 }
 0x42f   : > { %v2960_v11 = vpop.permute.xlu0 %2959  ;;  %v2964_v17 = vpop.permute.xlu2 %2963 }
 0x430   : > { %v3282_v36 = vpop.permute.xlu1 %3281  ;;  %v3031_v52 = vadd.f32 %v2960_v11, %v2711_v40  ;;  %v3033_v13 = vadd.f32 %v2964_v17, %v2713_v23  ;;  %v6334_v11 = vld [vmem:[#allocation24_spill] sm:$0xff] }
 0x431   : > { %3368 = vst.msk [vmem:[%s5953_s20 + $0x48] sm:$0xff] %vm388_vm0, %v3282_v36  ;;  %v2716_v17 = vmul.f32 %v6334_v11, %v5846_v19 }
 0x432   : > { %4072 = vtanh.f32 %v3031_v52 }
 0x435   : > { %3309 = vrot.lane.b32.xlu0 %v3030_v15, %s4188_s17  ;;  %3439 = vrot.lane.b32.xlu2 %v3207_v35, %s4189_s13 }
 0x436   : > { %3149 = vrot.lane.b32.xlu1 %v4071_v16, %s4186_s14  ;;  %v6335_v16 = vld [vmem:[#allocation26_spill] sm:$0xff] }
 0x437   : > { %v3124_v63 = vpop.permute.xlu0 %3123  ;;  %v3128_v49 = vpop.permute.xlu2 %3127 }
 0x438   : > { %v2962_v46 = vpop.permute.xlu1 %2961  ;;  %v4073_v58 = vpop.eup %4072  ;;  %v3209_v38 = vmul.f32 %v3124_v63, %v5599_v37  ;;  %v3211_v28 = vmul.f32 %v3128_v49, %v5630_v55  ;;  %v2717_v63 = vmul.f32 %v6335_v16, %v5863_v22 }
 0x439   : > { %v3032_v5 = vadd.f32 %v2962_v46, %v2712_v8  ;;  %v2718_v46 = vmul.f32 %v5678_v14, %v5876_v56 }
 0x43b   : > { %4074 = vtanh.f32 %v3032_v5 }
 0x43c   : > { %4076 = vtanh.f32 %v3033_v13 }
 0x43d   : > { %3441 = vrot.lane.b32.xlu0 %v3208_v43, %s4189_s13  ;;  %3151 = vrot.lane.b32.xlu2 %v4073_v58, %s4186_s14 }
 0x43e   : > { %3311 = vrot.lane.b32.xlu1 %v3031_v52, %s4188_s17 }
 0x43f   : > { %v3286_v48 = vpop.permute.xlu0 %3285  ;;  %v3290_v53 = vpop.permute.xlu2 %3289 }
 0x440   : > { %3370 = vst.msk [vmem:[%s5953_s20 + $0x58] sm:$0xff] %vm388_vm0, %v3286_v48  ;;  %v3126_v47 = vpop.permute.xlu1 %3125 }
 0x441   : > { %3372 = vst.msk [vmem:[%s5953_s20 + $0x68] sm:$0xff] %vm388_vm0, %v3290_v53  ;;  %v4075_v29 = vpop.eup %4074  ;;  %v3210_v18 = vmul.f32 %v3126_v47, %v5616_v31 }
 0x442   : > { %v4077_v3 = vpop.eup %4076 }
 0x445   : > { %3153 = vrot.lane.b32.xlu0 %v4075_v29, %s4186_s14  ;;  %3313 = vrot.lane.b32.xlu2 %v3032_v5, %s4188_s17 }
 0x446   : > { %3443 = vrot.lane.b32.xlu1 %v3209_v38, %s4189_s13 }
 0x447   : > { %v2966_v34 = vpop.permute.xlu0 %2965  ;;  %v2970_v9 = vpop.permute.xlu2 %2969 }
 0x448   : > { %v3288_v24 = vpop.permute.xlu1 %3287  ;;  %v3034_v54 = vadd.f32 %v2966_v34, %v2714_v20  ;;  %v3036_v55 = vadd.f32 %v2970_v9, %v2716_v17 }
 0x449   : > { %3371 = vst.msk [vmem:[%s5953_s20 + $0x60] sm:$0xff] %vm388_vm0, %v3288_v24 }
 0x44a   : > { %4078 = vtanh.f32 %v3034_v54 }
 0x44d   : > { %3315 = vrot.lane.b32.xlu0 %v3033_v13, %s4188_s17  ;;  %3445 = vrot.lane.b32.xlu2 %v3210_v18, %s4189_s13 }
 0x44e   : > { %3155 = vrot.lane.b32.xlu1 %v4077_v3, %s4186_s14 }
 0x44f   : > { %v3130_v37 = vpop.permute.xlu0 %3129  ;;  %v3134_v7 = vpop.permute.xlu2 %3133 }
 0x450   : > { %v2968_v50 = vpop.permute.xlu1 %2967  ;;  %v4079_v31 = vpop.eup %4078  ;;  %v3212_v41 = vmul.f32 %v3130_v37, %v5646_v4  ;;  %v3214_v13 = vmul.f32 %v3134_v7, %v5673_v6 }
 0x451   : > { %v3035_v0 = vadd.f32 %v2968_v50, %v2715_v51 }
 0x453   : > { %4080 = vtanh.f32 %v3035_v0 }
 0x454   : > { %4082 = vtanh.f32 %v3036_v55 }
 0x455   : > { %3447 = vrot.lane.b32.xlu0 %v3211_v28, %s4189_s13  ;;  %3157 = vrot.lane.b32.xlu2 %v4079_v31, %s4186_s14 }
 0x456   : > { %3317 = vrot.lane.b32.xlu1 %v3034_v54, %s4188_s17 }
 0x457   : > { %v3292_v15 = vpop.permute.xlu0 %3291  ;;  %v3296_v33 = vpop.permute.xlu2 %3295 }
 0x458   : > { %3373 = vst.msk [vmem:[%s5953_s20 + $0x70] sm:$0xff] %vm388_vm0, %v3292_v15  ;;  %v3132_v26 = vpop.permute.xlu1 %3131 }
 0x459   : > { %3375 = vst.msk [vmem:[%s5953_s20 + $0x80] sm:$0xff] %vm388_vm0, %v3296_v33  ;;  %v4081_v36 = vpop.eup %4080  ;;  %v3213_v49 = vmul.f32 %v3132_v26, %v5658_v61 }
 0x45a   : > { %v4083_v45 = vpop.eup %4082 }
 0x45d   : > { %3159 = vrot.lane.b32.xlu0 %v4081_v36, %s4186_s14  ;;  %3319 = vrot.lane.b32.xlu2 %v3035_v0, %s4188_s17 }
 0x45e   : > { %3449 = vrot.lane.b32.xlu1 %v3212_v41, %s4189_s13 }
 0x45f   : > { %v2972_v40 = vpop.permute.xlu0 %2971  ;;  %v3428_v52 = vpop.permute.xlu2 %3427 }
 0x460   : > { %v3294_v35 = vpop.permute.xlu1 %3293  ;;  %3521 = vst.msk [vmem:[%s6090_s28 + $0x10] sm:$0xff] %vm388_vm0, %v3428_v52  ;;  %v3037_v4 = vadd.f32 %v2972_v40, %v2717_v63 }
 0x461   : > { %3374 = vst.msk [vmem:[%s5953_s20 + $0x78] sm:$0xff] %vm388_vm0, %v3294_v35 }
 0x462   : > { %4084 = vtanh.f32 %v3037_v4 }
 0x465   : > { %3321 = vrot.lane.b32.xlu0 %v3036_v55, %s4188_s17  ;;  %3451 = vrot.lane.b32.xlu2 %v3213_v49, %s4189_s13 }
 0x466   : > { %3161 = vrot.lane.b32.xlu1 %v4083_v45, %s4186_s14 }
 0x467   : > { %v3424_v8 = vpop.permute.xlu0 %3423  ;;  %v3140_v5 = vpop.permute.xlu2 %3139 }
 0x468   : > { %3519 = vst.msk [vmem:[%s6090_s28] sm:$0xff] %vm388_vm0, %v3424_v8  ;;  %v2974_v43 = vpop.permute.xlu1 %2973  ;;  %v4085_v61 = vpop.eup %4084  ;;  %v3217_v9 = vmul.f32 %v3140_v5, %v5711_v59 }
 0x469   : > { %v3038_v58 = vadd.f32 %v2974_v43, %v2718_v46 }
 0x46b   : > { %4086 = vtanh.f32 %v3038_v58 }
 0x46d   : > { %3163 = vrot.lane.b32.xlu2 %v4085_v61, %s4186_s14 }
 0x46e   : > { %3323 = vrot.lane.b32.xlu1 %v3037_v4, %s4188_s17 }
 0x46f   : > { %v3136_v48 = vpop.permute.xlu0 %3135  ;;  %v3302_v53 = vpop.permute.xlu2 %3301 }
 0x470   : > { %v3426_v47 = vpop.permute.xlu1 %3425  ;;  %3378 = vst.msk [vmem:[%s5953_s20 + $0x98] sm:$0xff] %vm388_vm0, %v3302_v53  ;;  %v3215_v14 = vmul.f32 %v3136_v48, %v5687_v42 }
 0x471   : > { %v4087_v62 = vpop.eup %4086  ;;  %3520 = vst.msk [vmem:[%s6090_s28 + $0x8] sm:$0xff] %vm388_vm0, %v3426_v47 }
 0x472   : > { %3165 = vrot.lane.b32.xlu0 %v4087_v62, %s4186_s14  ;;  %s6297_s14 = sshll.u32 %s4248_s25, 8 }
 0x473   : > { %s3585_s11 = scalar_lea.hbm %s6296_s6, %s6297_s14 }
 0x474   : > { %s3588_s10 = sshll.u32 %s3585_s11, 4  ;;  %s3589_s10 = int_to_ptr.hbm [resolvable:$true] %s3588_s10 }
 0x475   : > { %3325 = vrot.lane.b32.xlu2 %v3038_v58, %s4188_s17  ;;  %s4104_s16 = sshra.s32 %s3589_s10, 4  ;;  %s4105_s16 = int_to_ptr.hbm [resolvable:$true] %s4104_s16 }
 0x476   : > { %3455 = vrot.lane.b32.xlu1 %v3215_v14, %s4189_s13  ;;  %s4106_s26 = scalar_lea.hbm %s4105_s16, 256  ;;  %p4111_p0 = scmp.lt.s32.totalorder %s4105_s16, %s6296_s6 }
 0x477   : > { %v3298_v23 = vpop.permute.xlu0 %3297  ;;  %v3434_v29 = vpop.permute.xlu2 %3433  ;;  %p4107_p11 = scmp.ne.s32.totalorder %s4105_s16, %s4106_s26  ;;  %p4112_p1 = scmp.lt.s32.totalorder %s4110_s29, %s4106_s26 }
 0x478   : > { %3376 = vst.msk [vmem:[%s5953_s20 + $0x88] sm:$0xff] %vm388_vm0, %v3298_v23  ;;  %v3138_v38 = vpop.permute.xlu1 %3137 }
 0x479   : > { %3524 = vst.msk [vmem:[%s6090_s28 + $0x28] sm:$0xff] %vm388_vm0, %v3434_v29  ;;  %v3216_v42 = vmul.f32 %v3138_v38, %v5699_v10  ;;  %p4108_p12 = pnand %p4107_p11, %p4265_p5  ;;  %p4113_p2 = por %p4112_p1, %p4111_p0 }
 0x47a   : > { %3453 = vrot.lane.b32.xlu0 %v3214_v13, %s4189_s13 }
 0x47b   : > { %p4109_p13 = pneg %p4108_p12 }
 0x47d   : > { %3457 = vrot.lane.b32.xlu2 %v3216_v42, %s4189_s13  ;;  %p4114_p3 = pnand %p4113_p2, %p4109_p13 }
 0x47f   : > { %v3430_v34 = vpop.permute.xlu0 %3429  ;;  %v3146_v6 = vpop.permute.xlu2 %3145 }
 0x480   : > { %3522 = vst.msk [vmem:[%s6090_s28 + $0x18] sm:$0xff] %vm388_vm0, %v3430_v34  ;;  %v3300_v24 = vpop.permute.xlu1 %3299  ;;  %v3220_v20 = vmul.f32 %v3146_v6, %v5752_v60 }
 0x481   : > { %3377 = vst.msk [vmem:[%s5953_s20 + $0x90] sm:$0xff] %vm388_vm0, %v3300_v24 }
 0x482   : > { %3459 = vrot.lane.b32.xlu0 %v3217_v9, %s4189_s13 }
 0x487   : > { %v3142_v12 = vpop.permute.xlu0 %3141  ;;  %v3308_v54 = vpop.permute.xlu2 %3307 }
 0x488   : > { %v3218_v10 = vmul.f32 %v3142_v12, %v5723_v25  ;;  %v3432_v18 = vpop.permute.xlu1 %3431  ;;  %3381 = vst.msk [vmem:[%s5953_s20 + $0xb0] sm:$0xff] %vm388_vm0, %v3308_v54 }
 0x489   : > { %3523 = vst.msk [vmem:[%s6090_s28 + $0x20] sm:$0xff] %vm388_vm0, %v3432_v18 }
 0x48a   : > { %3461 = vrot.lane.b32.xlu1 %v3218_v10, %s4189_s13  ;;  %3465 = vrot.lane.b32.xlu0 %v3220_v20, %s4189_s13 }
 0x48f   : > { %v3304_v59 = vpop.permute.xlu0 %3303  ;;  %v3440_v3 = vpop.permute.xlu2 %3439 }
 0x490   : > { %3379 = vst.msk [vmem:[%s5953_s20 + $0xa0] sm:$0xff] %vm388_vm0, %v3304_v59  ;;  %v3144_v60 = vpop.permute.xlu1 %3143 }
 0x491   : > { %3527 = vst.msk [vmem:[%s6090_s28 + $0x40] sm:$0xff] %vm388_vm0, %v3440_v3  ;;  %v3219_v25 = vmul.f32 %v3144_v60, %v5740_v30 }
 0x493   : > { %3463 = vrot.lane.b32.xlu2 %v3219_v25, %s4189_s13 }
 0x497   : > { %v3436_v37 = vpop.permute.xlu0 %3435  ;;  %v3152_v7 = vpop.permute.xlu2 %3151 }
 0x498   : > { %3525 = vst.msk [vmem:[%s6090_s28 + $0x30] sm:$0xff] %vm388_vm0, %v3436_v37  ;;  %v3306_v39 = vpop.permute.xlu1 %3305  ;;  %v3223_v51 = vmul.f32 %v3152_v7, %v5788_v21 }
 0x499   : > { %3380 = vst.msk [vmem:[%s5953_s20 + $0xa8] sm:$0xff] %vm388_vm0, %v3306_v39 }
 0x49a   : > { %3471 = vrot.lane.b32.xlu0 %v3223_v51, %s4189_s13 }
 0x49f   : > { %v3148_v50 = vpop.permute.xlu0 %3147  ;;  %v3314_v30 = vpop.permute.xlu2 %3313 }
 0x4a0   : > { %v3221_v0 = vmul.f32 %v3148_v50, %v5764_v27  ;;  %v3438_v28 = vpop.permute.xlu1 %3437  ;;  %3384 = vst.msk [vmem:[%s5953_s20 + $0xc8] sm:$0xff] %vm388_vm0, %v3314_v30 }
 0x4a1   : > { %3526 = vst.msk [vmem:[%s6090_s28 + $0x38] sm:$0xff] %vm388_vm0, %v3438_v28 }
 0x4a2   : > { %3467 = vrot.lane.b32.xlu1 %v3221_v0, %s4189_s13 }
 0x4a7   : > { %v3310_v31 = vpop.permute.xlu0 %3309  ;;  %v3446_v21 = vpop.permute.xlu2 %3445 }
 0x4a8   : > { %3382 = vst.msk [vmem:[%s5953_s20 + $0xb8] sm:$0xff] %vm388_vm0, %v3310_v31  ;;  %v3150_v15 = vpop.permute.xlu1 %3149 }
 0x4a9   : > { %3530 = vst.msk [vmem:[%s6090_s28 + $0x58] sm:$0xff] %vm388_vm0, %v3446_v21  ;;  %v3222_v27 = vmul.f32 %v3150_v15, %v5776_v44 }
 0x4ab   : > { %3469 = vrot.lane.b32.xlu2 %v3222_v27, %s4189_s13 }
 0x4af   : > { %v3442_v33 = vpop.permute.xlu0 %3441  ;;  %v3158_v26 = vpop.permute.xlu2 %3157 }
 0x4b0   : > { %3528 = vst.msk [vmem:[%s6090_s28 + $0x48] sm:$0xff] %vm388_vm0, %v3442_v33  ;;  %v3312_v11 = vpop.permute.xlu1 %3311  ;;  %v3226_v17 = vmul.f32 %v3158_v26, %v5824_v2 }
 0x4b1   : > { %3383 = vst.msk [vmem:[%s5953_s20 + $0xc0] sm:$0xff] %vm388_vm0, %v3312_v11 }
 0x4b2   : > { %3477 = vrot.lane.b32.xlu0 %v3226_v17, %s4189_s13 }
 0x4b7   : > { %v3154_v55 = vpop.permute.xlu0 %3153  ;;  %v3320_v44 = vpop.permute.xlu2 %3319 }
 0x4b8   : > { %v3224_v36 = vmul.f32 %v3154_v55, %v5800_v32  ;;  %v3444_v41 = vpop.permute.xlu1 %3443  ;;  %3387 = vst.msk [vmem:[%s5953_s20 + $0xe0] sm:$0xff] %vm388_vm0, %v3320_v44 }
 0x4b9   : > { %3529 = vst.msk [vmem:[%s6090_s28 + $0x50] sm:$0xff] %vm388_vm0, %v3444_v41 }
 0x4ba   : > { %3473 = vrot.lane.b32.xlu1 %v3224_v36, %s4189_s13 }
 0x4bf   : > { %v3316_v40 = vpop.permute.xlu0 %3315  ;;  %v3452_v2 = vpop.permute.xlu2 %3451 }
 0x4c0   : > { %3385 = vst.msk [vmem:[%s5953_s20 + $0xd0] sm:$0xff] %vm388_vm0, %v3316_v40  ;;  %v3156_v52 = vpop.permute.xlu1 %3155 }
 0x4c1   : > { %3533 = vst.msk [vmem:[%s6090_s28 + $0x70] sm:$0xff] %vm388_vm0, %v3452_v2  ;;  %v3225_v32 = vmul.f32 %v3156_v52, %v5812_v57 }
 0x4c3   : > { %3475 = vrot.lane.b32.xlu2 %v3225_v32, %s4189_s13 }
 0x4c7   : > { %v3448_v35 = vpop.permute.xlu0 %3447  ;;  %v3164_v16 = vpop.permute.xlu2 %3163 }
 0x4c8   : > { %3531 = vst.msk [vmem:[%s6090_s28 + $0x60] sm:$0xff] %vm388_vm0, %v3448_v35  ;;  %v3318_v63 = vpop.permute.xlu1 %3317  ;;  %v3229_v4 = vmul.f32 %v3164_v16, %v5863_v22 }
 0x4c9   : > { %3386 = vst.msk [vmem:[%s5953_s20 + $0xd8] sm:$0xff] %vm388_vm0, %v3318_v63 }
 0x4ca   : > { %3483 = vrot.lane.b32.xlu0 %v3229_v4, %s4189_s13 }
 0x4cf   : > { %v3160_v49 = vpop.permute.xlu0 %3159  ;;  %v3326_v45 = vpop.permute.xlu2 %3325 }
 0x4d0   : > { %v3227_v57 = vmul.f32 %v3160_v49, %v5836_v1  ;;  %v3450_v8 = vpop.permute.xlu1 %3449  ;;  %3390 = vst.msk [vmem:[%s5953_s20 + $0xf8] sm:$0xff] %vm388_vm0, %v3326_v45 }
 0x4d1   : > { %3532 = vst.msk [vmem:[%s6090_s28 + $0x68] sm:$0xff] %vm388_vm0, %v3450_v8 }
 0x4d2   : > { %3479 = vrot.lane.b32.xlu1 %v3227_v57, %s4189_s13 }
 0x4d7   : > { %v3322_v22 = vpop.permute.xlu0 %3321  ;;  %v3458_v46 = vpop.permute.xlu2 %3457 }
 0x4d8   : > { %3388 = vst.msk [vmem:[%s5953_s20 + $0xe8] sm:$0xff] %vm388_vm0, %v3322_v22  ;;  %v3162_v5 = vpop.permute.xlu1 %3161 }
 0x4d9   : > { %3536 = vst.msk [vmem:[%s6090_s28 + $0x88] sm:$0xff] %vm388_vm0, %v3458_v46  ;;  %v3228_v1 = vmul.f32 %v3162_v5, %v5846_v19 }
 0x4db   : > { %3481 = vrot.lane.b32.xlu2 %v3228_v1, %s4189_s13 }
 0x4e0   : > { %v3324_v43 = vpop.permute.xlu1 %3323 }
 0x4e1   : > { %3389 = vst.msk [vmem:[%s5953_s20 + $0xf0] sm:$0xff] %vm388_vm0, %v3324_v43 }
 0x4e2   : > { %4117 = shalt.err (!%p4114_p3)
}
 0x4e3   : > { %s4190_s20 = smov 128   ;;  %s4191_s11 = smov 8  }
 0x4e4   : > { %3910 = dma.vmem_to_hbm [thread:$0]  (%p4265_p5), %s3587_s12, 4096, %s3589_s10, %s3557_s15, %s4190_s20, %s4190_s20, %s4191_s11   ;;  %v3166_v19 = vpop.permute.xlu0 %3165 }
 0x4e5   : > { %v3230_v58 = vmul.f32 %v3166_v19, %v5876_v56  ;;  %s3569_s15 = sshll.u32 %s6090_s28, 4  ;;  %s3552_s26 = scalar_lea.sflag [#allocation4], %s5937_s18  ;;  %s3570_s15 = int_to_ptr.vmem [resolvable:$true] %s3569_s15 }
 0x4e6   : > { %s4138_s9 = scalar_lea.hbm %s6295_s5, 512 }
 0x4e7   : > { %3485 = vrot.lane.b32.xlu1 %v3230_v58, %s4189_s13  ;;  %s6336_s13 = sshll.u32 %s4248_s25, 8 }
 0x4e8   : > { %v3456_v61 = vpop.permute.xlu1 %3455  ;;  %s3568_s10 = scalar_lea.hbm %s6295_s5, %s6336_s13 }
 0x4e9   : > { %3535 = vst.msk [vmem:[%s6090_s28 + $0x80] sm:$0xff] %vm388_vm0, %v3456_v61  ;;  %s3571_s16 = sshll.u32 %s3568_s10, 4  ;;  %s3572_s16 = int_to_ptr.hbm [resolvable:$true] %s3571_s16 }
 0x4ea   : > { %s4132_s17 = sshra.s32 %s3572_s16, 4  ;;  %s4133_s17 = int_to_ptr.hbm [resolvable:$true] %s4132_s17 }
 0x4eb   : > { %s4134_s19 = scalar_lea.hbm %s4133_s17, 256  ;;  %p4139_p9 = scmp.lt.s32.totalorder %s4133_s17, %s6295_s5 }
 0x4ec   : > { %v3454_v48 = vpop.permute.xlu0 %3453  ;;  %p4135_p4 = scmp.ne.s32.totalorder %s4133_s17, %s4134_s19  ;;  %p4140_p10 = scmp.lt.s32.totalorder %s4138_s9, %s4134_s19 }
 0x4ed   : > { %3534 = vst.msk [vmem:[%s6090_s28 + $0x78] sm:$0xff] %vm388_vm0, %v3454_v48  ;;  %v3464_v53 = vpop.permute.xlu2 %3463 }
 0x4ee   : > { %3539 = vst.msk [vmem:[%s6090_s28 + $0xa0] sm:$0xff] %vm388_vm0, %v3464_v53  ;;  %p4136_p7 = pnand %p4135_p4, %p4265_p5  ;;  %p4141_p11 = por %p4140_p10, %p4139_p9 }
 0x4f0   : > { %p4137_p8 = pneg %p4136_p7 }
 0x4f2   : > { %p4142_p12 = pnand %p4141_p11, %p4137_p8 }
 0x4f4   : > { %v3460_v47 = vpop.permute.xlu0 %3459 }
 0x4f5   : > { %3537 = vst.msk [vmem:[%s6090_s28 + $0x90] sm:$0xff] %vm388_vm0, %v3460_v47 }
 0x4fc   : > { %v3466_v56 = vpop.permute.xlu0 %3465  ;;  %v3462_v62 = vpop.permute.xlu1 %3461 }
 0x4fd   : > { %3540 = vst.msk [vmem:[%s6090_s28 + $0xa8] sm:$0xff] %vm388_vm0, %v3466_v56 }
 0x4fe   : > { %3538 = vst.msk [vmem:[%s6090_s28 + $0x98] sm:$0xff] %vm388_vm0, %v3462_v62 }
 0x505   : > { %v3470_v14 = vpop.permute.xlu2 %3469 }
 0x506   : > { %3542 = vst.msk [vmem:[%s6090_s28 + $0xb8] sm:$0xff] %vm388_vm0, %v3470_v14 }
 0x50c   : > { %v3472_v23 = vpop.permute.xlu0 %3471 }
 0x50d   : > { %3543 = vst.msk [vmem:[%s6090_s28 + $0xc0] sm:$0xff] %vm388_vm0, %v3472_v23 }
 0x514   : > { %v3468_v13 = vpop.permute.xlu1 %3467 }
 0x515   : > { %3541 = vst.msk [vmem:[%s6090_s28 + $0xb0] sm:$0xff] %vm388_vm0, %v3468_v13 }
 0x51d   : > { %v3476_v29 = vpop.permute.xlu2 %3475 }
 0x51e   : > { %3545 = vst.msk [vmem:[%s6090_s28 + $0xd0] sm:$0xff] %vm388_vm0, %v3476_v29 }
 0x524   : > { %v3478_v38 = vpop.permute.xlu0 %3477 }
 0x525   : > { %3546 = vst.msk [vmem:[%s6090_s28 + $0xd8] sm:$0xff] %vm388_vm0, %v3478_v38 }
 0x52c   : > { %v3474_v42 = vpop.permute.xlu1 %3473 }
 0x52d   : > { %3544 = vst.msk [vmem:[%s6090_s28 + $0xc8] sm:$0xff] %vm388_vm0, %v3474_v42 }
 0x535   : > { %v3482_v34 = vpop.permute.xlu2 %3481 }
 0x536   : > { %3548 = vst.msk [vmem:[%s6090_s28 + $0xe8] sm:$0xff] %vm388_vm0, %v3482_v34 }
 0x53c   : > { %v3484_v9 = vpop.permute.xlu0 %3483 }
 0x53d   : > { %3549 = vst.msk [vmem:[%s6090_s28 + $0xf0] sm:$0xff] %vm388_vm0, %v3484_v9 }
 0x544   : > { %v3480_v6 = vpop.permute.xlu1 %3479 }
 0x545   : > { %3547 = vst.msk [vmem:[%s6090_s28 + $0xe0] sm:$0xff] %vm388_vm0, %v3480_v6 }
 0x559   : > { %v3486_v24 = vpop.permute.xlu1 %3485 }
 0x55a   : > { %3550 = vst.msk [vmem:[%s6090_s28 + $0xf8] sm:$0xff] %vm388_vm0, %v3486_v24 }
 0x55b   : > { %4145 = shalt.err (!%p4142_p12)
}
 0x55c   : > { %3909 = dma.vmem_to_hbm [thread:$0]  (%p4265_p5), %s3570_s15, 4096, %s3572_s16, %s3552_s26, %s4190_s20, %s4190_s20, %s4191_s11  }
 0x55d PF: > { %p3920_p13 = scmp.ge.s32.totalorder %s4184_s24, 2  ;;  %s3603_s18 = sand.u32 1, %s4172_s21  }
 0x55e   : > { %s3604_s28 = scalar_lea.sflag [#allocation4], %s3603_s18 }
 0x55f   : > { %p3914_p0 = pnand %p3920_p13, %p4269_p6 }
 0x561   : > { %p3915_p1 = pneg %p3914_p0 }
 0x563   : > { %4163 = dma.done.wait (%p3915_p1), %s3604_s28, 4096  }
 0x564   : > { %4165 = vsyncadd (%p3915_p1), %s3604_s28, 4294963200  ;;  %s3614_s12 = scalar_lea.sflag [#allocation6], %s3603_s18 }
 0x565   : > { %4167 = dma.done.wait (%p3915_p1), %s3614_s12, 4096  }
 0x566   : > { %4169 = vsyncadd (%p3915_p1), %s3614_s12, 4294963200  ;;  %p20_p5 = scmp.ge.s32.totalorder %s4252_s27, 4   ;;  %s6337_s21 = smov %s4176_s22 }
 0x567   : > { %s6338_s22 = smov %s4180_s23  ;;  %s6339_s23 = smov %s4263_s30 }
 0x568   : > { %s6340_s24 = smov %s4252_s27  ;;  %22 = sbr.rel (!%p20_p5) target bundleno = 5 (0x5), region = 108 }
 0x56d   :  { %3620 = vsyncpa [#allocation4], 1 }
 0x56e   :  { %3622 = vsyncpa [#allocation4 + $0x1], 1 }
 0x56f   :  { %3623 = vsyncpa [#allocation6], 1 }
 0x570   :  { %3625 = vsyncpa [#allocation6 + $0x1], 1 }

</bundles_post_ra>
